<compile_context>
chip_gen: v5e
topology: v5e:2x2
jax: 0.10.0
libtpu: 0.0.40
codegen_flags: <defaults>
</compile_context>

<pallas_src>
import math

import jax
import jax.numpy as jnp
from jax.experimental import pallas as pl
from jax.experimental.pallas import tpu as pltpu


def _round_up(x, m):
    return ((x + m - 1) // m) * m


def _vmem_limit_bytes(SR, R, CinP, CP):
    weights = (9 * CinP * CP + CP * 4 * CP + 4 * CP * 32) * 2 + (CP + 4 * CP + 32) * 4
    x_buf = 2 * SR * CinP * 2            # double-buffered bf16 input stripe
    out_buf = 2 * R * 32 * 4             # double-buffered f32 output tile
    interm = R * CP * 4 * 3 + R * CP * 2 + R * 4 * CP * (4 + 2) + R * 32 * 4 * 2
    est = 2 * weights + x_buf + out_buf + interm
    return int(min(max(2 * est, 32 << 20), 56 << 20))


def _make_fused_kernel(R, WP, CinP, CP):
    """conv3x3+BN+ReLU -> deconv1(2x2,s2)+BN+ReLU -> deconv2(2x2,s2)+sigmoid, fused."""

    def kernel(x_ref, wc_ref, bc_ref, w1_ref, b1_ref, w2_ref, b2_ref, o_ref):
        # x_ref : (SR, CinP)   bf16  flattened padded-row stripe (row halo included)
        # wc_ref: (9*CinP, CP) bf16  3x3 conv weights, tap-major, BN scale folded
        # w1_ref: (CP, 4*CP)   bf16  deconv1 weights, BN folded; cols = (dh,dw)*CP + cout
        # w2_ref: (4*CP, 32)   bf16  deconv2 weights; cols = (d, di, dj, map)
        # biases f32; o_ref: (R, 32) f32
        acc = jnp.zeros((R, CP), jnp.float32)
        for t in range(9):                       # unrolled 9-tap accumulation, no im2col
            kh, kw = divmod(t, 3)
            d = kh * WP + kw                     # static flat shift for this tap
            acc = acc + jnp.dot(
                x_ref[d:d + R, :],
                wc_ref[t * CinP:(t + 1) * CinP, :],
                preferred_element_type=jnp.float32)
        # conv epilogue: bias (BN folded) + ReLU
        feat = jnp.maximum(acc + bc_ref[...], 0.0).astype(jnp.bfloat16)
        # deconv1 (2x2 stride 2) is a per-pixel matmul onto 4 fine pixels; + BN + ReLU
        y = jnp.dot(feat, w1_ref[...], preferred_element_type=jnp.float32)
        y = jnp.maximum(y + b1_ref[...], 0.0).astype(jnp.bfloat16)
        # deconv2 (2x2 stride 2, 1 channel per branch) + bias + sigmoid
        z = jnp.dot(y, w2_ref[...], preferred_element_type=jnp.float32) + b2_ref[...]
        s = pl.reciprocal(1.0 + jnp.exp(-z), approx=True)   # exp & recip on the EUP slot
        o_ref[...] = jnp.clip(s, 0.0, 1.0)

    return kernel


def dbhead_forward(params, x, *, tile_h=16):
    """x: (N, C, H, W) float32 -> (N, 2, 4H, 4W) float32 (eval mode)."""
    N, C, H, W = x.shape
    CP = params["w_conv"].shape[1]
    CinP = params["w_conv"].shape[0] // 9

    TH = min(tile_h, H)                       # coarse rows per grid step
    HT = -(-H // TH)                          # row tiles per image
    Hp = HT * TH
    WP = _round_up(W + 2, 8)                  # padded row pitch (sublane aligned taps)
    R = TH * WP                               # output rows per tile (cols >= W dropped)
    SR = (TH + 2) * WP + 16                   # stripe rows incl. halo + tap-slice slack

    # NCHW -> NHWC bf16, zero pad: 1px conv halo, pitch pad, channel pad to CinP.
    xh = jnp.transpose(x, (0, 2, 3, 1)).astype(jnp.bfloat16)
    xp = jnp.pad(xh, ((0, 0), (1, Hp + 1 - H), (1, WP - 1 - W), (0, CinP - C)))
    # Overlapping row stripes (1 halo row above/below), flattened to (SR, CinP).
    rid = jnp.arange(HT)[:, None] * TH + jnp.arange(TH + 2)[None, :]
    xs = xp[:, rid]                                           # (N, HT, TH+2, WP, CinP)
    xs = xs.reshape(N, HT, (TH + 2) * WP, CinP)
    xs = jnp.pad(xs, ((0, 0), (0, 0), (0, SR - (TH + 2) * WP), (0, 0)))

    kernel = _make_fused_kernel(R, WP, CinP, CP)

    out = pl.pallas_call(
        kernel,
        out_shape=jax.ShapeDtypeStruct((N, HT, R, 32), jnp.float32),
        grid=(N, HT),
        in_specs=[
            pl.BlockSpec((None, None, SR, CinP), lambda n, t: (n, t, 0, 0)),
            pl.BlockSpec((9 * CinP, CP), lambda n, t: (0, 0)),
            pl.BlockSpec((1, CP), lambda n, t: (0, 0)),
            pl.BlockSpec((CP, 4 * CP), lambda n, t: (0, 0)),
            pl.BlockSpec((1, 4 * CP), lambda n, t: (0, 0)),
            pl.BlockSpec((4 * CP, 32), lambda n, t: (0, 0)),
            pl.BlockSpec((1, 32), lambda n, t: (0, 0)),
        ],
        out_specs=pl.BlockSpec((None, None, R, 32), lambda n, t: (n, t, 0, 0)),
        compiler_params=pltpu.CompilerParams(
            dimension_semantics=("parallel", "parallel"),
            vmem_limit_bytes=_vmem_limit_bytes(SR, R, CinP, CP)),
    )(xs, params["w_conv"], params["b_conv"],
      params["w_dc1"], params["b_dc1"],
      params["w_dc2"], params["b_dc2"])

    # pixel un-shuffle: rows (n, ht, th, w) x cols (dh, dw, di, dj, map) -> NCHW;
    # drop the pitch/halo junk columns (w >= W) and padded coarse rows (>= H).
    z = out.reshape(N, HT, TH, WP, 2, 2, 2, 2, 2)[:, :, :, :W]
    y = jnp.transpose(z, (0, 8, 1, 2, 4, 6, 3, 5, 7)).reshape(N, 2, 4 * Hp, 4 * W)
    return y[:, :, :4 * H, :]


def make_dbhead_params(key, in_channels):
    """PyTorch-style inits; binarize|thresh branches fused channel-wise (block-diagonal
    weights); eval-mode BatchNorm (identity running stats) folded; bf16 matmul weights."""
    C = in_channels
    C4 = C // 4
    F = 2 * C4                                    # fused (binarize | thresh) channels
    CP = _round_up(max(F, 128), 128)              # lane-dense fused channel count
    CinP = _round_up(max(C, 128), 128)            # lane-dense input channel count
    eps = 1e-5
    s_bn = 1.0 / math.sqrt(1.0 + eps)             # gamma=1, beta=0, mean=0, var=1

    ks = jax.random.split(key, 11)

    def kaiming_normal(k, shape, fan_in):
        return jax.random.normal(k, shape, jnp.float32) * math.sqrt(2.0 / fan_in)

    def uniform(k, shape, bound):
        return jax.random.uniform(k, shape, jnp.float32, -bound, bound)

    # stage 1: Conv2d(C, C4, 3, pad=1); binarize has bias, thresh bias=False
    fan_c = 9 * C
    wb = kaiming_normal(ks[0], (C4, C, 3, 3), fan_c)            # OIHW
    bb = uniform(ks[1], (C4,), 1.0 / math.sqrt(fan_c))
    wt = kaiming_normal(ks[2], (C4, C, 3, 3), fan_c)
    w_conv = jnp.zeros((3, 3, CinP, CP), jnp.float32)
    w_conv = w_conv.at[:, :, :C, :C4].set(jnp.transpose(wb, (2, 3, 1, 0)) * s_bn)
    w_conv = w_conv.at[:, :, :C, C4:F].set(jnp.transpose(wt, (2, 3, 1, 0)) * s_bn)
    w_conv = w_conv.reshape(9 * CinP, CP).astype(jnp.bfloat16)
    b_conv = jnp.zeros((1, CP), jnp.float32).at[0, :C4].set(bb * s_bn)

    # stage 2: ConvTranspose2d(C4, C4, 2, 2) per branch (+ folded BN)
    bd1 = 1.0 / math.sqrt(4 * C4)
    wbd1 = uniform(ks[3], (C4, C4, 2, 2), bd1)                  # (Cin, Cout, kh, kw)
    bbd1 = uniform(ks[4], (C4,), bd1)
    wtd1 = uniform(ks[5], (C4, C4, 2, 2), bd1)
    btd1 = uniform(ks[6], (C4,), bd1)
    w_dc1 = jnp.zeros((CP, 2, 2, CP), jnp.float32)              # (cin, dh, dw, cout)
    w_dc1 = w_dc1.at[:C4, :, :, :C4].set(jnp.transpose(wbd1, (0, 2, 3, 1)) * s_bn)
    w_dc1 = w_dc1.at[C4:F, :, :, C4:F].set(jnp.transpose(wtd1, (0, 2, 3, 1)) * s_bn)
    w_dc1 = w_dc1.reshape(CP, 4 * CP).astype(jnp.bfloat16)      # cols = d*CP + cout
    b1f = (jnp.zeros((CP,), jnp.float32)
           .at[:C4].set(bbd1 * s_bn).at[C4:F].set(btd1 * s_bn))
    b_dc1 = jnp.tile(b1f, 4).reshape(1, 4 * CP)

    # stage 3: ConvTranspose2d(C4, 1, 2, 2) per branch + sigmoid
    bd2 = 1.0 / math.sqrt(4 * 1)
    wbd2 = uniform(ks[7], (C4, 1, 2, 2), bd2)
    bbd2 = uniform(ks[8], (1,), bd2)
    wtd2 = uniform(ks[9], (C4, 1, 2, 2), bd2)
    btd2 = uniform(ks[10], (1,), bd2)
    # rows = (d, cin), block diagonal over d; cols = (d, di, dj, map); map 0=shrink 1=thresh
    w_dc2 = jnp.zeros((4, CP, 4, 2, 2, 2), jnp.float32)
    for d in range(4):
        w_dc2 = w_dc2.at[d, :C4, d, :, :, 0].set(wbd2[:, 0, :, :])
        w_dc2 = w_dc2.at[d, C4:F, d, :, :, 1].set(wtd2[:, 0, :, :])
    w_dc2 = w_dc2.reshape(4 * CP, 32).astype(jnp.bfloat16)
    b_dc2 = jnp.tile(jnp.concatenate([bbd2, btd2]), 16).reshape(1, 32)

    return dict(w_conv=w_conv, b_conv=b_conv,
                w_dc1=w_dc1, b_dc1=b_dc1,
                w_dc2=w_dc2, b_dc2=b_dc2)


if __name__ == "__main__":
    key = jax.random.PRNGKey(0)
    k_params, k_x = jax.random.split(key)

    in_channels = 32                  # real DBNet uses 256; 32 keeps the demo small
    N, H, W = 2, 16, 16
    x = jax.random.normal(k_x, (N, in_channels, H, W), jnp.float32)

    params = make_dbhead_params(k_params, in_channels)
    fwd = jax.jit(dbhead_forward, static_argnames=("tile_h",))
    out = fwd(params, x, tile_h=8)    # tile_h=8 -> 2 row tiles per image in the demo
    jax.block_until_ready(out)

    assert out.shape == (N, 2, 4 * H, 4 * W), out.shape
    assert bool(jnp.all(jnp.isfinite(out))), "non-finite output"
    assert bool(jnp.all((out >= 0.0) & (out <= 1.0))), "sigmoid range violated"
    print("KERNEL_OK")
</pallas_src>

<mosaic_0001>
module attributes {stable_mosaic.version = 11 : i64} {
  func.func @kernel(%arg0: i32, %arg1: i32, %arg2: memref<1x1x256x128xbf16, #tpu.memory_space<vmem>>, %arg3: memref<1152x128xbf16, #tpu.memory_space<vmem>>, %arg4: memref<1x128xf32, #tpu.memory_space<vmem>>, %arg5: memref<128x512xbf16, #tpu.memory_space<vmem>>, %arg6: memref<1x512xf32, #tpu.memory_space<vmem>>, %arg7: memref<512x32xbf16, #tpu.memory_space<vmem>>, %arg8: memref<1x32xf32, #tpu.memory_space<vmem>>, %arg9: memref<1x1x192x32xf32, #tpu.memory_space<vmem>>) attributes {dimension_semantics = [#tpu.dimension_semantics<parallel>, #tpu.dimension_semantics<parallel>], iteration_bounds = array<i64: 2, 2>, scalar_prefetch = 0 : i64, scratch_operands = 0 : i64, tpu.core_type = #tpu.core_type<tc>, window_params = [{transform_indices = @transform_0, window_bounds = array<i64: 1, 1, 256, 128>}, {pipeline_mode = #tpu.pipeline_mode<synchronous>, transform_indices = @transform_1, window_bounds = array<i64: 1152, 128>}, {pipeline_mode = #tpu.pipeline_mode<synchronous>, transform_indices = @transform_2, window_bounds = array<i64: 1, 128>}, {pipeline_mode = #tpu.pipeline_mode<synchronous>, transform_indices = @transform_3, window_bounds = array<i64: 128, 512>}, {pipeline_mode = #tpu.pipeline_mode<synchronous>, transform_indices = @transform_4, window_bounds = array<i64: 1, 512>}, {pipeline_mode = #tpu.pipeline_mode<synchronous>, transform_indices = @transform_5, window_bounds = array<i64: 512, 32>}, {pipeline_mode = #tpu.pipeline_mode<synchronous>, transform_indices = @transform_6, window_bounds = array<i64: 1, 32>}, {transform_indices = @transform_7, window_bounds = array<i64: 1, 1, 192, 32>}]} {
    %cst = arith.constant 0.000000e+00 : f32
    %0 = vector.broadcast %cst : f32 to vector<192x128xf32>
    %c0 = arith.constant 0 : index
    %c0_0 = arith.constant 0 : index
    %c0_1 = arith.constant 0 : index
    %c0_2 = arith.constant 0 : index
    %1 = vector.load %arg2[%c0, %c0_0, %c0_1, %c0_2] : memref<1x1x256x128xbf16, #tpu.memory_space<vmem>>, vector<1x1x192x128xbf16>
    %2 = vector.shape_cast %1 : vector<1x1x192x128xbf16> to vector<192x128xbf16>
    %c0_3 = arith.constant 0 : index
    %c0_4 = arith.constant 0 : index
    %3 = vector.load %arg3[%c0_3, %c0_4] : memref<1152x128xbf16, #tpu.memory_space<vmem>>, vector<128x128xbf16>
    %cst_5 = arith.constant dense<0.000000e+00> : vector<192x128xf32>
    %4 = tpu.matmul %2, %3, %cst_5 {dimension_numbers = #tpu.dot_dimension_numbers<[1], [0], [0], [1], [0, 0, 1, 1], [], []>} : vector<192x128xbf16>, vector<128x128xbf16>, vector<192x128xf32> -> vector<192x128xf32>
    %5 = arith.addf %0, %4 : vector<192x128xf32>
    %c0_6 = arith.constant 0 : index
    %c0_7 = arith.constant 0 : index
    %c1 = arith.constant 1 : index
    %c0_8 = arith.constant 0 : index
    %6 = vector.load %arg2[%c0_6, %c0_7, %c1, %c0_8] : memref<1x1x256x128xbf16, #tpu.memory_space<vmem>>, vector<1x1x192x128xbf16>
    %7 = vector.shape_cast %6 : vector<1x1x192x128xbf16> to vector<192x128xbf16>
    %c128 = arith.constant 128 : index
    %c0_9 = arith.constant 0 : index
    %8 = vector.load %arg3[%c128, %c0_9] : memref<1152x128xbf16, #tpu.memory_space<vmem>>, vector<128x128xbf16>
    %cst_10 = arith.constant dense<0.000000e+00> : vector<192x128xf32>
    %9 = tpu.matmul %7, %8, %cst_10 {dimension_numbers = #tpu.dot_dimension_numbers<[1], [0], [0], [1], [0, 0, 1, 1], [], []>} : vector<192x128xbf16>, vector<128x128xbf16>, vector<192x128xf32> -> vector<192x128xf32>
    %10 = arith.addf %5, %9 : vector<192x128xf32>
    %c0_11 = arith.constant 0 : index
    %c0_12 = arith.constant 0 : index
    %c2 = arith.constant 2 : index
    %c0_13 = arith.constant 0 : index
    %11 = vector.load %arg2[%c0_11, %c0_12, %c2, %c0_13] : memref<1x1x256x128xbf16, #tpu.memory_space<vmem>>, vector<1x1x192x128xbf16>
    %12 = vector.shape_cast %11 : vector<1x1x192x128xbf16> to vector<192x128xbf16>
    %c256 = arith.constant 256 : index
    %c0_14 = arith.constant 0 : index
    %13 = vector.load %arg3[%c256, %c0_14] : memref<1152x128xbf16, #tpu.memory_space<vmem>>, vector<128x128xbf16>
    %cst_15 = arith.constant dense<0.000000e+00> : vector<192x128xf32>
    %14 = tpu.matmul %12, %13, %cst_15 {dimension_numbers = #tpu.dot_dimension_numbers<[1], [0], [0], [1], [0, 0, 1, 1], [], []>} : vector<192x128xbf16>, vector<128x128xbf16>, vector<192x128xf32> -> vector<192x128xf32>
    %15 = arith.addf %10, %14 : vector<192x128xf32>
    %c0_16 = arith.constant 0 : index
    %c0_17 = arith.constant 0 : index
    %c24 = arith.constant 24 : index
    %c0_18 = arith.constant 0 : index
    %16 = vector.load %arg2[%c0_16, %c0_17, %c24, %c0_18] : memref<1x1x256x128xbf16, #tpu.memory_space<vmem>>, vector<1x1x192x128xbf16>
    %17 = vector.shape_cast %16 : vector<1x1x192x128xbf16> to vector<192x128xbf16>
    %c384 = arith.constant 384 : index
    %c0_19 = arith.constant 0 : index
    %18 = vector.load %arg3[%c384, %c0_19] : memref<1152x128xbf16, #tpu.memory_space<vmem>>, vector<128x128xbf16>
    %cst_20 = arith.constant dense<0.000000e+00> : vector<192x128xf32>
    %19 = tpu.matmul %17, %18, %cst_20 {dimension_numbers = #tpu.dot_dimension_numbers<[1], [0], [0], [1], [0, 0, 1, 1], [], []>} : vector<192x128xbf16>, vector<128x128xbf16>, vector<192x128xf32> -> vector<192x128xf32>
    %20 = arith.addf %15, %19 : vector<192x128xf32>
    %c0_21 = arith.constant 0 : index
    %c0_22 = arith.constant 0 : index
    %c25 = arith.constant 25 : index
    %c0_23 = arith.constant 0 : index
    %21 = vector.load %arg2[%c0_21, %c0_22, %c25, %c0_23] : memref<1x1x256x128xbf16, #tpu.memory_space<vmem>>, vector<1x1x192x128xbf16>
    %22 = vector.shape_cast %21 : vector<1x1x192x128xbf16> to vector<192x128xbf16>
    %c512 = arith.constant 512 : index
    %c0_24 = arith.constant 0 : index
    %23 = vector.load %arg3[%c512, %c0_24] : memref<1152x128xbf16, #tpu.memory_space<vmem>>, vector<128x128xbf16>
    %cst_25 = arith.constant dense<0.000000e+00> : vector<192x128xf32>
    %24 = tpu.matmul %22, %23, %cst_25 {dimension_numbers = #tpu.dot_dimension_numbers<[1], [0], [0], [1], [0, 0, 1, 1], [], []>} : vector<192x128xbf16>, vector<128x128xbf16>, vector<192x128xf32> -> vector<192x128xf32>
    %25 = arith.addf %20, %24 : vector<192x128xf32>
    %c0_26 = arith.constant 0 : index
    %c0_27 = arith.constant 0 : index
    %c26 = arith.constant 26 : index
    %c0_28 = arith.constant 0 : index
    %26 = vector.load %arg2[%c0_26, %c0_27, %c26, %c0_28] : memref<1x1x256x128xbf16, #tpu.memory_space<vmem>>, vector<1x1x192x128xbf16>
    %27 = vector.shape_cast %26 : vector<1x1x192x128xbf16> to vector<192x128xbf16>
    %c640 = arith.constant 640 : index
    %c0_29 = arith.constant 0 : index
    %28 = vector.load %arg3[%c640, %c0_29] : memref<1152x128xbf16, #tpu.memory_space<vmem>>, vector<128x128xbf16>
    %cst_30 = arith.constant dense<0.000000e+00> : vector<192x128xf32>
    %29 = tpu.matmul %27, %28, %cst_30 {dimension_numbers = #tpu.dot_dimension_numbers<[1], [0], [0], [1], [0, 0, 1, 1], [], []>} : vector<192x128xbf16>, vector<128x128xbf16>, vector<192x128xf32> -> vector<192x128xf32>
    %30 = arith.addf %25, %29 : vector<192x128xf32>
    %c0_31 = arith.constant 0 : index
    %c0_32 = arith.constant 0 : index
    %c48 = arith.constant 48 : index
    %c0_33 = arith.constant 0 : index
    %31 = vector.load %arg2[%c0_31, %c0_32, %c48, %c0_33] : memref<1x1x256x128xbf16, #tpu.memory_space<vmem>>, vector<1x1x192x128xbf16>
    %32 = vector.shape_cast %31 : vector<1x1x192x128xbf16> to vector<192x128xbf16>
    %c768 = arith.constant 768 : index
    %c0_34 = arith.constant 0 : index
    %33 = vector.load %arg3[%c768, %c0_34] : memref<1152x128xbf16, #tpu.memory_space<vmem>>, vector<128x128xbf16>
    %cst_35 = arith.constant dense<0.000000e+00> : vector<192x128xf32>
    %34 = tpu.matmul %32, %33, %cst_35 {dimension_numbers = #tpu.dot_dimension_numbers<[1], [0], [0], [1], [0, 0, 1, 1], [], []>} : vector<192x128xbf16>, vector<128x128xbf16>, vector<192x128xf32> -> vector<192x128xf32>
    %35 = arith.addf %30, %34 : vector<192x128xf32>
    %c0_36 = arith.constant 0 : index
    %c0_37 = arith.constant 0 : index
    %c49 = arith.constant 49 : index
    %c0_38 = arith.constant 0 : index
    %36 = vector.load %arg2[%c0_36, %c0_37, %c49, %c0_38] : memref<1x1x256x128xbf16, #tpu.memory_space<vmem>>, vector<1x1x192x128xbf16>
    %37 = vector.shape_cast %36 : vector<1x1x192x128xbf16> to vector<192x128xbf16>
    %c896 = arith.constant 896 : index
    %c0_39 = arith.constant 0 : index
    %38 = vector.load %arg3[%c896, %c0_39] : memref<1152x128xbf16, #tpu.memory_space<vmem>>, vector<128x128xbf16>
    %cst_40 = arith.constant dense<0.000000e+00> : vector<192x128xf32>
    %39 = tpu.matmul %37, %38, %cst_40 {dimension_numbers = #tpu.dot_dimension_numbers<[1], [0], [0], [1], [0, 0, 1, 1], [], []>} : vector<192x128xbf16>, vector<128x128xbf16>, vector<192x128xf32> -> vector<192x128xf32>
    %40 = arith.addf %35, %39 : vector<192x128xf32>
    %c0_41 = arith.constant 0 : index
    %c0_42 = arith.constant 0 : index
    %c50 = arith.constant 50 : index
    %c0_43 = arith.constant 0 : index
    %41 = vector.load %arg2[%c0_41, %c0_42, %c50, %c0_43] : memref<1x1x256x128xbf16, #tpu.memory_space<vmem>>, vector<1x1x192x128xbf16>
    %42 = vector.shape_cast %41 : vector<1x1x192x128xbf16> to vector<192x128xbf16>
    %c1024 = arith.constant 1024 : index
    %c0_44 = arith.constant 0 : index
    %43 = vector.load %arg3[%c1024, %c0_44] : memref<1152x128xbf16, #tpu.memory_space<vmem>>, vector<128x128xbf16>
    %cst_45 = arith.constant dense<0.000000e+00> : vector<192x128xf32>
    %44 = tpu.matmul %42, %43, %cst_45 {dimension_numbers = #tpu.dot_dimension_numbers<[1], [0], [0], [1], [0, 0, 1, 1], [], []>} : vector<192x128xbf16>, vector<128x128xbf16>, vector<192x128xf32> -> vector<192x128xf32>
    %45 = arith.addf %40, %44 : vector<192x128xf32>
    %c0_46 = arith.constant 0 : index
    %c0_47 = arith.constant 0 : index
    %46 = vector.load %arg4[%c0_46, %c0_47] : memref<1x128xf32, #tpu.memory_space<vmem>>, vector<1x128xf32>
    %47 = vector.broadcast %46 : vector<1x128xf32> to vector<192x128xf32>
    %48 = arith.addf %45, %47 : vector<192x128xf32>
    %cst_48 = arith.constant 0.000000e+00 : f32
    %49 = vector.broadcast %cst_48 : f32 to vector<192x128xf32>
    %50 = arith.maximumf %48, %49 : vector<192x128xf32>
    %51 = arith.truncf %50 : vector<192x128xf32> to vector<192x128xbf16>
    %c0_49 = arith.constant 0 : index
    %c0_50 = arith.constant 0 : index
    %52 = vector.load %arg5[%c0_49, %c0_50] : memref<128x512xbf16, #tpu.memory_space<vmem>>, vector<128x512xbf16>
    %cst_51 = arith.constant dense<0.000000e+00> : vector<192x512xf32>
    %53 = tpu.matmul %51, %52, %cst_51 {dimension_numbers = #tpu.dot_dimension_numbers<[1], [0], [0], [1], [0, 0, 1, 1], [], []>} : vector<192x128xbf16>, vector<128x512xbf16>, vector<192x512xf32> -> vector<192x512xf32>
    %c0_52 = arith.constant 0 : index
    %c0_53 = arith.constant 0 : index
    %54 = vector.load %arg6[%c0_52, %c0_53] : memref<1x512xf32, #tpu.memory_space<vmem>>, vector<1x512xf32>
    %55 = vector.broadcast %54 : vector<1x512xf32> to vector<192x512xf32>
    %56 = arith.addf %53, %55 : vector<192x512xf32>
    %cst_54 = arith.constant 0.000000e+00 : f32
    %57 = vector.broadcast %cst_54 : f32 to vector<192x512xf32>
    %58 = arith.maximumf %56, %57 : vector<192x512xf32>
    %59 = arith.truncf %58 : vector<192x512xf32> to vector<192x512xbf16>
    %c0_55 = arith.constant 0 : index
    %c0_56 = arith.constant 0 : index
    %60 = vector.load %arg7[%c0_55, %c0_56] : memref<512x32xbf16, #tpu.memory_space<vmem>>, vector<512x32xbf16>
    %cst_57 = arith.constant dense<0.000000e+00> : vector<192x32xf32>
    %61 = tpu.matmul %59, %60, %cst_57 {dimension_numbers = #tpu.dot_dimension_numbers<[1], [0], [0], [1], [0, 0, 1, 1], [], []>} : vector<192x512xbf16>, vector<512x32xbf16>, vector<192x32xf32> -> vector<192x32xf32>
    %c0_58 = arith.constant 0 : index
    %c0_59 = arith.constant 0 : index
    %62 = vector.load %arg8[%c0_58, %c0_59] : memref<1x32xf32, #tpu.memory_space<vmem>>, vector<1x32xf32>
    %63 = vector.broadcast %62 : vector<1x32xf32> to vector<192x32xf32>
    %64 = arith.addf %61, %63 : vector<192x32xf32>
    %cst_60 = arith.constant 0.000000e+00 : f32
    %65 = vector.broadcast %cst_60 : f32 to vector<192x32xf32>
    %66 = arith.subf %65, %64 : vector<192x32xf32>
    %67 = math.exp %66 : vector<192x32xf32>
    %cst_61 = arith.constant 1.000000e+00 : f32
    %68 = vector.broadcast %cst_61 : f32 to vector<192x32xf32>
    %69 = arith.addf %68, %67 : vector<192x32xf32>
    %70 = tpu.reciprocal %69 {approx = true} : vector<192x32xf32> -> vector<192x32xf32>
    %cst_62 = arith.constant 0.000000e+00 : f32
    %cst_63 = arith.constant 1.000000e+00 : f32
    %71 = vector.broadcast %cst_62 : f32 to vector<192x32xf32>
    %72 = arith.maximumf %71, %70 : vector<192x32xf32>
    %73 = vector.broadcast %cst_63 : f32 to vector<192x32xf32>
    %74 = arith.minimumf %73, %72 : vector<192x32xf32>
    %c0_64 = arith.constant 0 : index
    %c0_65 = arith.constant 0 : index
    %c0_66 = arith.constant 0 : index
    %c0_67 = arith.constant 0 : index
    %75 = vector.load %arg9[%c0_64, %c0_65, %c0_66, %c0_67] : memref<1x1x192x32xf32, #tpu.memory_space<vmem>>, vector<1x1x192x32xf32>
    %76 = vector.shape_cast %75 : vector<1x1x192x32xf32> to vector<192x32xf32>
    %77 = vector.shape_cast %74 : vector<192x32xf32> to vector<1x1x192x32xf32>
    tpu.vector_store %arg9[%c0_64, %c0_65, %c0_66, %c0_67], %77 {strides = array<i32>} : memref<1x1x192x32xf32, #tpu.memory_space<vmem>>, vector<1x1x192x32xf32>,
    return
  }
  func.func @transform_0(%arg0: i32, %arg1: i32) -> (i32, i32, i32, i32) {
    %c0_i32 = arith.constant 0 : i32
    %c0_i32_0 = arith.constant 0 : i32
    %c0_i32_1 = arith.constant 0 : i32
    return %arg0, %arg1, %c0_i32, %c0_i32_0 : i32, i32, i32, i32
  }
  func.func @transform_1(%arg0: i32, %arg1: i32) -> (i32, i32) {
    %c0_i32 = arith.constant 0 : i32
    %c0_i32_0 = arith.constant 0 : i32
    %c0_i32_1 = arith.constant 0 : i32
    return %c0_i32, %c0_i32_0 : i32, i32
  }
  func.func @transform_2(%arg0: i32, %arg1: i32) -> (i32, i32) {
    %c0_i32 = arith.constant 0 : i32
    %c0_i32_0 = arith.constant 0 : i32
    %c0_i32_1 = arith.constant 0 : i32
    return %c0_i32, %c0_i32_0 : i32, i32
  }
  func.func @transform_3(%arg0: i32, %arg1: i32) -> (i32, i32) {
    %c0_i32 = arith.constant 0 : i32
    %c0_i32_0 = arith.constant 0 : i32
    %c0_i32_1 = arith.constant 0 : i32
    return %c0_i32, %c0_i32_0 : i32, i32
  }
  func.func @transform_4(%arg0: i32, %arg1: i32) -> (i32, i32) {
    %c0_i32 = arith.constant 0 : i32
    %c0_i32_0 = arith.constant 0 : i32
    %c0_i32_1 = arith.constant 0 : i32
    return %c0_i32, %c0_i32_0 : i32, i32
  }
  func.func @transform_5(%arg0: i32, %arg1: i32) -> (i32, i32) {
    %c0_i32 = arith.constant 0 : i32
    %c0_i32_0 = arith.constant 0 : i32
    %c0_i32_1 = arith.constant 0 : i32
    return %c0_i32, %c0_i32_0 : i32, i32
  }
  func.func @transform_6(%arg0: i32, %arg1: i32) -> (i32, i32) {
    %c0_i32 = arith.constant 0 : i32
    %c0_i32_0 = arith.constant 0 : i32
    %c0_i32_1 = arith.constant 0 : i32
    return %c0_i32, %c0_i32_0 : i32, i32
  }
  func.func @transform_7(%arg0: i32, %arg1: i32) -> (i32, i32, i32, i32) {
    %c0_i32 = arith.constant 0 : i32
    %c0_i32_0 = arith.constant 0 : i32
    %c0_i32_1 = arith.constant 0 : i32
    return %arg0, %arg1, %c0_i32, %c0_i32_0 : i32, i32, i32, i32
  }
}

</mosaic_0001>

<bundles_post_ra>
// kernel: dbhead_forward.1
= control target key start
LH: loop header
LB: loop body
LE: loop exit
PB: predicated region body
PF: predicated region fallthrough
CT: control target
= control target key end

     0   :  { %s6972_s0 = inlined_call_operand.vmem [shape: bf16[2,2,256,128], index: 0, kind: input, shape index: {}]   ;;  %s6973_s1 = inlined_call_operand.hbm [shape: bf16[1152,128], index: 1, kind: input, shape index: {}]   ;;  %s6974_s2 = inlined_call_operand.hbm [shape: f32[1,128], index: 2, kind: input, shape index: {}]   ;;  %s6975_s3 = inlined_call_operand.hbm [shape: bf16[128,512], index: 3, kind: input, shape index: {}]   ;;  %s6976_s4 = inlined_call_operand.hbm [shape: f32[1,512], index: 4, kind: input, shape index: {}]   ;;  %s6977_s5 = inlined_call_operand.vmem [shape: bf16[512,32], index: 5, kind: input, shape index: {}]   ;;  %s6978_s6 = inlined_call_operand.hbm [shape: f32[1,32], index: 6, kind: input, shape index: {}]   ;;  %s6979_s7 = inlined_call_operand.vmem [shape: f32[2,2,192,32], index: 7, kind: output, shape index: {}]  }
   0x1   :  { %6980 = sst [smem:[#allocation13_spill]] %s6973_s1 }
   0x2   :  { %6981 = sst [smem:[#allocation14_spill]] %s6974_s2 }
   0x3   :  { %6982 = sst [smem:[#allocation15_spill]] %s6976_s4 }
   0x4   :  { %12 = vsyncpa [#allocation3], 0 }
   0x5   :  { %13 = vsyncpa [#allocation5], 0 }
   0x6   :  { %14 = vsyncpa [#allocation8], 0  ;;  %s5722_s24 = smov 0   ;;  %s5724_s25 = smov 0  }
   0x7   :  { %s5726_s26 = smov 0   ;;  %s5728_s27 = smov 0  }
   0x8   :  { %s5730_s28 = smov 0  }
   0x9 LB: > { %s6983_s2 = sld [smem:[#allocation14_spill]]  ;;  %s4247_s9 = sadd.s32 4294967295, %s5671_s28   ;;  %s5671_s28 = sphi %s5730_s28, %s20_s28   ;;  %s5667_s27 = sphi %s5728_s27, %s6992_s27   ;;  %s5663_s26 = sphi %s5726_s26, %s6991_s26   ;;  %s5659_s25 = sphi %s5724_s25, %s6990_s25   ;;  %s5655_s24 = sphi %s5722_s24, %s6989_s24  }
   0xa   : > { %p4249_p0 = scmp.ge.s32.totalorder %s5671_s28, 1  ;;  %p219_p1 = scmp.lt.s32.totalorder %s5671_s28, 5 }
   0xb   : > { %p5753_p2 = scmp.eq.s32.totalorder %s4247_s9, 0  ;;  %s5673_s12 = smov [#allocation4]  }
   0xc   : > { %p5757_p3 = pnand %p4249_p0, %p219_p1  ;;  %s247_s13 = sshll.u32 %s5673_s12, 4  ;;  %s248_s13 = int_to_ptr.vmem [resolvable:$true] %s247_s13 }
   0xd   : > { %s6986_s4 = sld [smem:[#allocation15_spill]]  ;;  %s5674_s18 = smov [#allocation7]  }
   0xe   : > { %p5294_p4 = pneg %p5757_p3  ;;  %s273_s19 = sshll.u32 %s5674_s18, 4  ;;  %s274_s19 = int_to_ptr.vmem [resolvable:$true] %s273_s19 }
   0xf   : > { %s245_s8 = sshll.u32 %s6983_s2, 4  ;;  %s29_s20 = sadd.s32 1, %s5663_s26  ;;  %s246_s8 = int_to_ptr.hbm [resolvable:$true] %s245_s8 }
  0x10   : > { %p5768_p5 = pnand %p5753_p2, %p5294_p4  ;;  %p30_p6 = scmp.ge.s32.totalorder %s29_s20, 2 }
  0x11   : > { %s32_s21 = sadd.s32 1, %s5667_s27  ;;  %s6988_s1 = sld [smem:[#allocation13_spill]] }
  0x12   : > { %5300 = dma.hbm_to_vmem [thread:$0]  (!%p5768_p5), %s246_s8, 16, %s248_s13, [#allocation5]  }
  0x13   : > { %s271_s16 = sshll.u32 %s6986_s4, 4  ;;  %s6994_s20 = smov (%p30_p6, %s29_s20), 0  ;;  %s272_s16 = int_to_ptr.hbm [resolvable:$true] %s271_s16 }
  0x14   : > { %5306 = dma.hbm_to_vmem [thread:$0]  (!%p5768_p5), %s272_s16, 64, %s274_s19, [#allocation8]  }
  0x15   : > { %s6996_s21 = smov (!%p30_p6, %s32_s21), %s5667_s27  ;;  %s5675_s30 = smov [#allocation2]  }
  0x16   : > { %s232_s9 = sshll.u32 %s5675_s30, 4  ;;  %p34_p7 = scmp.ge.s32.totalorder %s6996_s21, 2  ;;  %s233_s9 = int_to_ptr.vmem [resolvable:$true] %s232_s9 }
  0x17   : > { %s230_s29 = sshll.u32 %s6988_s1, 4  ;;  %s5676_s8 = smov 64   ;;  %s231_s29 = int_to_ptr.hbm [resolvable:$true] %s230_s29 }
  0x18   : > { %s6998_s21 = smov (%p34_p7, %s6996_s21), 0  ;;  %s5677_s12 = smov 4  }
  0x19   : > { %5297 = dma.hbm_to_vmem [thread:$0]  (!%p5768_p5), %s231_s29, 9216, %s233_s9, [#allocation3], %s5676_s8, %s5676_s8, %s5677_s12  }
  0x1a   : > { %s256_s15 = sshll.u32 %s6975_s3, 4  ;;  %s5678_s16 = smov [#allocation6]   ;;  %s257_s15 = int_to_ptr.hbm [resolvable:$true] %s256_s15 }
  0x1b   : > { %s258_s18 = sshll.u32 %s5678_s16, 4  ;;  %s286_s23 = sshll.u32 %s6978_s6, 4  ;;  %s259_s18 = int_to_ptr.vmem [resolvable:$true] %s258_s18  ;;  %s287_s23 = int_to_ptr.hbm [resolvable:$true] %s286_s23 }
  0x1c   : > { %s5679_s30 = smov 256   ;;  %s5680_s1 = smov 16  }
  0x1d   : > { %5303 = dma.hbm_to_vmem [thread:$0]  (!%p5768_p5), %s257_s15, 4096, %s259_s18, [#allocation5], %s5679_s30, %s5679_s30, %s5680_s1  }
  0x1e   : > { %s5681_s2 = smov [#allocation9]   ;;  %313 = sbr.rel (%p5757_p3) target bundleno = 1044 (0x414), region = 48 }
  0x1f   : > { %s288_s4 = sshll.u32 %s5681_s2, 4  ;;  %s289_s4 = int_to_ptr.vmem [resolvable:$true] %s288_s4 }
  0x20   : > { %5309 = dma.hbm_to_vmem [thread:$0]  (!%p5768_p5), %s287_s23, 16, %s289_s4, [#allocation8]  }
  0x23   : > { %5642 = dma.done.wait (%p5753_p2), [#allocation3], 9216  }
  0x24   : > { %5644 = vsyncadd (%p5753_p2), [#allocation3], 4294958080 }
  0x25   : > { %5646 = dma.done.wait (%p5753_p2), [#allocation5], 4112  }
  0x26   : > { %5648 = vsyncadd (%p5753_p2), [#allocation5], 4294963184 }
  0x27   : > { %5650 = dma.done.wait (%p5753_p2), [#allocation8], 80  }
  0x28   : > { %5652 = vsyncadd (%p5753_p2), [#allocation8], 4294967216  ;;  %p374_p8 = scmp.lt.s32.totalorder %s5659_s25, 1  ;;  %p376_p9 = scmp.lt.s32.totalorder %s5655_s24, 1  ;;  %v5066_v0 = vld [vmem:[#allocation2 + $0x78] sm:$0xff]  ;;  %v5065_v1 = vld [vmem:[#allocation2 + $0x70] sm:$0xff] }
  0x29   : > { %673 = vmatpush.bf16.msra.mxu0 %v5066_v0  ;;  %5248 = vmatpush.bf16.msra.mxu1 %v5066_v0  ;;  %v5064_v2 = vld [vmem:[#allocation2 + $0x68] sm:$0xff]  ;;  %v5063_v3 = vld [vmem:[#allocation2 + $0x60] sm:$0xff]  ;;  %v5062_v4 = vld [vmem:[#allocation2 + $0x58] sm:$0xff]  ;;  %vm512_vm0 = vsmask.f32 7424  ;;  %vm891_vm1 = vcmask 1046528  }
  0x2a   : > { %s7000_s25 = smov (!%p374_p8, %s5659_s25), 1  ;;  %s7002_s24 = smov (!%p376_p9, %s5655_s24), 1  ;;  %5249 = vmatpush.bf16.msra.mxu2 %v5066_v0  ;;  %5250 = vmatpush.bf16.msra.mxu3 %v5066_v0  ;;  %v5061_v11 = vld [vmem:[#allocation2 + $0x50] sm:$0xff]  ;;  %v5060_v22 = vld [vmem:[#allocation2 + $0x48] sm:$0xff]  ;;  %v5059_v31 = vld [vmem:[#allocation2 + $0x40] sm:$0xff]  ;;  %vm4076_vm2 = vcmask 261120  }
  0x2b   : > { %s4262_s1 = sshll.u32 %s7002_s24, 5  ;;  %s4263_s2 = sshll.u32 %s7000_s25, 6  ;;  %v5074_v40 = vld [vmem:[#allocation2 + $0xb8] sm:$0xff]  ;;  %v5073_v48 = vld [vmem:[#allocation2 + $0xb0] sm:$0xff]  ;;  %v5072_v56 = vld [vmem:[#allocation2 + $0xa8] sm:$0xff] }
  0x2c   : > { %s380_s4 = sadd.s32 %s4263_s2, %s4262_s1  ;;  %v5094_v41 = vld [vmem:[#allocation2 + $0xf8] sm:$0xff]  ;;  %v5093_v49 = vld [vmem:[#allocation2 + $0xf0] sm:$0xff]  ;;  %v5092_v57 = vld [vmem:[#allocation2 + $0xe8] sm:$0xff]  ;;  %s5272_s18 = smul.u32 24, %s7002_s24 }
  0x2d   : > { %674 = vmatpush.bf16.msra.mxu0 %v5065_v1  ;;  %5251 = vmatpush.bf16.msra.mxu1 %v5065_v1  ;;  %s4264_s10 = sshll.u32 %s380_s4, 2  ;;  %v5058_v46 = vld [vmem:[#allocation2 + $0x38] sm:$0xff]  ;;  %v5057_v50 = vld [vmem:[#allocation2 + $0x30] sm:$0xff]  ;;  %s5273_s19 = smul.u32 48, %s7000_s25 }
  0x2e   : > { %5252 = vmatpush.bf16.msra.mxu2 %v5065_v1  ;;  %5253 = vmatpush.bf16.msra.mxu3 %v5065_v1  ;;  %s5825_s29 = scalar_lea.vmem %s6972_s0, %s4264_s10  ;;  %v5113_v47 = vld [vmem:[#allocation2 + $0x138] sm:$0xff]  ;;  %v5112_v55 = vld [vmem:[#allocation2 + $0x130] sm:$0xff] }
  0x2f   : > { %v5828_v5 = vld [vmem:[%s5825_s29] sm:$0xff]   ;;  %v5831_v6 = vld [vmem:[%s5825_s29 + $0x18] sm:$0xff]  ;;  %v5834_v7 = vld [vmem:[%s5825_s29 + $0x30] sm:$0xff]  ;;  %s389_s24 = sadd.s32 %s5273_s19, %s5272_s18 }
  0x30   : > { %v5837_v8 = vld [vmem:[%s5825_s29 + $0x48] sm:$0xff]  ;;  %v516_v10 = vshll.u32 %v5828_v5, 16  ;;  %v5844_v12 = vld [vmem:[%s5825_s29 + $0x20] sm:$0xff]  ;;  %v537_v13 = vshll.u32 %v5831_v6, 16  ;;  %v5848_v14 = vld [vmem:[%s5825_s29 + $0x38] sm:$0xff]  ;;  %v561_v15 = vshll.u32 %v5834_v7, 16 }
  0x31   : > { %675 = vmatpush.bf16.msra.mxu0 %v5064_v2  ;;  %5254 = vmatpush.bf16.msra.mxu1 %v5064_v2  ;;  %v5840_v9 = vld [vmem:[%s5825_s29 + $0x8] sm:$0xff]  ;;  %v5852_v16 = vld [vmem:[%s5825_s29 + $0x50] sm:$0xff]  ;;  %v585_v17 = vshll.u32 %v5837_v8, 16  ;;  %v514_v18 = vshrl.u32 %v5828_v5, 16  ;;  %v541_v21 = vshrl.u32 %v5831_v6, 16  ;;  %v545_v24 = vshll.u32 %v5844_v12, 16 }
  0x32   : > { %5255 = vmatpush.bf16.msra.mxu2 %v5064_v2  ;;  %5256 = vmatpush.bf16.msra.mxu3 %v5064_v2  ;;  %v518_v19 = vrot.slane %v516_v10, 1  ;;  %v521_v20 = vshll.u32 %v5840_v9, 16  ;;  %v5858_v23 = vrot.slane %v537_v13, 1  ;;  %v565_v25 = vshrl.u32 %v5834_v7, 16  ;;  %v5877_v51 = vld [vmem:[%s5825_s29 + $0x10] sm:$0xff]  ;;  %v5880_v52 = vld [vmem:[%s5825_s29 + $0x28] sm:$0xff] }
  0x33   : > { %v569_v26 = vshll.u32 %v5848_v14, 16  ;;  %v5863_v27 = vrot.slane %v561_v15, 1  ;;  %v5865_v28 = vrot.slane %v585_v17, 1  ;;  %v589_v29 = vshrl.u32 %v5837_v8, 16  ;;  %v5883_v53 = vld [vmem:[%s5825_s29 + $0x40] sm:$0xff]  ;;  %v5886_v54 = vld [vmem:[%s5825_s29 + $0x58] sm:$0xff] }
  0x34   : > { %v593_v30 = vshll.u32 %v5852_v16, 16  ;;  %v519_v32 = vor.u32 %v518_v19, %v514_v18  ;;  %v523_v33 = vrot.slane %v521_v20, 1  ;;  %v543_v34 = vor.u32 %v541_v21, %v5858_v23  ;;  %v5056_v2 = vld [vmem:[#allocation2 + $0x28] sm:$0xff]  ;;  %v5091_v10 = vld [vmem:[#allocation2 + $0xe0] sm:$0xff]  ;;  %s4265_s25 = sshll.u32 %s389_s24, 3 }
  0x35   : > { %676 = vmatpush.bf16.msra.mxu0 %v5063_v3  ;;  %5257 = vmatpush.bf16.msra.mxu1 %v5063_v3  ;;  %v547_v35 = vrot.slane %v545_v24, 1  ;;  %v567_v36 = vor.u32 %v565_v25, %v5863_v27  ;;  %v571_v37 = vrot.slane %v569_v26, 1  ;;  %v591_v38 = vor.u32 %v589_v29, %v5865_v28  ;;  %v5110_v24 = vld [vmem:[#allocation2 + $0x120] sm:$0xff]  ;;  %v5070_v25 = vld [vmem:[#allocation2 + $0x98] sm:$0xff]  ;;  %s6871_s30 = scalar_lea.vmem %s6979_s7, %s4265_s25 }
  0x36   : > { %5258 = vmatpush.bf16.msra.mxu2 %v5063_v3  ;;  %5259 = vmatpush.bf16.msra.mxu3 %v5063_v3  ;;  %v595_v39 = vrot.slane %v593_v30, 1  ;;  %v524_v42 = vsel %vm512_vm0, %v519_v32, %v523_v33  ;;  %v525_v58 = vshrl.u32 %v5840_v9, 16  ;;  %v529_v59 = vshll.u32 %v5877_v51, 16  ;;  %v5111_v3 = vld [vmem:[#allocation2 + $0x128] sm:$0xff]  ;;  %v5090_v26 = vld [vmem:[#allocation2 + $0xd8] sm:$0xff] }
  0x37   : > { %v548_v43 = vsel %vm512_vm0, %v543_v34, %v547_v35  ;;  %v572_v44 = vsel %vm512_vm0, %v567_v36, %v571_v37  ;;  %v549_v60 = vshrl.u32 %v5844_v12, 16  ;;  %v553_v61 = vshll.u32 %v5880_v52, 16  ;;  %v432_v29 = vld [vmem:[%s5825_s29 + $0x60] sm:$0x1]  ;;  %v5054_v34 = vld [vmem:[#allocation2 + $0x18] sm:$0xff] }
  0x38   : > { %v596_v45 = vsel %vm512_vm0, %v591_v38, %v595_v39  ;;  %v573_v62 = vshrl.u32 %v5848_v14, 16  ;;  %v577_v63 = vshll.u32 %v5883_v53, 16  ;;  %v597_v0 = vshrl.u32 %v5852_v16, 16  ;;  %v5109_v36 = vld [vmem:[#allocation2 + $0x118] sm:$0xff]  ;;  %v5089_v38 = vld [vmem:[#allocation2 + $0xd0] sm:$0xff] }
  0x39   : > { %677 = vmatpush.bf16.msra.mxu0 %v5062_v4  ;;  %5260 = vmatpush.bf16.msra.mxu1 %v5062_v4  ;;  %v601_v1 = vshll.u32 %v5886_v54, 16  ;;  %v531_v13 = vrot.slane %v529_v59, 1  ;;  %v551_v15 = vor.u32 %v549_v60, %v547_v35  ;;  %v555_v17 = vrot.slane %v553_v61, 1  ;;  %v5141_v59 = vld [vmem:[#allocation2 + $0x1b8] sm:$0xff] }
  0x3a   : > { %5261 = vmatpush.bf16.msra.mxu2 %v5062_v4  ;;  %5262 = vmatpush.bf16.msra.mxu3 %v5062_v4  ;;  %v5071_v4 = vld [vmem:[#allocation2 + $0xa0] sm:$0xff]  ;;  %v575_v18 = vor.u32 %v573_v62, %v571_v37  ;;  %v579_v19 = vrot.slane %v577_v63, 1  ;;  %v599_v20 = vor.u32 %v597_v0, %v595_v39  ;;  %v498_v35 = vunpack.c.l.b16 %v432_v29  ;;  %v5069_v37 = vld [vmem:[#allocation2 + $0x90] sm:$0xff]  ;;  %v5160_v60 = vld [vmem:[#allocation2 + $0x1f8] sm:$0xff] }
  0x3b   : > { %v603_v21 = vrot.slane %v601_v1, 1 }
  0x3c   : > { %v580_v32 = vsel %vm512_vm0, %v575_v18, %v579_v19  ;;  %v5901_v39 = vpack.c.b16 %v498_v35, %v498_v35  ;;  %v5920_v18 = vld [vmem:[%s5825_s29 + $0x14] sm:$0xff] }
  0x3d   : > { %678 = vmatpush.bf16.msra.mxu0 %v5061_v11  ;;  %5263 = vmatpush.bf16.msra.mxu1 %v5061_v11 }
  0x3e   : > { %5264 = vmatpush.bf16.msra.mxu2 %v5061_v11  ;;  %5265 = vmatpush.bf16.msra.mxu3 %v5061_v11  ;;  %v527_v11 = vor.u32 %v525_v58, %v523_v33  ;;  %v604_v33 = vsel %vm512_vm0, %v599_v20, %v603_v21  ;;  %v5087_v58 = vld [vmem:[#allocation2 + $0xc0] sm:$0xff]  ;;  %v5120_v20 = vld [vmem:[#allocation2 + $0x170] sm:$0xff] }
  0x40   : > { %v532_v30 = vsel %vm512_vm0, %v527_v11, %v531_v13 }
  0x41   : > { %679 = vmatpush.bf16.msra.mxu0 %v5060_v22  ;;  %5266 = vmatpush.bf16.msra.mxu1 %v5060_v22 }
  0x42   : > { %5267 = vmatpush.bf16.msra.mxu2 %v5060_v22  ;;  %5268 = vmatpush.bf16.msra.mxu3 %v5060_v22  ;;  %v5055_v22 = vld [vmem:[#allocation2 + $0x20] sm:$0xff] }
  0x45   : > { %680 = vmatpush.bf16.msra.mxu0 %v5059_v31  ;;  %5269 = vmatpush.bf16.msra.mxu1 %v5059_v31 }
  0x46   : > { %5270 = vmatpush.bf16.msra.mxu2 %v5059_v31  ;;  %5271 = vmatpush.bf16.msra.mxu3 %v5059_v31  ;;  %v556_v31 = vsel %vm512_vm0, %v551_v15, %v555_v17 }
  0x48   : > { %681 = vmatmul.bf16.vlgmr.msra.gmra.mxu0 %v524_v42  ;;  %696 = vmatmul.bf16.vlgmr.msra.gmra.mxu1 %v548_v43  ;;  %v5068_v42 = vld [vmem:[#allocation2 + $0x88] sm:$0xff] }
  0x49   : > { %711 = vmatmul.bf16.vlgmr.msra.gmra.mxu2 %v572_v44  ;;  %726 = vmatmul.bf16.vlgmr.msra.gmra.mxu3 %v596_v45  ;;  %v5088_v43 = vld [vmem:[#allocation2 + $0xc8] sm:$0xff]  ;;  %v533_v44 = vshrl.u32 %v5877_v51, 16  ;;  %v557_v45 = vshrl.u32 %v5880_v52, 16 }
  0x4a   : > { %977 = vmatpush.bf16.msrb.mxu2 %v5074_v40  ;;  %1230 = vmatpush.bf16.msrb.mxu3 %v5094_v41  ;;  %v5053_v40 = vld [vmem:[#allocation2 + $0x10] sm:$0xff] }
  0x4b   : > { %802 = vmatpush.bf16.msrb.mxu1 %v5058_v46  ;;  %1587 = vmatpush.bf16.msrb.mxu0 %v5113_v47  ;;  %v5108_v41 = vld [vmem:[#allocation2 + $0x110] sm:$0xff]  ;;  %v581_v46 = vshrl.u32 %v5883_v53, 16  ;;  %v605_v47 = vshrl.u32 %v5886_v54, 16  ;;  %v535_v61 = vor.u32 %v533_v44, %v531_v13  ;;  %v559_v62 = vor.u32 %v557_v45, %v555_v17 }
  0x4c   : > { %v5076_v44 = vld [vmem:[%s5825_s29 + $0x14] sm:$0xff] }
  0x4d   : > { %v583_v63 = vor.u32 %v581_v46, %v579_v19  ;;  %v607_v0 = vor.u32 %v605_v47, %v603_v21  ;;  %v540_v11 = vsel %vm512_vm0, %v535_v61, %v5858_v23  ;;  %v564_v13 = vsel %vm512_vm0, %v559_v62, %v5863_v27  ;;  %v5140_v19 = vld [vmem:[#allocation2 + $0x1b0] sm:$0xff]  ;;  %v5241_v21 = vld [vmem:[%s5825_s29] sm:$0xf0]  ;;  %v5139_v47 = vld [vmem:[#allocation2 + $0x1a8] sm:$0xff] }
  0x4e   : > { %978 = vmatpush.bf16.msrb.mxu2 %v5073_v48  ;;  %1231 = vmatpush.bf16.msrb.mxu3 %v5093_v49  ;;  %v609_v48 = vshll.u32 %v5901_v39, 16  ;;  %v5052_v49 = vld [vmem:[#allocation2 + $0x8] sm:$0xff]  ;;  %v5159_v27 = vld [vmem:[#allocation2 + $0x1f0] sm:$0xff] }
  0x4f   : > { %803 = vmatpush.bf16.msrb.mxu1 %v5057_v50  ;;  %1588 = vmatpush.bf16.msrb.mxu0 %v5112_v55  ;;  %v5107_v50 = vld [vmem:[#allocation2 + $0x108] sm:$0xff]  ;;  %v588_v15 = vsel %vm512_vm0, %v583_v63, %v5865_v28  ;;  %v5242_v28 = vld [vmem:[%s5825_s29] sm:$0xe] }
  0x50   : > { %v1323_v55 = vld [vmem:[%s5825_s29 + $0xc] sm:$0xff]   ;;  %v611_v1 = vrot.slane %v609_v48, 1  ;;  %v5941_v46 = vld [vmem:[%s5825_s29 + $0x24] sm:$0xff] }
  0x51   : > { %v1430_v23 = vshll.u32 %v1323_v55, 16  ;;  %v5158_v48 = vld [vmem:[#allocation2 + $0x1e8] sm:$0xff] }
  0x52   : > { %979 = vmatpush.bf16.msrb.mxu2 %v5072_v56  ;;  %1232 = vmatpush.bf16.msrb.mxu3 %v5092_v57  ;;  %v5910_v56 = vld [vmem:[%s5825_s29 + $0xc] sm:$0xf0]  ;;  %v5067_v57 = vld [vmem:[#allocation2 + $0x80] sm:$0xff]  ;;  %v612_v17 = vsel %vm512_vm0, %v607_v0, %v611_v1 }
  0x53   : > { %804 = vmatpush.bf16.msrb.mxu1 %v5056_v2  ;;  %1589 = vmatpush.bf16.msrb.mxu0 %v5111_v3  ;;  %v5051_v2 = vld [vmem:[#allocation2] sm:$0xff]  ;;  %v5951_v63 = vld [vmem:[%s5825_s29 + $0x2c] sm:$0xff] }
  0x54   : > { %v5106_v3 = vld [vmem:[#allocation2 + $0x100] sm:$0xff] }
  0x55   : > { %v5138_v0 = vld [vmem:[#allocation2 + $0x1a0] sm:$0xff] }
  0x56   : > { %980 = vmatpush.bf16.msrb.mxu2 %v5071_v4  ;;  %1233 = vmatpush.bf16.msrb.mxu3 %v5091_v10  ;;  %v5121_v4 = vld [vmem:[#allocation2 + $0x178] sm:$0xff]  ;;  %v5157_v1 = vld [vmem:[#allocation2 + $0x1e0] sm:$0xff] }
  0x57   : > { %805 = vmatpush.bf16.msrb.mxu1 %v5055_v22  ;;  %1590 = vmatpush.bf16.msrb.mxu0 %v5110_v24  ;;  %v5168_v10 = vld [vmem:[#allocation2 + $0x238] sm:$0xff]  ;;  %v1428_v22 = vshrl.u32 %v1323_v55, 16  ;;  %v1432_v24 = vrot.slane %v1430_v23, 1 }
  0x58   : > { %686 = vmatmul.bf16.gmra.mxu0 %v532_v30  ;;  %701 = vmatmul.bf16.gmra.mxu1 %v556_v31  ;;  %v5961_v23 = vld [vmem:[%s5825_s29 + $0x34] sm:$0xff] }
  0x59   : > { %716 = vmatmul.bf16.gmra.mxu2 %v580_v32  ;;  %731 = vmatmul.bf16.gmra.mxu3 %v604_v33  ;;  %v1433_v29 = vor.u32 %v1432_v24, %v1428_v22  ;;  %v893_v32 = vrot.slane %v5840_v9, 1  ;;  %v5075_v33 = vld [vmem:[%s5825_s29 + $0xc] sm:$0xff]  ;;  %v901_v22 = vrot.slane %v5880_v52, 1 }
  0x5a   : > { %981 = vmatpush.bf16.msrb.mxu2 %v5070_v25  ;;  %1234 = vmatpush.bf16.msrb.mxu3 %v5090_v26  ;;  %v1435_v25 = vshll.u32 %v5920_v18, 16  ;;  %v5243_v26 = vor.u32 %v5242_v28, %v5241_v21  ;;  %v5079_v24 = vld [vmem:[%s5825_s29 + $0x2c] sm:$0xff] }
  0x5b   : > { %806 = vmatpush.bf16.msrb.mxu1 %v5054_v34  ;;  %1591 = vmatpush.bf16.msrb.mxu0 %v5109_v36  ;;  %v5931_v36 = vld [vmem:[%s5825_s29 + $0x1c] sm:$0xff] }
  0x5c   : > { %v1437_v30 = vrot.slane %v1435_v25, 1  ;;  %v892_v31 = vrot.slane %v5243_v26, 1  ;;  %v1447_v55 = vshrl.u32 %v5931_v36, 16  ;;  %v5971_v26 = vld [vmem:[%s5825_s29 + $0x3c] sm:$0xff] }
  0x5e   : > { %982 = vmatpush.bf16.msrb.mxu2 %v5069_v37  ;;  %1235 = vmatpush.bf16.msrb.mxu3 %v5089_v38  ;;  %v1438_v34 = vsel %vm512_vm0, %v1433_v29, %v1437_v30  ;;  %v894_v35 = vsel %vm891_vm1, %v892_v31, %v893_v32  ;;  %v5167_v37 = vld [vmem:[#allocation2 + $0x230] sm:$0xff]  ;;  %v1439_v38 = vshrl.u32 %v5920_v18, 16  ;;  %v5137_v29 = vld [vmem:[#allocation2 + $0x198] sm:$0xff] }
  0x5f   : > { %807 = vmatpush.bf16.msrb.mxu1 %v5053_v40  ;;  %1592 = vmatpush.bf16.msrb.mxu0 %v5108_v41  ;;  %v1443_v40 = vshll.u32 %v5931_v36, 16  ;;  %v5117_v31 = vld [vmem:[#allocation2 + $0x158] sm:$0xff] }
  0x60   : > { %v1441_v41 = vor.u32 %v1439_v38, %v1437_v30  ;;  %v5156_v30 = vld [vmem:[#allocation2 + $0x1d8] sm:$0xff] }
  0x62   : > { %983 = vmatpush.bf16.msrb.mxu2 %v5068_v42  ;;  %1236 = vmatpush.bf16.msrb.mxu3 %v5088_v43  ;;  %v1445_v42 = vrot.slane %v1443_v40, 1  ;;  %v895_v43 = vrot.slane %v5877_v51, 1 }
  0x63   : > { %808 = vmatpush.bf16.msrb.mxu1 %v5052_v49  ;;  %1593 = vmatpush.bf16.msrb.mxu0 %v5107_v50  ;;  %v5119_v49 = vld [vmem:[#allocation2 + $0x168] sm:$0xff] }
  0x64   : > { %v1446_v45 = vsel %vm512_vm0, %v1441_v41, %v1445_v42  ;;  %v5166_v50 = vld [vmem:[#allocation2 + $0x228] sm:$0xff]  ;;  %v5080_v41 = vld [vmem:[%s5825_s29 + $0x34] sm:$0xff] }
  0x66   : > { %984 = vmatpush.bf16.msrb.mxu2 %v5067_v57  ;;  %1237 = vmatpush.bf16.msrb.mxu3 %v5087_v58  ;;  %v1451_v57 = vshll.u32 %v5941_v46, 16 }
  0x67   : > { %809 = vmatpush.bf16.msrb.mxu1 %v5051_v2  ;;  %1594 = vmatpush.bf16.msrb.mxu0 %v5106_v3  ;;  %v5118_v2 = vld [vmem:[#allocation2 + $0x160] sm:$0xff]  ;;  %v1455_v3 = vshrl.u32 %v5941_v46, 16 }
  0x68   : > { %691 = vmatmul.bf16.gmra.mxu0 %v540_v11  ;;  %706 = vmatmul.bf16.gmra.mxu1 %v564_v13  ;;  %v1453_v58 = vrot.slane %v1451_v57, 1  ;;  %v5078_v13 = vld [vmem:[%s5825_s29 + $0x24] sm:$0xff] }
  0x69   : > { %721 = vmatmul.bf16.gmra.mxu2 %v588_v15  ;;  %736 = vmatmul.bf16.gmra.mxu3 %v612_v17 }
  0x6a   : > { %2038 = vmatpush.bf16.msra.mxu2 %v5141_v59  ;;  %2395 = vmatpush.bf16.msra.mxu3 %v5160_v60  ;;  %v897_v59 = vrot.slane %v5831_v6, 1  ;;  %v5077_v60 = vld [vmem:[%s5825_s29 + $0x1c] sm:$0xff] }
  0x6b   : > { %1785 = vmatpush.bf16.msra.mxu1 %v5121_v4  ;;  %2593 = vmatpush.bf16.msra.mxu0 %v5168_v10  ;;  %v1459_v4 = vshll.u32 %v5951_v63, 16  ;;  %v1457_v10 = vor.u32 %v1455_v3, %v1453_v58 }
  0x6c   : > { %v898_v62 = vsel %vm891_vm1, %v895_v43, %v897_v59 }
  0x6d   : > { %v1461_v11 = vrot.slane %v1459_v4, 1  ;;  %v6011_v4 = vld [vmem:[%s5825_s29 + $0x4c] sm:$0xff] }
  0x6e   : > { %2039 = vmatpush.bf16.msra.mxu2 %v5140_v19  ;;  %2396 = vmatpush.bf16.msra.mxu3 %v5159_v27  ;;  %v5165_v19 = vld [vmem:[#allocation2 + $0x220] sm:$0xff]  ;;  %v1463_v27 = vshrl.u32 %v5951_v63, 16 }
  0x6f   : > { %1786 = vmatpush.bf16.msra.mxu1 %v5120_v20  ;;  %2594 = vmatpush.bf16.msra.mxu0 %v5167_v37  ;;  %v1462_v15 = vsel %vm512_vm0, %v1457_v10, %v1461_v11  ;;  %v1467_v20 = vshll.u32 %v5961_v23, 16  ;;  %v903_v37 = vrot.slane %v5834_v7, 1  ;;  %v5163_v10 = vld [vmem:[#allocation2 + $0x210] sm:$0xff] }
  0x70   : > { %v1465_v21 = vor.u32 %v1463_v27, %v1461_v11 }
  0x71   : > { %v1469_v28 = vrot.slane %v1467_v20, 1  ;;  %v907_v20 = vrot.slane %v5883_v53, 1 }
  0x72   : > { %2040 = vmatpush.bf16.msra.mxu2 %v5139_v47  ;;  %2397 = vmatpush.bf16.msra.mxu3 %v5158_v48 }
  0x73   : > { %1787 = vmatpush.bf16.msra.mxu1 %v5119_v49  ;;  %2595 = vmatpush.bf16.msra.mxu0 %v5166_v50  ;;  %v1470_v25 = vsel %vm512_vm0, %v1465_v21, %v1469_v28  ;;  %v1479_v49 = vshrl.u32 %v5971_v26, 16 }
  0x76   : > { %2041 = vmatpush.bf16.msra.mxu2 %v5138_v0  ;;  %2398 = vmatpush.bf16.msra.mxu3 %v5157_v1  ;;  %v5081_v1 = vld [vmem:[%s5825_s29 + $0x3c] sm:$0xff] }
  0x77   : > { %1788 = vmatpush.bf16.msra.mxu1 %v5118_v2  ;;  %2596 = vmatpush.bf16.msra.mxu0 %v5165_v19 }
  0x78   : > { %810 = vmatmul.bf16.vlgmr.msrb.gmra.mxu1 %v5828_v5  ;;  %1595 = vmatmul.bf16.vlgmr.msrb.gmra.mxu0 %v1438_v34  ;;  %v896_v5 = vsel %vm891_vm1, %v893_v32, %v895_v43  ;;  %v1471_v32 = vshrl.u32 %v5961_v23, 16  ;;  %v5164_v34 = vld [vmem:[#allocation2 + $0x218] sm:$0xff]  ;;  %v904_v43 = vsel %vm891_vm1, %v901_v22, %v903_v37 }
  0x79   : > { %985 = vmatmul.bf16.vlgmr.msrb.gmra.mxu2 %v894_v35  ;;  %1238 = vmatmul.bf16.vlgmr.msrb.gmra.mxu3 %v5075_v33  ;;  %v1475_v33 = vshll.u32 %v5971_v26, 16 }
  0x7a   : > { %2042 = vmatpush.bf16.msra.mxu2 %v5137_v29  ;;  %2399 = vmatpush.bf16.msra.mxu3 %v5156_v30  ;;  %v6037_v30 = vld [vmem:[%s5825_s29 + $0x54] sm:$0xff] }
  0x7b   : > { %1789 = vmatpush.bf16.msra.mxu1 %v5117_v31  ;;  %2597 = vmatpush.bf16.msra.mxu0 %v5164_v34  ;;  %v1477_v35 = vrot.slane %v1475_v33, 1  ;;  %v5135_v31 = vld [vmem:[#allocation2 + $0x188] sm:$0xff] }
  0x7d   : > { %v1481_v57 = vor.u32 %v1479_v49, %v1477_v35 }
  0x7f   : > { %2598 = vmatpush.bf16.msra.mxu0 %v5163_v10 }
  0x88   : > { %815 = vmatmul.bf16.gmra.mxu1 %v5840_v9  ;;  %1600 = vmatmul.bf16.gmra.mxu0 %v1446_v45  ;;  %v1449_v9 = vor.u32 %v1447_v55, %v1445_v42  ;;  %v5136_v55 = vld [vmem:[#allocation2 + $0x190] sm:$0xff] }
  0x89   : > { %990 = vmatmul.bf16.gmra.mxu2 %v896_v5  ;;  %1243 = vmatmul.bf16.gmra.mxu3 %v5076_v44  ;;  %v5985_v44 = vld [vmem:[%s5825_s29 + $0x44] sm:$0xff] }
  0x8a   : > { %v1454_v61 = vsel %vm512_vm0, %v1449_v9, %v1453_v58  ;;  %v1483_v50 = vshll.u32 %v5985_v44, 16  ;;  %2043 = vmatpush.bf16.msra.mxu2 %v5136_v55  ;;  %v905_v58 = vrot.slane %v5848_v14, 1 }
  0x8c   : > { %v1485_v9 = vrot.slane %v1483_v50, 1  ;;  %v906_v3 = vsel %vm891_vm1, %v903_v37, %v905_v58  ;;  %v908_v29 = vsel %vm891_vm1, %v905_v58, %v907_v20  ;;  %v1499_v37 = vshll.u32 %v6037_v30, 16  ;;  %v5083_v58 = vld [vmem:[%s5825_s29 + $0x4c] sm:$0xff] }
  0x8d   : > { %v909_v50 = vrot.slane %v5837_v8, 1 }
  0x8e   : > { %v1486_v2 = vsel %vm512_vm0, %v1481_v57, %v1485_v9  ;;  %2044 = vmatpush.bf16.msra.mxu2 %v5135_v31  ;;  %v1501_v49 = vrot.slane %v1499_v37, 1  ;;  %v911_v37 = vrot.slane %v5852_v16, 1 }
  0x98   : > { %820 = vmatmul.bf16.gmra.mxu1 %v5877_v51  ;;  %1605 = vmatmul.bf16.gmra.mxu0 %v1454_v61  ;;  %v899_v51 = vrot.slane %v5844_v12, 1  ;;  %v5116_v61 = vld [vmem:[#allocation2 + $0x150] sm:$0xff] }
  0x99   : > { %995 = vmatmul.bf16.gmra.mxu2 %v898_v62  ;;  %1248 = vmatmul.bf16.gmra.mxu3 %v5077_v60 }
  0x9a   : > { %v900_v17 = vsel %vm891_vm1, %v897_v59, %v899_v51  ;;  %1790 = vmatpush.bf16.msra.mxu1 %v5116_v61 }
  0xa8   : > { %825 = vmatmul.bf16.gmra.mxu1 %v5831_v6  ;;  %1610 = vmatmul.bf16.gmra.mxu0 %v1462_v15  ;;  %v902_v6 = vsel %vm891_vm1, %v899_v51, %v901_v22 }
  0xa9   : > { %1000 = vmatmul.bf16.gmra.mxu2 %v900_v17  ;;  %1253 = vmatmul.bf16.gmra.mxu3 %v5078_v13  ;;  %v1487_v17 = vshrl.u32 %v5985_v44, 16 }
  0xab   : > { %v1489_v19 = vor.u32 %v1487_v17, %v1485_v9 }
  0xb8   : > { %830 = vmatmul.bf16.gmra.mxu1 %v5844_v12  ;;  %1615 = vmatmul.bf16.gmra.mxu0 %v1470_v25  ;;  %v1473_v12 = vor.u32 %v1471_v32, %v1469_v28  ;;  %v5082_v25 = vld [vmem:[%s5825_s29 + $0x44] sm:$0xff] }
  0xb9   : > { %1005 = vmatmul.bf16.gmra.mxu2 %v902_v6  ;;  %1258 = vmatmul.bf16.gmra.mxu3 %v5079_v24  ;;  %v5154_v32 = vld [vmem:[#allocation2 + $0x1c8] sm:$0xff] }
  0xba   : > { %v1478_v42 = vsel %vm512_vm0, %v1473_v12, %v1477_v35 }
  0xc5   : > { %v5976_v38 = vpop.f32.mrf.mxu0  ;;  %v5978_v40 = vpop.f32.mrf.mxu1 }
  0xc8   : > { %835 = vmatmul.bf16.gmra.mxu1 %v5880_v52  ;;  %1620 = vmatmul.bf16.gmra.mxu0 %v1478_v42  ;;  %v5155_v52 = vld [vmem:[#allocation2 + $0x1d0] sm:$0xff]  ;;  %v5162_v42 = vld [vmem:[#allocation2 + $0x208] sm:$0xff] }
  0xc9   : > { %1010 = vmatmul.bf16.gmra.mxu2 %v904_v43  ;;  %1263 = vmatmul.bf16.gmra.mxu3 %v5080_v41  ;;  %v5115_v41 = vld [vmem:[#allocation2 + $0x148] sm:$0xff] }
  0xca   : > { %2400 = vmatpush.bf16.msra.mxu3 %v5155_v52  ;;  %1791 = vmatpush.bf16.msra.mxu1 %v5115_v41 }
  0xcb   : > { %2599 = vmatpush.bf16.msra.mxu0 %v5162_v42 }
  0xcc   : > { %v5987_v45 = vpop.f32.mrf.mxu2  ;;  %v5989_v5 = vpop.f32.mrf.mxu3 }
  0xcd   : > { %v5991_v47 = vpop.f32.mrf.mxu0  ;;  %v5993_v48 = vpop.f32.mrf.mxu1 }
  0xce   : > { %2401 = vmatpush.bf16.msra.mxu3 %v5154_v32 }
  0xd4   : > { %v5998_v59 = vpop.f32.mrf.mxu2  ;;  %v6000_v60 = vpop.f32.mrf.mxu3 }
  0xd5   : > { %v6002_v62 = vpop.f32.mrf.mxu0  ;;  %v6004_v0 = vpop.f32.mrf.mxu1 }
  0xd8   : > { %840 = vmatmul.bf16.gmra.mxu1 %v5834_v7  ;;  %1625 = vmatmul.bf16.gmra.mxu0 %v1486_v2  ;;  %v1491_v7 = vshll.u32 %v6011_v4, 16  ;;  %v910_v2 = vsel %vm891_vm1, %v907_v20, %v909_v50 }
  0xd9   : > { %1015 = vmatmul.bf16.gmra.mxu2 %v906_v3  ;;  %1268 = vmatmul.bf16.gmra.mxu3 %v5081_v1  ;;  %v6060_v3 = vld [vmem:[%s5825_s29 + $0x5c] sm:$0xff] }
  0xda   : > { %v1493_v27 = vrot.slane %v1491_v7, 1 }
  0xdc   : > { %v6013_v11 = vpop.f32.mrf.mxu2  ;;  %v6015_v51 = vpop.f32.mrf.mxu3  ;;  %v1494_v6 = vsel %vm512_vm0, %v1489_v19, %v1493_v27 }
  0xdd   : > { %v6017_v13 = vpop.f32.mrf.mxu0  ;;  %v6019_v15 = vpop.f32.mrf.mxu1 }
  0xe4   : > { %v6024_v21 = vpop.f32.mrf.mxu2  ;;  %v6026_v28 = vpop.f32.mrf.mxu3 }
  0xe5   : > { %v6028_v22 = vpop.f32.mrf.mxu0  ;;  %v6030_v24 = vpop.f32.mrf.mxu1 }
  0xe8   : > { %845 = vmatmul.bf16.gmra.mxu1 %v5848_v14  ;;  %1630 = vmatmul.bf16.gmra.mxu0 %v1494_v6  ;;  %v1495_v14 = vshrl.u32 %v6011_v4, 16  ;;  %v1507_v6 = vshll.u32 %v6060_v3, 16 }
  0xe9   : > { %1020 = vmatmul.bf16.gmra.mxu2 %v908_v29  ;;  %1273 = vmatmul.bf16.gmra.mxu3 %v5082_v25  ;;  %v1503_v25 = vshrl.u32 %v6037_v30, 16  ;;  %v5134_v29 = vld [vmem:[#allocation2 + $0x180] sm:$0xff] }
  0xea   : > { %v1497_v43 = vor.u32 %v1495_v14, %v1493_v27  ;;  %v1509_v32 = vrot.slane %v1507_v6, 1  ;;  %2045 = vmatpush.bf16.msra.mxu2 %v5134_v29 }
  0xeb   : > { %v1505_v31 = vor.u32 %v1503_v25, %v1501_v49 }
  0xec   : > { %v6039_v33 = vpop.f32.mrf.mxu2  ;;  %v6041_v34 = vpop.f32.mrf.mxu3  ;;  %v1502_v61 = vsel %vm512_vm0, %v1497_v43, %v1501_v49  ;;  %v912_v49 = vsel %vm891_vm1, %v909_v50, %v911_v37 }
  0xed   : > { %v6043_v12 = vpop.f32.mrf.mxu0  ;;  %v6045_v35 = vpop.f32.mrf.mxu1 }
  0xf4   : > { %v6050_v55 = vpop.f32.mrf.mxu2  ;;  %v6052_v52 = vpop.f32.mrf.mxu3 }
  0xf5   : > { %v811_v57 = vpop.f32.mrf.mxu1  ;;  %v1596_v9 = vpop.f32.mrf.mxu0 }
  0xf6   : > { %v812_v1 = vadd.f32 %v811_v57, %v5976_v38 }
  0xf8   : > { %850 = vmatmul.bf16.gmra.mxu1 %v5883_v53  ;;  %1635 = vmatmul.bf16.gmra.mxu0 %v1502_v61  ;;  %v5153_v53 = vld [vmem:[#allocation2 + $0x1c0] sm:$0xff]  ;;  %v5084_v61 = vld [vmem:[%s5825_s29 + $0x54] sm:$0xff] }
  0xf9   : > { %1025 = vmatmul.bf16.gmra.mxu2 %v910_v2  ;;  %1278 = vmatmul.bf16.gmra.mxu3 %v5083_v58 }
  0xfa   : > { %2402 = vmatpush.bf16.msra.mxu3 %v5153_v53 }
  0xfc   : > { %v986_v10 = vpop.f32.mrf.mxu2  ;;  %v1239_v17 = vpop.f32.mrf.mxu3 }
  0xfd   : > { %v1046_v7 = vadd.f32 %v986_v10, %v812_v1  ;;  %v813_v19 = vpop.f32.mrf.mxu1  ;;  %v1598_v27 = vpop.f32.mrf.mxu0  ;;  %v5114_v10 = vld [vmem:[#allocation2 + $0x140] sm:$0xff] }
  0xfe   : > { %v814_v38 = vadd.f32 %v813_v19, %v5991_v47  ;;  %v1510_v47 = vsel %vm512_vm0, %v1505_v31, %v1509_v32  ;;  %1792 = vmatpush.bf16.msra.mxu1 %v5114_v10 }
  0xff   : > { %v1299_v20 = vadd.f32 %v1239_v17, %v1046_v7  ;;  %v5161_v17 = vld [vmem:[#allocation2 + $0x200] sm:$0xff] }
 0x100   : > { %2600 = vmatpush.bf16.msra.mxu0 %v5161_v17 }
 0x101   : > { %v6065_v14 = vadd.f32 %v1596_v9, %v1299_v20  ;;  %v5105_v9 = vld [vmem:[%s5825_s29 + $0x64] sm:$0xff] }
 0x102   : > { %v1515_v20 = vshll.u32 %v5105_v9, 16 }
 0x104   : > { %v988_v41 = vpop.f32.mrf.mxu2  ;;  %v1241_v42 = vpop.f32.mrf.mxu3  ;;  %v1517_v31 = vrot.slane %v1515_v20, 1  ;;  %v5200_v20 = vld [vmem:[#allocation6 + $0xf4] sm:$0xf0] }
 0x105   : > { %v1047_v43 = vadd.f32 %v988_v41, %v814_v38  ;;  %v816_v57 = vpop.f32.mrf.mxu1  ;;  %v1601_v58 = vpop.f32.mrf.mxu0  ;;  %v1511_v38 = vshrl.u32 %v6060_v3, 16 }
 0x106   : > { %v817_v1 = vadd.f32 %v816_v57, %v6002_v62 }
 0x107   : > { %v1300_v2 = vadd.f32 %v1241_v42, %v1047_v43  ;;  %v1513_v53 = vor.u32 %v1511_v38, %v1509_v32  ;;  %v1347_v42 = vld [vmem:[%s5825_s29 + $0x6c] sm:$0x1] }
 0x108   : > { %855 = vmatmul.bf16.gmra.mxu1 %v5837_v8  ;;  %1640 = vmatmul.bf16.gmra.mxu0 %v1510_v47  ;;  %v1413_v10 = vunpack.c.l.b16 %v1347_v42 }
 0x109   : > { %1030 = vmatmul.bf16.gmra.mxu2 %v912_v49  ;;  %1283 = vmatmul.bf16.gmra.mxu3 %v5084_v61  ;;  %v6074_v7 = vadd.f32 %v1598_v27, %v1300_v2  ;;  %v913_v27 = vrot.slane %v5886_v54, 1  ;;  %v5085_v49 = vld [vmem:[%s5825_s29 + $0x5c] sm:$0xff]  ;;  %v1518_v2 = vsel %vm512_vm0, %v1513_v53, %v1517_v31 }
 0x10c   : > { %v991_v19 = vpop.f32.mrf.mxu2  ;;  %v1244_v25 = vpop.f32.mrf.mxu3 }
 0x10d   : > { %v1048_v6 = vadd.f32 %v991_v19, %v817_v1  ;;  %v818_v62 = vpop.f32.mrf.mxu1  ;;  %v1603_v50 = vpop.f32.mrf.mxu0  ;;  %v5197_v19 = vld [vmem:[#allocation6 + $0xe4] sm:$0xf] }
 0x10e   : > { %v819_v8 = vadd.f32 %v818_v62, %v6017_v13  ;;  %v914_v13 = vsel %vm891_vm1, %v911_v37, %v913_v27 }
 0x10f   : > { %v1301_v29 = vadd.f32 %v1244_v25, %v1048_v6  ;;  %v4898_v25 = vld [vmem:[#allocation6 + $0xf0] sm:$0xf0]  ;;  %v4904_v6 = vld [vmem:[#allocation6 + $0xe8] sm:$0xf] }
 0x110   : > { %v4901_v38 = vor.u32 %v5197_v19, %v4898_v25 }
 0x111   : > { %v6078_v41 = vadd.f32 %v1601_v58, %v1301_v29  ;;  %v6087_v58 = vpack.c.b16 %v1413_v10, %v1413_v10  ;;  %v4906_v10 = vld [vmem:[#allocation6 + $0xf8] sm:$0xf0] }
 0x112   : > { %3021 = vmatpush.bf16.msrb.mxu2 %v4901_v38 }
 0x114   : > { %v993_v43 = vpop.f32.mrf.mxu2  ;;  %v1246_v57 = vpop.f32.mrf.mxu3 }
 0x115   : > { %v1049_v61 = vadd.f32 %v993_v43, %v819_v8  ;;  %v821_v47 = vpop.f32.mrf.mxu1  ;;  %v1606_v1 = vpop.f32.mrf.mxu0  ;;  %v4905_v8 = vor.u32 %v5200_v20, %v4904_v6  ;;  %v1523_v43 = vshll.u32 %v6087_v58, 16 }
 0x116   : > { %v822_v17 = vadd.f32 %v821_v47, %v6028_v22  ;;  %v4896_v47 = vld [vmem:[#allocation6 + $0xe0] sm:$0xf] }
 0x117   : > { %v1302_v32 = vadd.f32 %v1246_v57, %v1049_v61  ;;  %3090 = vmatpush.bf16.msrb.mxu3 %v4905_v8  ;;  %v5086_v8 = vld [vmem:[%s5825_s29 + $0x64] sm:$0xff] }
 0x118   : > { %860 = vmatmul.bf16.gmra.mxu1 %v5852_v16  ;;  %1645 = vmatmul.bf16.gmra.mxu0 %v1518_v2  ;;  %v1519_v16 = vshrl.u32 %v5105_v9, 16  ;;  %v915_v9 = vrot.slane %v5901_v39, 1 }
 0x119   : > { %1035 = vmatmul.bf16.gmra.mxu2 %v914_v13  ;;  %1288 = vmatmul.bf16.gmra.mxu3 %v5085_v49  ;;  %v6089_v62 = vadd.f32 %v1603_v50, %v1302_v32  ;;  %v5199_v49 = vld [vmem:[#allocation6 + $0xec] sm:$0xf0]  ;;  %v5198_v50 = vld [vmem:[#allocation6 + $0xec] sm:$0xf]  ;;  %v1525_v32 = vrot.slane %v1523_v43, 1 }
 0x11a   : > { %v4897_v2 = vor.u32 %v5199_v49, %v4896_v47  ;;  %v1521_v13 = vor.u32 %v1519_v16, %v1517_v31  ;;  %v5245_v43 = vld [vmem:[%s5825_s29 + $0x18] sm:$0xf0] }
 0x11c   : > { %v996_v29 = vpop.f32.mrf.mxu2  ;;  %v1249_v22 = vpop.f32.mrf.mxu3  ;;  %2952 = vmatpush.bf16.msrb.mxu1 %v4897_v2  ;;  %v1526_v31 = vsel %vm512_vm0, %v1521_v13, %v1525_v32 }
 0x11d   : > { %v1050_v37 = vadd.f32 %v996_v29, %v822_v17  ;;  %v823_v53 = vpop.f32.mrf.mxu1  ;;  %v1608_v42 = vpop.f32.mrf.mxu0  ;;  %v4909_v17 = vor.u32 %v5198_v50, %v4906_v10  ;;  %v5469_v29 = vld [vmem:[%s5825_s29 + $0xc] sm:$0xe] }
 0x11e   : > { %v824_v57 = vadd.f32 %v823_v53, %v6043_v12  ;;  %v6105_v53 = vld [vmem:[%s5825_s29 + $0x20] sm:$0xff] }
 0x11f   : > { %v1303_v61 = vadd.f32 %v1249_v22, %v1050_v37  ;;  %3159 = vmatpush.bf16.msrb.mxu0 %v4909_v17  ;;  %v916_v22 = vsel %vm891_vm1, %v913_v27, %v915_v9  ;;  %v5244_v37 = vld [vmem:[%s5825_s29 + $0x18] sm:$0xff]   ;;  %v5470_v27 = vor.u32 %v5469_v29, %v5910_v56  ;;  %v5193_v9 = vld [vmem:[#allocation6 + $0xc4] sm:$0xf]  ;;  %v2509_v56 = vrot.slane %v6105_v53, 1 }
 0x120   : > { %v2238_v16 = vshll.u32 %v5244_v37, 16  ;;  %v2236_v13 = vshrl.u32 %v5244_v37, 16 }
 0x121   : > { %v6093_v19 = vadd.f32 %v1606_v1, %v1303_v61 }
 0x122   : > { %v2240_v32 = vrot.slane %v2238_v16, 1 }
 0x124   : > { %v998_v25 = vpop.f32.mrf.mxu2  ;;  %v1251_v12 = vpop.f32.mrf.mxu3 }
 0x125   : > { %v1051_v6 = vadd.f32 %v998_v25, %v824_v57  ;;  %v826_v38 = vpop.f32.mrf.mxu1  ;;  %v1611_v20 = vpop.f32.mrf.mxu0  ;;  %v5246_v57 = vld [vmem:[%s5825_s29 + $0x18] sm:$0xe] }
 0x126   : > { %v827_v61 = vadd.f32 %v826_v38, %v5978_v40  ;;  %v4882_v25 = vld [vmem:[#allocation6 + $0xd0] sm:$0xf0]  ;;  %v5196_v38 = vld [vmem:[#allocation6 + $0xd4] sm:$0xf0] }
 0x127   : > { %v1304_v1 = vadd.f32 %v1251_v12, %v1051_v6  ;;  %v4888_v12 = vld [vmem:[#allocation6 + $0xc8] sm:$0xf]  ;;  %v1700_v6 = vrot.slane %v5470_v27, 1  ;;  %v4885_v40 = vor.u32 %v5193_v9, %v4882_v25  ;;  %v5122_v27 = vld [vmem:[%s5825_s29 + $0x18] sm:$0xff] }
 0x128   : > { %865 = vmatmul.bf16.gmra.mxu1 %v5886_v54  ;;  %1650 = vmatmul.bf16.gmra.mxu0 %v1526_v31  ;;  %v5247_v54 = vor.u32 %v5246_v57, %v5245_v43  ;;  %v4889_v29 = vor.u32 %v5196_v38, %v4888_v12  ;;  %v6124_v9 = vld [vmem:[%s5825_s29 + $0x28] sm:$0xff] }
 0x129   : > { %1040 = vmatmul.bf16.gmra.mxu2 %v916_v22  ;;  %1293 = vmatmul.bf16.gmra.mxu3 %v5086_v8  ;;  %v6102_v39 = vadd.f32 %v1608_v42, %v1304_v1  ;;  %v2243_v42 = vshll.u32 %v6105_v53, 16  ;;  %v1701_v8 = vrot.slane %v5920_v18, 1  ;;  %v2241_v1 = vor.u32 %v2240_v32, %v2236_v13  ;;  %v4880_v13 = vld [vmem:[#allocation6 + $0xc0] sm:$0xf]  ;;  %v5195_v32 = vld [vmem:[#allocation6 + $0xcc] sm:$0xf0] }
 0x12a   : > { %v2508_v31 = vrot.slane %v5247_v54, 1  ;;  %3022 = vmatpush.bf16.msrb.mxu2 %v4885_v40  ;;  %3091 = vmatpush.bf16.msrb.mxu3 %v4889_v29 }
 0x12b   : > { %v2245_v37 = vrot.slane %v2243_v42, 1  ;;  %v4890_v42 = vld [vmem:[#allocation6 + $0xd8] sm:$0xf0] }
 0x12c   : > { %v1001_v47 = vpop.f32.mrf.mxu2  ;;  %v1254_v49 = vpop.f32.mrf.mxu3 }
 0x12d   : > { %v1052_v50 = vadd.f32 %v1001_v47, %v827_v61  ;;  %v828_v2 = vpop.f32.mrf.mxu1  ;;  %v1613_v10 = vpop.f32.mrf.mxu0 }
 0x12e   : > { %v829_v16 = vadd.f32 %v828_v2, %v5993_v48  ;;  %v4881_v48 = vor.u32 %v5195_v32, %v4880_v13  ;;  %v5194_v2 = vld [vmem:[#allocation6 + $0xcc] sm:$0xf]  ;;  %v5123_v32 = vld [vmem:[%s5825_s29 + $0x20] sm:$0xff] }
 0x12f   : > { %v1305_v17 = vadd.f32 %v1254_v49, %v1052_v50  ;;  %v1702_v49 = vsel %vm891_vm1, %v1700_v6, %v1701_v8  ;;  %v2510_v50 = vsel %vm891_vm1, %v2508_v31, %v2509_v56  ;;  %v4893_v25 = vor.u32 %v5194_v2, %v4890_v42 }
 0x130   : > { %2953 = vmatpush.bf16.msrb.mxu1 %v4881_v48 }
 0x131   : > { %v6114_v22 = vadd.f32 %v1611_v20, %v1305_v17  ;;  %v2246_v20 = vsel %vm512_vm0, %v2241_v1, %v2245_v37  ;;  %3160 = vmatpush.bf16.msrb.mxu0 %v4893_v25  ;;  %v2247_v1 = vshrl.u32 %v6105_v53, 16  ;;  %v6141_v25 = vld [vmem:[%s5825_s29 + $0x30] sm:$0xff] }
 0x134   : > { %v1003_v43 = vpop.f32.mrf.mxu2  ;;  %v1256_v57 = vpop.f32.mrf.mxu3 }
 0x135   : > { %v1053_v61 = vadd.f32 %v1003_v43, %v829_v16  ;;  %v831_v47 = vpop.f32.mrf.mxu1  ;;  %v1616_v18 = vpop.f32.mrf.mxu0  ;;  %v2251_v16 = vshll.u32 %v6124_v9, 16 }
 0x136   : > { %v832_v12 = vadd.f32 %v831_v47, %v6004_v0 }
 0x137   : > { %v1306_v54 = vadd.f32 %v1256_v57, %v1053_v61  ;;  %v2511_v57 = vrot.slane %v6124_v9, 1  ;;  %v2253_v0 = vrot.slane %v2251_v16, 1 }
 0x138   : > { %1793 = vmatmul.bf16.vlgmr.msra.gmra.mxu1 %v1702_v49  ;;  %2601 = vmatmul.bf16.vlgmr.msra.gmra.mxu0 %v2510_v50  ;;  %v2249_v49 = vor.u32 %v2247_v1, %v2245_v37  ;;  %v5189_v37 = vld [vmem:[#allocation6 + $0xa4] sm:$0xf] }
 0x139   : > { %2046 = vmatmul.bf16.vlgmr.msra.gmra.mxu2 %v5122_v27  ;;  %2403 = vmatmul.bf16.vlgmr.msra.gmra.mxu3 %v2246_v20  ;;  %v6121_v17 = vadd.f32 %v1613_v10, %v1306_v54  ;;  %v1703_v10 = vrot.slane %v5931_v36, 1  ;;  %v2512_v48 = vsel %vm891_vm1, %v2509_v56, %v2511_v57 }
 0x13a   : > { %v2254_v36 = vsel %vm512_vm0, %v2249_v49, %v2253_v0  ;;  %v2259_v49 = vshll.u32 %v6141_v25, 16 }
 0x13b   : > { %v1704_v53 = vsel %vm891_vm1, %v1701_v8, %v1703_v10 }
 0x13c   : > { %v1006_v6 = vpop.f32.mrf.mxu2  ;;  %v1259_v40 = vpop.f32.mrf.mxu3 }
 0x13d   : > { %v1054_v38 = vadd.f32 %v1006_v6, %v832_v12  ;;  %v833_v31 = vpop.f32.mrf.mxu1  ;;  %v1618_v29 = vpop.f32.mrf.mxu0  ;;  %v5192_v6 = vld [vmem:[#allocation6 + $0xb4] sm:$0xf0] }
 0x13e   : > { %v834_v47 = vadd.f32 %v833_v31, %v6019_v15  ;;  %v4866_v15 = vld [vmem:[#allocation6 + $0xb0] sm:$0xf0] }
 0x13f   : > { %v1307_v43 = vadd.f32 %v1259_v40, %v1054_v38  ;;  %v4869_v12 = vor.u32 %v5189_v37, %v4866_v15 }
 0x141   : > { %v6131_v61 = vadd.f32 %v1616_v18, %v1307_v43  ;;  %v4872_v18 = vld [vmem:[#allocation6 + $0xa8] sm:$0xf]  ;;  %3023 = vmatpush.bf16.msrb.mxu2 %v4869_v12  ;;  %v2255_v43 = vshrl.u32 %v6124_v9, 16 }
 0x142   : > { %v4873_v40 = vor.u32 %v5192_v6, %v4872_v18 }
 0x144   : > { %v1008_v27 = vpop.f32.mrf.mxu2  ;;  %v1261_v50 = vpop.f32.mrf.mxu3  ;;  %3092 = vmatpush.bf16.msrb.mxu3 %v4873_v40 }
 0x145   : > { %v1055_v20 = vadd.f32 %v1008_v27, %v834_v47  ;;  %v836_v54 = vpop.f32.mrf.mxu1  ;;  %v1621_v13 = vpop.f32.mrf.mxu0  ;;  %v4864_v47 = vld [vmem:[#allocation6 + $0xa0] sm:$0xf]  ;;  %v5191_v27 = vld [vmem:[#allocation6 + $0xac] sm:$0xf0] }
 0x146   : > { %v837_v8 = vadd.f32 %v836_v54, %v6030_v24  ;;  %v1705_v24 = vrot.slane %v5941_v46, 1  ;;  %v2513_v54 = vrot.slane %v6141_v25, 1  ;;  %v5124_v46 = vld [vmem:[%s5825_s29 + $0x28] sm:$0xff] }
 0x147   : > { %v1308_v2 = vadd.f32 %v1261_v50, %v1055_v20  ;;  %v5190_v50 = vld [vmem:[#allocation6 + $0xac] sm:$0xf]  ;;  %v4865_v20 = vor.u32 %v5191_v27, %v4864_v47  ;;  %v5185_v27 = vld [vmem:[#allocation6 + $0x84] sm:$0xf] }
 0x148   : > { %1798 = vmatmul.bf16.gmra.mxu1 %v1704_v53  ;;  %2606 = vmatmul.bf16.gmra.mxu0 %v2512_v48  ;;  %v4874_v53 = vld [vmem:[#allocation6 + $0xb8] sm:$0xf0]  ;;  %v2514_v40 = vsel %vm891_vm1, %v2511_v57, %v2513_v54  ;;  %v2263_v57 = vshrl.u32 %v6141_v25, 16 }
 0x149   : > { %2051 = vmatmul.bf16.gmra.mxu2 %v5123_v32  ;;  %2408 = vmatmul.bf16.gmra.mxu3 %v2254_v36  ;;  %v6138_v42 = vadd.f32 %v1618_v29, %v1308_v2  ;;  %v4877_v32 = vor.u32 %v5190_v50, %v4874_v53  ;;  %v2257_v36 = vor.u32 %v2255_v43, %v2253_v0  ;;  %v2261_v2 = vrot.slane %v2259_v49, 1  ;;  %v6158_v0 = vld [vmem:[%s5825_s29 + $0x38] sm:$0xff] }
 0x14a   : > { %2954 = vmatpush.bf16.msrb.mxu1 %v4865_v20  ;;  %v4850_v50 = vld [vmem:[#allocation6 + $0x90] sm:$0xf0]  ;;  %v4856_v20 = vld [vmem:[#allocation6 + $0x88] sm:$0xf] }
 0x14b   : > { %3161 = vmatpush.bf16.msrb.mxu0 %v4877_v32  ;;  %v4853_v53 = vor.u32 %v5185_v27, %v4850_v50  ;;  %v1707_v32 = vrot.slane %v5951_v63, 1  ;;  %v5125_v63 = vld [vmem:[%s5825_s29 + $0x30] sm:$0xff] }
 0x14c   : > { %v1011_v56 = vpop.f32.mrf.mxu2  ;;  %v1264_v38 = vpop.f32.mrf.mxu3 }
 0x14d   : > { %v1056_v31 = vadd.f32 %v1011_v56, %v837_v8  ;;  %v838_v1 = vpop.f32.mrf.mxu1  ;;  %v1623_v16 = vpop.f32.mrf.mxu0  ;;  %v1706_v8 = vsel %vm891_vm1, %v1703_v10, %v1705_v24  ;;  %3024 = vmatpush.bf16.msrb.mxu2 %v4853_v53  ;;  %v2271_v53 = vshrl.u32 %v6158_v0, 16 }
 0x14e   : > { %v839_v9 = vadd.f32 %v838_v1, %v6045_v35 }
 0x14f   : > { %v1309_v29 = vadd.f32 %v1264_v38, %v1056_v31 }
 0x151   : > { %v6148_v48 = vadd.f32 %v1621_v13, %v1309_v29  ;;  %v2262_v13 = vsel %vm512_vm0, %v2257_v36, %v2261_v2  ;;  %v2267_v29 = vshll.u32 %v6158_v0, 16 }
 0x154   : > { %v1013_v37 = vpop.f32.mrf.mxu2  ;;  %v1266_v15 = vpop.f32.mrf.mxu3 }
 0x155   : > { %v1057_v18 = vadd.f32 %v1013_v37, %v839_v9  ;;  %v841_v12 = vpop.f32.mrf.mxu1  ;;  %v1626_v6 = vpop.f32.mrf.mxu0  ;;  %v2265_v37 = vor.u32 %v2263_v57, %v2261_v2  ;;  %v4848_v2 = vld [vmem:[#allocation6 + $0x80] sm:$0xf] }
 0x156   : > { %v842_v38 = vadd.f32 %v841_v12, %v5987_v45  ;;  %v2515_v45 = vrot.slane %v6158_v0, 1  ;;  %v6175_v57 = vld [vmem:[%s5825_s29 + $0x40] sm:$0xff] }
 0x157   : > { %v1310_v56 = vadd.f32 %v1266_v15, %v1057_v18  ;;  %v2269_v15 = vrot.slane %v2267_v29, 1 }
 0x158   : > { %1803 = vmatmul.bf16.gmra.mxu1 %v1706_v8  ;;  %2611 = vmatmul.bf16.gmra.mxu0 %v2514_v40 }
 0x159   : > { %2056 = vmatmul.bf16.gmra.mxu2 %v5124_v46  ;;  %2413 = vmatmul.bf16.gmra.mxu3 %v2262_v13  ;;  %v6155_v35 = vadd.f32 %v1623_v16, %v1310_v56  ;;  %v5188_v16 = vld [vmem:[#allocation6 + $0x94] sm:$0xf0]  ;;  %v1708_v13 = vsel %vm891_vm1, %v1705_v24, %v1707_v32  ;;  %v2516_v56 = vsel %vm891_vm1, %v2513_v54, %v2515_v45 }
 0x15a   : > { %v4857_v36 = vor.u32 %v5188_v16, %v4856_v20  ;;  %v2275_v16 = vshll.u32 %v6175_v57, 16 }
 0x15c   : > { %v1016_v31 = vpop.f32.mrf.mxu2  ;;  %v1269_v1 = vpop.f32.mrf.mxu3  ;;  %3093 = vmatpush.bf16.msrb.mxu3 %v4857_v36 }
 0x15d   : > { %v1058_v43 = vadd.f32 %v1016_v31, %v842_v38  ;;  %v843_v10 = vpop.f32.mrf.mxu1  ;;  %v1628_v49 = vpop.f32.mrf.mxu0  ;;  %v5187_v31 = vld [vmem:[#allocation6 + $0x8c] sm:$0xf0] }
 0x15e   : > { %v844_v25 = vadd.f32 %v843_v10, %v5998_v59  ;;  %v4849_v59 = vor.u32 %v5187_v31, %v4848_v2 }
 0x15f   : > { %v1311_v47 = vadd.f32 %v1269_v1, %v1058_v43  ;;  %v5186_v1 = vld [vmem:[#allocation6 + $0x8c] sm:$0xf]  ;;  %v4858_v43 = vld [vmem:[#allocation6 + $0x98] sm:$0xf0] }
 0x160   : > { %2955 = vmatpush.bf16.msrb.mxu1 %v4849_v59  ;;  %v4861_v24 = vor.u32 %v5186_v1, %v4858_v43  ;;  %v6192_v59 = vld [vmem:[%s5825_s29 + $0x48] sm:$0xff]  ;;  %v5184_v43 = vld [vmem:[#allocation6 + $0x74] sm:$0xf0] }
 0x161   : > { %v6165_v9 = vadd.f32 %v1626_v6, %v1311_v47  ;;  %v2270_v6 = vsel %vm512_vm0, %v2265_v37, %v2269_v15  ;;  %v2517_v37 = vrot.slane %v6175_v57, 1 }
 0x162   : > { %3162 = vmatpush.bf16.msrb.mxu0 %v4861_v24 }
 0x164   : > { %v1018_v18 = vpop.f32.mrf.mxu2  ;;  %v1271_v12 = vpop.f32.mrf.mxu3 }
 0x165   : > { %v1059_v8 = vadd.f32 %v1018_v18, %v844_v25  ;;  %v846_v46 = vpop.f32.mrf.mxu1  ;;  %v1631_v40 = vpop.f32.mrf.mxu0  ;;  %v2273_v18 = vor.u32 %v2271_v53, %v2269_v15  ;;  %v5181_v15 = vld [vmem:[#allocation6 + $0x64] sm:$0xf]  ;;  %v2283_v53 = vshll.u32 %v6192_v59, 16 }
 0x166   : > { %v847_v54 = vadd.f32 %v846_v46, %v6013_v11  ;;  %v2277_v11 = vrot.slane %v2275_v16, 1  ;;  %v4832_v16 = vld [vmem:[#allocation6 + $0x60] sm:$0xf] }
 0x167   : > { %v1312_v38 = vadd.f32 %v1271_v12, %v1059_v8 }
 0x168   : > { %1808 = vmatmul.bf16.gmra.mxu1 %v1708_v13  ;;  %2616 = vmatmul.bf16.gmra.mxu0 %v2516_v56 }
 0x169   : > { %2061 = vmatmul.bf16.gmra.mxu2 %v5125_v63  ;;  %2418 = vmatmul.bf16.gmra.mxu3 %v2270_v6  ;;  %v6172_v10 = vadd.f32 %v1628_v49, %v1312_v38  ;;  %v1709_v49 = vrot.slane %v5961_v23, 1  ;;  %v5126_v6 = vld [vmem:[%s5825_s29 + $0x38] sm:$0xff]  ;;  %v2518_v38 = vsel %vm891_vm1, %v2515_v45, %v2517_v37  ;;  %v2278_v23 = vsel %vm512_vm0, %v2273_v18, %v2277_v11  ;;  %v5182_v18 = vld [vmem:[#allocation6 + $0x6c] sm:$0xf] }
 0x16b   : > { %v1710_v0 = vsel %vm891_vm1, %v1707_v32, %v1709_v49 }
 0x16c   : > { %v1021_v29 = vpop.f32.mrf.mxu2  ;;  %v1274_v47 = vpop.f32.mrf.mxu3 }
 0x16d   : > { %v1060_v27 = vadd.f32 %v1021_v29, %v847_v54  ;;  %v848_v50 = vpop.f32.mrf.mxu1  ;;  %v1633_v20 = vpop.f32.mrf.mxu0 }
 0x16e   : > { %v849_v12 = vadd.f32 %v848_v50, %v6024_v21  ;;  %v4834_v21 = vld [vmem:[#allocation6 + $0x70] sm:$0xf0]  ;;  %v2279_v50 = vshrl.u32 %v6175_v57, 16 }
 0x16f   : > { %v1313_v36 = vadd.f32 %v1274_v47, %v1060_v27  ;;  %v4837_v1 = vor.u32 %v5181_v15, %v4834_v21 }
 0x171   : > { %v6182_v25 = vadd.f32 %v1631_v40, %v1313_v36  ;;  %v4840_v40 = vld [vmem:[#allocation6 + $0x68] sm:$0xf]  ;;  %3025 = vmatpush.bf16.msrb.mxu2 %v4837_v1  ;;  %v5183_v36 = vld [vmem:[#allocation6 + $0x6c] sm:$0xf0] }
 0x172   : > { %v4841_v24 = vor.u32 %v5184_v43, %v4840_v40 }
 0x174   : > { %v1023_v8 = vpop.f32.mrf.mxu2  ;;  %v1276_v46 = vpop.f32.mrf.mxu3  ;;  %3094 = vmatpush.bf16.msrb.mxu3 %v4841_v24 }
 0x175   : > { %v1061_v13 = vadd.f32 %v1023_v8, %v849_v12  ;;  %v851_v63 = vpop.f32.mrf.mxu1  ;;  %v1636_v56 = vpop.f32.mrf.mxu0  ;;  %v4833_v12 = vor.u32 %v5183_v36, %v4832_v16  ;;  %v4842_v8 = vld [vmem:[#allocation6 + $0x78] sm:$0xf0]  ;;  %v4824_v16 = vld [vmem:[#allocation6 + $0x48] sm:$0xf] }
 0x176   : > { %v852_v32 = vadd.f32 %v851_v63, %v6039_v33  ;;  %v1711_v33 = vrot.slane %v5971_v26, 1  ;;  %v5127_v26 = vld [vmem:[%s5825_s29 + $0x40] sm:$0xff] }
 0x177   : > { %v1314_v2 = vadd.f32 %v1276_v46, %v1061_v13  ;;  %v2519_v46 = vrot.slane %v6192_v59, 1  ;;  %v4845_v13 = vor.u32 %v5182_v18, %v4842_v8  ;;  %2956 = vmatpush.bf16.msrb.mxu1 %v4833_v12  ;;  %v1713_v18 = vrot.slane %v5985_v44, 1  ;;  %v5128_v44 = vld [vmem:[%s5825_s29 + $0x48] sm:$0xff] }
 0x178   : > { %1813 = vmatmul.bf16.gmra.mxu1 %v1710_v0  ;;  %2621 = vmatmul.bf16.gmra.mxu0 %v2518_v38  ;;  %v2281_v0 = vor.u32 %v2279_v50, %v2277_v11  ;;  %v1712_v40 = vsel %vm891_vm1, %v1709_v49, %v1711_v33  ;;  %v6209_v11 = vld [vmem:[%s5825_s29 + $0x50] sm:$0xff] }
 0x179   : > { %2066 = vmatmul.bf16.gmra.mxu2 %v5126_v6  ;;  %2423 = vmatmul.bf16.gmra.mxu3 %v2278_v23  ;;  %v6189_v31 = vadd.f32 %v1633_v20, %v1314_v2  ;;  %v2285_v6 = vrot.slane %v2283_v53, 1  ;;  %v2520_v1 = vsel %vm891_vm1, %v2517_v37, %v2519_v46  ;;  %v2287_v37 = vshrl.u32 %v6192_v59, 16  ;;  %v5177_v53 = vld [vmem:[#allocation6 + $0x44] sm:$0xf] }
 0x17a   : > { %3163 = vmatpush.bf16.msrb.mxu0 %v4845_v13 }
 0x17b   : > { %v2289_v13 = vor.u32 %v2287_v37, %v2285_v6 }
 0x17c   : > { %v1026_v45 = vpop.f32.mrf.mxu2  ;;  %v1279_v54 = vpop.f32.mrf.mxu3 }
 0x17d   : > { %v1062_v29 = vadd.f32 %v1026_v45, %v852_v32  ;;  %v853_v47 = vpop.f32.mrf.mxu1  ;;  %v1638_v27 = vpop.f32.mrf.mxu0 }
 0x17e   : > { %v854_v57 = vadd.f32 %v853_v47, %v6050_v55  ;;  %v2291_v47 = vshll.u32 %v6209_v11, 16 }
 0x17f   : > { %v1315_v20 = vadd.f32 %v1279_v54, %v1062_v29 }
 0x181   : > { %v6199_v63 = vadd.f32 %v1636_v56, %v1315_v20  ;;  %v2286_v56 = vsel %vm512_vm0, %v2281_v0, %v2285_v6  ;;  %v4818_v20 = vld [vmem:[#allocation6 + $0x50] sm:$0xf0]  ;;  %v2293_v0 = vrot.slane %v2291_v47, 1  ;;  %v4816_v6 = vld [vmem:[#allocation6 + $0x40] sm:$0xf] }
 0x182   : > { %v4821_v36 = vor.u32 %v5177_v53, %v4818_v20  ;;  %v2295_v53 = vshrl.u32 %v6209_v11, 16 }
 0x184   : > { %v1028_v38 = vpop.f32.mrf.mxu2  ;;  %v1281_v23 = vpop.f32.mrf.mxu3  ;;  %3026 = vmatpush.bf16.msrb.mxu2 %v4821_v36 }
 0x185   : > { %v1063_v2 = vadd.f32 %v1028_v38, %v854_v57  ;;  %v856_v15 = vpop.f32.mrf.mxu1  ;;  %v1641_v21 = vpop.f32.mrf.mxu0 }
 0x186   : > { %v857_v32 = vadd.f32 %v856_v15, %v5989_v5  ;;  %v2521_v5 = vrot.slane %v6209_v11, 1 }
 0x187   : > { %v1316_v43 = vadd.f32 %v1281_v23, %v1063_v2 }
 0x188   : > { %1818 = vmatmul.bf16.gmra.mxu1 %v1712_v40  ;;  %2626 = vmatmul.bf16.gmra.mxu0 %v2520_v1  ;;  %v1714_v40 = vsel %vm891_vm1, %v1711_v33, %v1713_v18 }
 0x189   : > { %2071 = vmatmul.bf16.gmra.mxu2 %v5127_v26  ;;  %2428 = vmatmul.bf16.gmra.mxu3 %v2286_v56  ;;  %v6206_v55 = vadd.f32 %v1638_v27, %v1316_v43  ;;  %v5180_v27 = vld [vmem:[#allocation6 + $0x54] sm:$0xf0]  ;;  %v2522_v26 = vsel %vm891_vm1, %v2519_v46, %v2521_v5  ;;  %v5179_v56 = vld [vmem:[#allocation6 + $0x4c] sm:$0xf0]  ;;  %v5178_v43 = vld [vmem:[#allocation6 + $0x4c] sm:$0xf] }
 0x18a   : > { %v4825_v12 = vor.u32 %v5180_v27, %v4824_v16 }
 0x18c   : > { %v1031_v24 = vpop.f32.mrf.mxu2  ;;  %v1284_v45 = vpop.f32.mrf.mxu3  ;;  %3095 = vmatpush.bf16.msrb.mxu3 %v4825_v12  ;;  %v2297_v12 = vor.u32 %v2295_v53, %v2293_v0 }
 0x18d   : > { %v1064_v54 = vadd.f32 %v1031_v24, %v857_v32  ;;  %v858_v49 = vpop.f32.mrf.mxu1  ;;  %v1643_v29 = vpop.f32.mrf.mxu0  ;;  %v4826_v32 = vld [vmem:[#allocation6 + $0x58] sm:$0xf0] }
 0x18e   : > { %v859_v59 = vadd.f32 %v858_v49, %v6000_v60  ;;  %v4817_v60 = vor.u32 %v5179_v56, %v4816_v6  ;;  %v4829_v33 = vor.u32 %v5178_v43, %v4826_v32  ;;  %v5173_v32 = vld [vmem:[#allocation6 + $0x24] sm:$0xf] }
 0x18f   : > { %v1317_v50 = vadd.f32 %v1284_v45, %v1064_v54  ;;  %v6226_v45 = vld [vmem:[%s5825_s29 + $0x58] sm:$0xff] }
 0x190   : > { %2957 = vmatpush.bf16.msrb.mxu1 %v4817_v60  ;;  %3164 = vmatpush.bf16.msrb.mxu0 %v4829_v33  ;;  %v2299_v20 = vshll.u32 %v6226_v45, 16  ;;  %v2523_v36 = vrot.slane %v6226_v45, 1  ;;  %v4802_v33 = vld [vmem:[#allocation6 + $0x30] sm:$0xf0] }
 0x191   : > { %v6216_v8 = vadd.f32 %v1641_v21, %v1317_v50  ;;  %v2294_v21 = vsel %vm512_vm0, %v2289_v13, %v2293_v0 }
 0x194   : > { %v1033_v57 = vpop.f32.mrf.mxu2  ;;  %v1286_v38 = vpop.f32.mrf.mxu3 }
 0x195   : > { %v1065_v23 = vadd.f32 %v1033_v57, %v859_v59  ;;  %v861_v2 = vpop.f32.mrf.mxu1  ;;  %v1646_v15 = vpop.f32.mrf.mxu0 }
 0x196   : > { %v862_v46 = vadd.f32 %v861_v2, %v6015_v51  ;;  %v2301_v51 = vrot.slane %v2299_v20, 1 }
 0x197   : > { %v1318_v1 = vadd.f32 %v1286_v38, %v1065_v23 }
 0x198   : > { %1823 = vmatmul.bf16.gmra.mxu1 %v1714_v40  ;;  %2631 = vmatmul.bf16.gmra.mxu0 %v2522_v26  ;;  %v5129_v40 = vld [vmem:[%s5825_s29 + $0x50] sm:$0xff] }
 0x199   : > { %2076 = vmatmul.bf16.gmra.mxu2 %v5128_v44  ;;  %2433 = vmatmul.bf16.gmra.mxu3 %v2294_v21  ;;  %v6223_v24 = vadd.f32 %v1643_v29, %v1318_v1  ;;  %v1715_v29 = vrot.slane %v6011_v4, 1  ;;  %v2524_v44 = vsel %vm891_vm1, %v2521_v5, %v2523_v36  ;;  %v2302_v4 = vsel %vm512_vm0, %v2297_v12, %v2301_v51 }
 0x19a   : > { %v2303_v5 = vshrl.u32 %v6226_v45, 16 }
 0x19b   : > { %v1716_v11 = vsel %vm891_vm1, %v1713_v18, %v1715_v29 }
 0x19c   : > { %v1036_v54 = vpop.f32.mrf.mxu2  ;;  %v1289_v49 = vpop.f32.mrf.mxu3  ;;  %v2305_v53 = vor.u32 %v2303_v5, %v2301_v51 }
 0x19d   : > { %v1066_v37 = vadd.f32 %v1036_v54, %v862_v46  ;;  %v863_v47 = vpop.f32.mrf.mxu1  ;;  %v1648_v50 = vpop.f32.mrf.mxu0  ;;  %v4808_v46 = vld [vmem:[#allocation6 + $0x28] sm:$0xf]  ;;  %v4805_v54 = vor.u32 %v5173_v32, %v4802_v33 }
 0x19e   : > { %v864_v13 = vadd.f32 %v863_v47, %v6026_v28  ;;  %v6243_v28 = vld [vmem:[%s5825_s29 + $0x60] sm:$0xff] }
 0x19f   : > { %v1319_v16 = vadd.f32 %v1289_v49, %v1066_v37  ;;  %v2307_v60 = vshll.u32 %v6243_v28, 16  ;;  %v5176_v49 = vld [vmem:[#allocation6 + $0x34] sm:$0xf0]  ;;  %v1717_v37 = vrot.slane %v6037_v30, 1  ;;  %3027 = vmatpush.bf16.msrb.mxu2 %v4805_v54 }
 0x1a0   : > { %v4809_v47 = vor.u32 %v5176_v49, %v4808_v46 }
 0x1a1   : > { %v6233_v27 = vadd.f32 %v1646_v15, %v1319_v16  ;;  %v2309_v20 = vrot.slane %v2307_v60, 1  ;;  %v1718_v30 = vsel %vm891_vm1, %v1715_v29, %v1717_v37  ;;  %v2311_v60 = vshrl.u32 %v6243_v28, 16 }
 0x1a2   : > { %3096 = vmatpush.bf16.msrb.mxu3 %v4809_v47 }
 0x1a3   : > { %v2310_v51 = vsel %vm512_vm0, %v2305_v53, %v2309_v20  ;;  %v2313_v46 = vor.u32 %v2311_v60, %v2309_v20  ;;  %v4784_v60 = vld [vmem:[#allocation6] sm:$0xf] }
 0x1a4   : > { %v1038_v59 = vpop.f32.mrf.mxu2  ;;  %v1291_v57 = vpop.f32.mrf.mxu3 }
 0x1a5   : > { %v1067_v38 = vadd.f32 %v1038_v59, %v864_v13  ;;  %v866_v23 = vpop.f32.mrf.mxu1  ;;  %v1651_v2 = vpop.f32.mrf.mxu0  ;;  %v5130_v13 = vld [vmem:[%s5825_s29 + $0x58] sm:$0xff] }
 0x1a6   : > { %v867_v15 = vadd.f32 %v866_v23, %v6041_v34  ;;  %v2525_v34 = vrot.slane %v6243_v28, 1 }
 0x1a7   : > { %v1320_v26 = vadd.f32 %v1291_v57, %v1067_v38 }
 0x1a8   : > { %1828 = vmatmul.bf16.gmra.mxu1 %v1716_v11  ;;  %2636 = vmatmul.bf16.gmra.mxu0 %v2524_v44  ;;  %v2526_v23 = vsel %vm891_vm1, %v2523_v36, %v2525_v34  ;;  %v4800_v11 = vld [vmem:[#allocation6 + $0x20] sm:$0xf] }
 0x1a9   : > { %2081 = vmatmul.bf16.gmra.mxu2 %v5129_v40  ;;  %2438 = vmatmul.bf16.gmra.mxu3 %v2302_v4  ;;  %v6240_v0 = vadd.f32 %v1648_v50, %v1320_v26  ;;  %v5174_v40 = vld [vmem:[#allocation6 + $0x2c] sm:$0xf]  ;;  %v4810_v4 = vld [vmem:[#allocation6 + $0x38] sm:$0xf0] }
 0x1aa   : > { %v4813_v26 = vor.u32 %v5174_v40, %v4810_v4 }
 0x1ac   : > { %v1041_v21 = vpop.f32.mrf.mxu2  ;;  %v1294_v1 = vpop.f32.mrf.mxu3  ;;  %3165 = vmatpush.bf16.msrb.mxu0 %v4813_v26 }
 0x1ad   : > { %v1068_v6 = vadd.f32 %v1041_v21, %v867_v15  ;;  %v868_v18 = vpop.f32.mrf.mxu1  ;;  %v1653_v56 = vpop.f32.mrf.mxu0  ;;  %v6260_v21 = vld [vmem:[%s5825_s29 + $0x68] sm:$0xff] }
 0x1ae   : > { %v869_v45 = vadd.f32 %v868_v18, %v6052_v52  ;;  %v2527_v33 = vrot.slane %v6260_v21, 1 }
 0x1af   : > { %v1321_v43 = vadd.f32 %v1294_v1, %v1068_v6 }
 0x1b0   : > { %v2528_v20 = vsel %vm891_vm1, %v2525_v34, %v2527_v33 }
 0x1b1   : > { %v6250_v50 = vadd.f32 %v1651_v2, %v1321_v43  ;;  %v5175_v2 = vld [vmem:[#allocation6 + $0x2c] sm:$0xf0]  ;;  %v2315_v43 = vshll.u32 %v6260_v21, 16 }
 0x1b2   : > { %v4801_v44 = vor.u32 %v5175_v2, %v4800_v11  ;;  %v4792_v11 = vld [vmem:[#allocation6 + $0x8] sm:$0xf] }
 0x1b3   : > { %v2317_v54 = vrot.slane %v2315_v43, 1  ;;  %v2319_v43 = vshrl.u32 %v6260_v21, 16 }
 0x1b4   : > { %v1043_v16 = vpop.f32.mrf.mxu2  ;;  %v1296_v12 = vpop.f32.mrf.mxu3  ;;  %2958 = vmatpush.bf16.msrb.mxu1 %v4801_v44  ;;  %v6280_v44 = vld [vmem:[%s5825_s29 + $0x70] sm:$0xff] }
 0x1b5   : > { %v1069_v59 = vadd.f32 %v1043_v16, %v869_v45  ;;  %v1794_v57 = vpop.f32.mrf.mxu1  ;;  %v2602_v38 = vpop.f32.mrf.mxu0 }
 0x1b6   : > { %v1854_v29 = vadd.f32 %v1794_v57, %v6065_v14  ;;  %v6268_v14 = vld [vmem:[#allocation4] ss:$0 sm:$0xff]  ;;  %v5169_v57 = vld [vmem:[#allocation6 + $0x4] sm:$0xf] }
 0x1b7   : > { %v1322_v52 = vadd.f32 %v1296_v12, %v1069_v59  ;;  %v5131_v59 = vld [vmem:[%s5825_s29 + $0x60] sm:$0xff] }
 0x1b8   : > { %1833 = vmatmul.bf16.gmra.mxu1 %v1718_v30  ;;  %2641 = vmatmul.bf16.gmra.mxu0 %v2526_v23  ;;  %v2318_v30 = vsel %vm512_vm0, %v2313_v46, %v2317_v54 }
 0x1b9   : > { %2086 = vmatmul.bf16.gmra.mxu2 %v5130_v13  ;;  %2443 = vmatmul.bf16.gmra.mxu3 %v2310_v51  ;;  %v6257_v15 = vadd.f32 %v1653_v56, %v1322_v52  ;;  %v1719_v56 = vrot.slane %v6060_v3, 1 }
 0x1bb   : > { %v1720_v13 = vsel %vm891_vm1, %v1717_v37, %v1719_v56 }
 0x1bc   : > { %v2047_v36 = vpop.f32.mrf.mxu2  ;;  %v2404_v1 = vpop.f32.mrf.mxu3 }
 0x1bd   : > { %v2107_v6 = vadd.f32 %v2047_v36, %v1854_v29  ;;  %v1796_v18 = vpop.f32.mrf.mxu1  ;;  %v2604_v5 = vpop.f32.mrf.mxu0 }
 0x1be   : > { %v1855_v49 = vadd.f32 %v1796_v18, %v6074_v7  ;;  %v4786_v7 = vld [vmem:[#allocation6 + $0x10] sm:$0xf0] }
 0x1bf   : > { %v2464_v32 = vadd.f32 %v2404_v1, %v2107_v6  ;;  %v4789_v23 = vor.u32 %v5169_v57, %v4786_v7  ;;  %v2155_v7 = vld [vmem:[%s5825_s29 + $0x78] sm:$0x1] }
 0x1c1   : > { %v2662_v45 = vadd.f32 %v2602_v38, %v2464_v32  ;;  %v5172_v38 = vld [vmem:[#allocation6 + $0x14] sm:$0xf0]  ;;  %3028 = vmatpush.bf16.msrb.mxu2 %v4789_v23  ;;  %v2323_v32 = vshll.u32 %v6280_v44, 16 }
 0x1c2   : > { %v4793_v40 = vor.u32 %v5172_v38, %v4792_v11 }
 0x1c3   : > { %v2690_v51 = vadd.f32 %v6268_v14, %v2662_v45 }
 0x1c4   : > { %v2049_v47 = vpop.f32.mrf.mxu2  ;;  %v2406_v53 = vpop.f32.mrf.mxu3  ;;  %3097 = vmatpush.bf16.msrb.mxu3 %v4793_v40 }
 0x1c5   : > { %v2108_v16 = vadd.f32 %v2049_v47, %v1855_v49  ;;  %v1799_v12 = vpop.f32.mrf.mxu1  ;;  %v2607_v28 = vpop.f32.mrf.mxu0  ;;  %v2714_v29 = vmax.f32 %v2690_v51, 0.0  ;;  %v5170_v49 = vld [vmem:[#allocation6 + $0xc] sm:$0xf]  ;;  %v4794_v47 = vld [vmem:[#allocation6 + $0x18] sm:$0xf0] }
 0x1c6   : > { %v1856_v4 = vadd.f32 %v1799_v12, %v6078_v41  ;;  %v4797_v41 = vor.u32 %v5170_v49, %v4794_v47  ;;  %v1723_v49 = vrot.slane %v6087_v58, 1  ;;  %v5208_v58 = vld [vmem:[%s6977_s5 + $0x38] sm:$0xff] }
 0x1c7   : > { %v2465_v2 = vadd.f32 %v2406_v53, %v2108_v16  ;;  %v5467_v16 = vld [vmem:[%s5825_s29 + $0x64] sm:$0xff] }
 0x1c8   : > { %1838 = vmatmul.bf16.gmra.mxu1 %v1720_v13  ;;  %2646 = vmatmul.bf16.gmra.mxu0 %v2528_v20  ;;  %v1721_v12 = vrot.slane %v5467_v16, 1  ;;  %v2529_v13 = vrot.slane %v6280_v44, 1  ;;  %v2325_v20 = vrot.slane %v2323_v32, 1 }
 0x1c9   : > { %v2663_v37 = vadd.f32 %v2604_v5, %v2465_v2  ;;  %2091 = vmatmul.bf16.gmra.mxu2 %v5131_v59  ;;  %2448 = vmatmul.bf16.gmra.mxu3 %v2318_v30  ;;  %v5171_v5 = vld [vmem:[#allocation6 + $0xc] sm:$0xf0]  ;;  %v2321_v59 = vor.u32 %v2319_v43, %v2317_v54  ;;  %v2327_v43 = vshrl.u32 %v6280_v44, 16 }
 0x1ca   : > { %v4785_v46 = vor.u32 %v5171_v5, %v4784_v60  ;;  %3166 = vmatpush.bf16.msrb.mxu0 %v4797_v41  ;;  %v1722_v51 = vsel %vm891_vm1, %v1719_v56, %v1721_v12  ;;  %v5216_v5 = vld [vmem:[%s6977_s5 + $0x78] sm:$0xff] }
 0x1cb   : > { %v2691_v34 = vadd.f32 %v6268_v14, %v2663_v37  ;;  %v5132_v37 = vld [vmem:[%s5825_s29 + $0x68] sm:$0xff]  ;;  %v2326_v54 = vsel %vm512_vm0, %v2321_v59, %v2325_v20  ;;  %3701 = vmatpush.bf16.msra.mxu2 %v5216_v5  ;;  %v2329_v41 = vor.u32 %v2327_v43, %v2325_v20  ;;  %v5232_v20 = vld [vmem:[%s6977_s5 + $0xf8] sm:$0xff]  ;;  %v5223_v5 = vld [vmem:[%s6977_s5 + $0xb0] sm:$0xff] }
 0x1cc   : > { %v2052_v52 = vpop.f32.mrf.mxu2  ;;  %v2409_v26 = vpop.f32.mrf.mxu3  ;;  %2959 = vmatpush.bf16.msrb.mxu1 %v4785_v46 }
 0x1cd   : > { %v2715_v36 = vmax.f32 %v2691_v34, 0.0  ;;  %v2109_v1 = vadd.f32 %v2052_v52, %v1856_v4  ;;  %v1801_v6 = vpop.f32.mrf.mxu1  ;;  %v2609_v18 = vpop.f32.mrf.mxu0  ;;  %v2530_v34 = vsel %vm891_vm1, %v2527_v33, %v2529_v13  ;;  %v2221_v4 = vunpack.c.l.b16 %v2155_v7 }
 0x1ce   : > { %v1857_v57 = vadd.f32 %v1801_v6, %v6089_v62  ;;  %3839 = vmatpush.bf16.msra.mxu0 %v5232_v20 }
 0x1cf   : > { %v6286_v53 = vpack.c.bf16 %v2715_v36, %v2714_v29  ;;  %v2466_v45 = vadd.f32 %v2409_v26, %v2109_v1  ;;  %v2234_v26 = vpack.c.b16 %v2221_v4, %v2221_v4 }
 0x1d0   : > { %3632 = vmatpush.bf16.msra.mxu1 %v5208_v58 }
 0x1d1   : > { %v2664_v11 = vadd.f32 %v2607_v28, %v2466_v45  ;;  %v2331_v32 = vshll.u32 %v2234_v26, 16  ;;  %v2531_v47 = vrot.slane %v2234_v26, 1 }
 0x1d3   : > { %v2692_v28 = vadd.f32 %v6268_v14, %v2664_v11  ;;  %v2333_v45 = vrot.slane %v2331_v32, 1  ;;  %v1724_v11 = vsel %vm891_vm1, %v1721_v12, %v1723_v49 }
 0x1d4   : > { %v2054_v30 = vpop.f32.mrf.mxu2  ;;  %v2411_v23 = vpop.f32.mrf.mxu3 }
 0x1d5   : > { %v2110_v38 = vadd.f32 %v2054_v30, %v1857_v57  ;;  %v1804_v2 = vpop.f32.mrf.mxu1  ;;  %v2612_v40 = vpop.f32.mrf.mxu0  ;;  %v2716_v36 = vmax.f32 %v2692_v28, 0.0 }
 0x1d6   : > { %v1858_v56 = vadd.f32 %v1804_v2, %v6093_v19  ;;  %v2532_v2 = vsel %vm891_vm1, %v2529_v13, %v2531_v47 }
 0x1d7   : > { %v2467_v62 = vadd.f32 %v2411_v23, %v2110_v38  ;;  %v5133_v38 = vld [vmem:[%s5825_s29 + $0x70] sm:$0xff] }
 0x1d8   : > { %1843 = vmatmul.bf16.gmra.mxu1 %v1722_v51  ;;  %2651 = vmatmul.bf16.gmra.mxu0 %v2530_v34 }
 0x1d9   : > { %v2665_v52 = vadd.f32 %v2609_v18, %v2467_v62  ;;  %2096 = vmatmul.bf16.gmra.mxu2 %v5132_v37  ;;  %2453 = vmatmul.bf16.gmra.mxu3 %v2326_v54  ;;  %v5224_v18 = vld [vmem:[%s6977_s5 + $0xb8] sm:$0xff] }
 0x1da   : > { %3770 = vmatpush.bf16.msra.mxu3 %v5224_v18 }
 0x1db   : > { %v2693_v3 = vadd.f32 %v6268_v14, %v2665_v52 }
 0x1dc   : > { %v2057_v29 = vpop.f32.mrf.mxu2  ;;  %v2414_v21 = vpop.f32.mrf.mxu3 }
 0x1dd   : > { %v2717_v33 = vmax.f32 %v2693_v3, 0.0  ;;  %v2111_v1 = vadd.f32 %v2057_v29, %v1858_v56  ;;  %v1806_v6 = vpop.f32.mrf.mxu1  ;;  %v2614_v60 = vpop.f32.mrf.mxu0 }
 0x1de   : > { %v1859_v16 = vadd.f32 %v1806_v6, %v6102_v39  ;;  %v2334_v39 = vsel %vm512_vm0, %v2329_v41, %v2333_v45  ;;  %3771 = vmatpush.bf16.msra.mxu3 %v5223_v5 }
 0x1df   : > { %v6310_v19 = vpack.c.bf16 %v2717_v33, %v2716_v36  ;;  %v2468_v46 = vadd.f32 %v2414_v21, %v2111_v1 }
 0x1e1   : > { %v2666_v7 = vadd.f32 %v2612_v40, %v2468_v46 }
 0x1e3   : > { %v2694_v12 = vadd.f32 %v6268_v14, %v2666_v7  ;;  %v5207_v7 = vld [vmem:[%s6977_s5 + $0x30] sm:$0xff] }
 0x1e4   : > { %v2059_v59 = vpop.f32.mrf.mxu2  ;;  %v2416_v57 = vpop.f32.mrf.mxu3  ;;  %3633 = vmatpush.bf16.msra.mxu1 %v5207_v7 }
 0x1e5   : > { %v2112_v30 = vadd.f32 %v2059_v59, %v1859_v16  ;;  %v1809_v23 = vpop.f32.mrf.mxu1  ;;  %v2617_v44 = vpop.f32.mrf.mxu0  ;;  %v2718_v4 = vmax.f32 %v2694_v12, 0.0 }
 0x1e6   : > { %v1860_v37 = vadd.f32 %v1809_v23, %v6114_v22  ;;  %v5215_v22 = vld [vmem:[%s6977_s5 + $0x70] sm:$0xff] }
 0x1e7   : > { %v2469_v51 = vadd.f32 %v2416_v57, %v2112_v30  ;;  %3702 = vmatpush.bf16.msra.mxu2 %v5215_v22  ;;  %v5231_v30 = vld [vmem:[%s6977_s5 + $0xf0] sm:$0xff]  ;;  %v5230_v22 = vld [vmem:[%s6977_s5 + $0xe8] sm:$0xff] }
 0x1e8   : > { %1848 = vmatmul.bf16.gmra.mxu1 %v1724_v11  ;;  %2656 = vmatmul.bf16.gmra.mxu0 %v2532_v2 }
 0x1e9   : > { %v2667_v40 = vadd.f32 %v2614_v60, %v2469_v51  ;;  %2101 = vmatmul.bf16.gmra.mxu2 %v5133_v38  ;;  %2458 = vmatmul.bf16.gmra.mxu3 %v2334_v39 }
 0x1ea   : > { %3840 = vmatpush.bf16.msra.mxu0 %v5231_v30 }
 0x1eb   : > { %v2695_v13 = vadd.f32 %v6268_v14, %v2667_v40 }
 0x1ec   : > { %v2062_v34 = vpop.f32.mrf.mxu2  ;;  %v2419_v54 = vpop.f32.mrf.mxu3 }
 0x1ed   : > { %v2719_v62 = vmax.f32 %v2695_v13, 0.0  ;;  %v2113_v28 = vadd.f32 %v2062_v34, %v1860_v37  ;;  %v1811_v52 = vpop.f32.mrf.mxu1  ;;  %v2619_v26 = vpop.f32.mrf.mxu0 }
 0x1ee   : > { %v1861_v29 = vadd.f32 %v1811_v52, %v6121_v17  ;;  %v5214_v52 = vld [vmem:[%s6977_s5 + $0x68] sm:$0xff]  ;;  %3841 = vmatpush.bf16.msra.mxu0 %v5230_v22 }
 0x1ef   : > { %v6327_v3 = vpack.c.bf16 %v2719_v62, %v2718_v4  ;;  %v2470_v56 = vadd.f32 %v2419_v54, %v2113_v28  ;;  %3703 = vmatpush.bf16.msra.mxu2 %v5214_v52 }
 0x1f1   : > { %v2668_v33 = vadd.f32 %v2617_v44, %v2470_v56 }
 0x1f3   : > { %v2696_v17 = vadd.f32 %v6268_v14, %v2668_v33 }
 0x1f4   : > { %v2064_v21 = vpop.f32.mrf.mxu2  ;;  %v2421_v36 = vpop.f32.mrf.mxu3 }
 0x1f5   : > { %v2114_v1 = vadd.f32 %v2064_v21, %v1861_v29  ;;  %v1814_v6 = vpop.f32.mrf.mxu1  ;;  %v2622_v60 = vpop.f32.mrf.mxu0  ;;  %v2720_v41 = vmax.f32 %v2696_v17, 0.0 }
 0x1f6   : > { %v1862_v46 = vadd.f32 %v1814_v6, %v6131_v61 }
 0x1f7   : > { %v2471_v18 = vadd.f32 %v2421_v36, %v2114_v1 }
 0x1f8   : > { %2960 = vmatmul.bf16.vlgmr.msrb.gmra.mxu1 %v6286_v53  ;;  %3167 = vmatmul.bf16.vlgmr.msrb.gmra.mxu0 %v6286_v53 }
 0x1f9   : > { %v2669_v43 = vadd.f32 %v2619_v26, %v2471_v18  ;;  %3029 = vmatmul.bf16.vlgmr.msrb.gmra.mxu2 %v6286_v53  ;;  %3098 = vmatmul.bf16.vlgmr.msrb.gmra.mxu3 %v6286_v53  ;;  %v5222_v26 = vld [vmem:[%s6977_s5 + $0xa8] sm:$0xff] }
 0x1fa   : > { %3772 = vmatpush.bf16.msra.mxu3 %v5222_v26 }
 0x1fb   : > { %v2697_v32 = vadd.f32 %v6268_v14, %v2669_v43 }
 0x1fc   : > { %v2067_v49 = vpop.f32.mrf.mxu2  ;;  %v2424_v47 = vpop.f32.mrf.mxu3 }
 0x1fd   : > { %v2721_v45 = vmax.f32 %v2697_v32, 0.0  ;;  %v2115_v16 = vadd.f32 %v2067_v49, %v1862_v46  ;;  %v1816_v59 = vpop.f32.mrf.mxu1  ;;  %v2624_v57 = vpop.f32.mrf.mxu0 }
 0x1fe   : > { %v1863_v23 = vadd.f32 %v1816_v59, %v6138_v42 }
 0x1ff   : > { %v6349_v53 = vpack.c.bf16 %v2721_v45, %v2720_v41  ;;  %v2472_v61 = vadd.f32 %v2424_v47, %v2115_v16 }
 0x201   : > { %v2670_v38 = vadd.f32 %v2622_v60, %v2472_v61  ;;  %v5206_v60 = vld [vmem:[%s6977_s5 + $0x28] sm:$0xff] }
 0x202   : > { %3634 = vmatpush.bf16.msra.mxu1 %v5206_v60 }
 0x203   : > { %v2698_v51 = vadd.f32 %v6268_v14, %v2670_v38  ;;  %v5221_v38 = vld [vmem:[%s6977_s5 + $0xa0] sm:$0xff] }
 0x204   : > { %v2069_v44 = vpop.f32.mrf.mxu2  ;;  %v2426_v11 = vpop.f32.mrf.mxu3  ;;  %3773 = vmatpush.bf16.msra.mxu3 %v5221_v38 }
 0x205   : > { %v2116_v2 = vadd.f32 %v2069_v44, %v1863_v23  ;;  %v1819_v58 = vpop.f32.mrf.mxu1  ;;  %v2627_v20 = vpop.f32.mrf.mxu0  ;;  %v2722_v34 = vmax.f32 %v2698_v51, 0.0 }
 0x206   : > { %v1864_v40 = vadd.f32 %v1819_v58, %v6148_v48 }
 0x207   : > { %v2473_v39 = vadd.f32 %v2426_v11, %v2116_v2 }
 0x208   : > { %2965 = vmatmul.bf16.gmra.mxu1 %v6310_v19  ;;  %3172 = vmatmul.bf16.gmra.mxu0 %v6310_v19 }
 0x209   : > { %v2671_v12 = vadd.f32 %v2624_v57, %v2473_v39  ;;  %3034 = vmatmul.bf16.gmra.mxu2 %v6310_v19  ;;  %3103 = vmatmul.bf16.gmra.mxu3 %v6310_v19 }
 0x20b   : > { %v2699_v42 = vadd.f32 %v6268_v14, %v2671_v12 }
 0x20c   : > { %v2072_v13 = vpop.f32.mrf.mxu2  ;;  %v2429_v37 = vpop.f32.mrf.mxu3 }
 0x20d   : > { %v2723_v54 = vmax.f32 %v2699_v42, 0.0  ;;  %v2117_v4 = vadd.f32 %v2072_v13, %v1864_v40  ;;  %v1821_v62 = vpop.f32.mrf.mxu1  ;;  %v2629_v28 = vpop.f32.mrf.mxu0 }
 0x20e   : > { %v1865_v56 = vadd.f32 %v1821_v62, %v6155_v35 }
 0x20f   : > { %v6365_v19 = vpack.c.bf16 %v2723_v54, %v2722_v34  ;;  %v2474_v48 = vadd.f32 %v2429_v37, %v2117_v4  ;;  %v5205_v54 = vld [vmem:[%s6977_s5 + $0x20] sm:$0xff] }
 0x210   : > { %v5229_v4 = vld [vmem:[%s6977_s5 + $0xe0] sm:$0xff]  ;;  %3635 = vmatpush.bf16.msra.mxu1 %v5205_v54  ;;  %v5219_v54 = vld [vmem:[%s6977_s5 + $0x90] sm:$0xff] }
 0x211   : > { %v2672_v36 = vadd.f32 %v2627_v20, %v2474_v48  ;;  %3842 = vmatpush.bf16.msra.mxu0 %v5229_v4 }
 0x213   : > { %v2700_v35 = vadd.f32 %v6268_v14, %v2672_v36 }
 0x214   : > { %v2074_v29 = vpop.f32.mrf.mxu2  ;;  %v2431_v21 = vpop.f32.mrf.mxu3 }
 0x215   : > { %v2118_v33 = vadd.f32 %v2074_v29, %v1865_v56  ;;  %v1824_v1 = vpop.f32.mrf.mxu1  ;;  %v2632_v6 = vpop.f32.mrf.mxu0  ;;  %v2724_v49 = vmax.f32 %v2700_v35, 0.0 }
 0x216   : > { %v1866_v43 = vadd.f32 %v1824_v1, %v6165_v9  ;;  %v5213_v9 = vld [vmem:[%s6977_s5 + $0x60] sm:$0xff] }
 0x217   : > { %v2475_v5 = vadd.f32 %v2431_v21, %v2118_v33  ;;  %3704 = vmatpush.bf16.msra.mxu2 %v5213_v9 }
 0x218   : > { %2970 = vmatmul.bf16.gmra.mxu1 %v6327_v3  ;;  %3177 = vmatmul.bf16.gmra.mxu0 %v6327_v3 }
 0x219   : > { %v2673_v18 = vadd.f32 %v2629_v28, %v2475_v5  ;;  %3039 = vmatmul.bf16.gmra.mxu2 %v6327_v3  ;;  %3108 = vmatmul.bf16.gmra.mxu3 %v6327_v3 }
 0x21b   : > { %v2701_v17 = vadd.f32 %v6268_v14, %v2673_v18 }
 0x21c   : > { %v2077_v32 = vpop.f32.mrf.mxu2  ;;  %v2434_v46 = vpop.f32.mrf.mxu3 }
 0x21d   : > { %v2725_v47 = vmax.f32 %v2701_v17, 0.0  ;;  %v2119_v41 = vadd.f32 %v2077_v32, %v1866_v43  ;;  %v1826_v45 = vpop.f32.mrf.mxu1  ;;  %v2634_v16 = vpop.f32.mrf.mxu0  ;;  %v5212_v43 = vld [vmem:[%s6977_s5 + $0x58] sm:$0xff] }
 0x21e   : > { %v1867_v7 = vadd.f32 %v1826_v45, %v6172_v10  ;;  %v5220_v32 = vld [vmem:[%s6977_s5 + $0x98] sm:$0xff]  ;;  %3705 = vmatpush.bf16.msra.mxu2 %v5212_v43 }
 0x21f   : > { %v6381_v59 = vpack.c.bf16 %v2725_v47, %v2724_v49  ;;  %v2476_v57 = vadd.f32 %v2434_v46, %v2119_v41  ;;  %3774 = vmatpush.bf16.msra.mxu3 %v5220_v32 }
 0x221   : > { %v2674_v23 = vadd.f32 %v2632_v6, %v2476_v57 }
 0x223   : > { %v2702_v10 = vadd.f32 %v6268_v14, %v2674_v23  ;;  %3775 = vmatpush.bf16.msra.mxu3 %v5219_v54 }
 0x224   : > { %v2079_v30 = vpop.f32.mrf.mxu2  ;;  %v2436_v61 = vpop.f32.mrf.mxu3 }
 0x225   : > { %v2120_v3 = vadd.f32 %v2079_v30, %v1867_v7  ;;  %v1829_v44 = vpop.f32.mrf.mxu1  ;;  %v2637_v11 = vpop.f32.mrf.mxu0  ;;  %v2726_v42 = vmax.f32 %v2702_v10, 0.0  ;;  %v5204_v7 = vld [vmem:[%s6977_s5 + $0x18] sm:$0xff] }
 0x226   : > { %v1868_v39 = vadd.f32 %v1829_v44, %v6182_v25  ;;  %v5228_v30 = vld [vmem:[%s6977_s5 + $0xd8] sm:$0xff]  ;;  %3636 = vmatpush.bf16.msra.mxu1 %v5204_v7 }
 0x227   : > { %v2477_v2 = vadd.f32 %v2436_v61, %v2120_v3  ;;  %3843 = vmatpush.bf16.msra.mxu0 %v5228_v30  ;;  %v5202_v30 = vld [vmem:[%s6977_s5 + $0x8] sm:$0xff] }
 0x228   : > { %2975 = vmatmul.bf16.gmra.mxu1 %v6349_v53  ;;  %3182 = vmatmul.bf16.gmra.mxu0 %v6349_v53 }
 0x229   : > { %v2675_v58 = vadd.f32 %v2634_v16, %v2477_v2  ;;  %3044 = vmatmul.bf16.gmra.mxu2 %v6349_v53  ;;  %3113 = vmatmul.bf16.gmra.mxu3 %v6349_v53 }
 0x22b   : > { %v2703_v20 = vadd.f32 %v6268_v14, %v2675_v58 }
 0x22c   : > { %v2082_v51 = vpop.f32.mrf.mxu2  ;;  %v2439_v12 = vpop.f32.mrf.mxu3 }
 0x22d   : > { %v2727_v40 = vmax.f32 %v2703_v20, 0.0  ;;  %v2121_v13 = vadd.f32 %v2082_v51, %v1868_v39  ;;  %v1831_v37 = vpop.f32.mrf.mxu1  ;;  %v2639_v34 = vpop.f32.mrf.mxu0 }
 0x22e   : > { %v1869_v62 = vadd.f32 %v1831_v37, %v6189_v31 }
 0x22f   : > { %v6403_v53 = vpack.c.bf16 %v2727_v40, %v2726_v42  ;;  %v2478_v25 = vadd.f32 %v2439_v12, %v2121_v13 }
 0x231   : > { %v2676_v26 = vadd.f32 %v2637_v11, %v2478_v25 }
 0x233   : > { %v2704_v36 = vadd.f32 %v6268_v14, %v2676_v26 }
 0x234   : > { %v2084_v28 = vpop.f32.mrf.mxu2  ;;  %v2441_v52 = vpop.f32.mrf.mxu3 }
 0x235   : > { %v2122_v48 = vadd.f32 %v2084_v28, %v1869_v62  ;;  %v1834_v56 = vpop.f32.mrf.mxu1  ;;  %v2642_v29 = vpop.f32.mrf.mxu0  ;;  %v2728_v22 = vmax.f32 %v2704_v36, 0.0 }
 0x236   : > { %v1870_v1 = vadd.f32 %v1834_v56, %v6199_v63 }
 0x237   : > { %v2479_v21 = vadd.f32 %v2441_v52, %v2122_v48 }
 0x238   : > { %2980 = vmatmul.bf16.gmra.mxu1 %v6365_v19  ;;  %3187 = vmatmul.bf16.gmra.mxu0 %v6365_v19 }
 0x239   : > { %v2677_v33 = vadd.f32 %v2639_v34, %v2479_v21  ;;  %3049 = vmatmul.bf16.gmra.mxu2 %v6365_v19  ;;  %3118 = vmatmul.bf16.gmra.mxu3 %v6365_v19 }
 0x23b   : > { %v2705_v31 = vadd.f32 %v6268_v14, %v2677_v33  ;;  %v5203_v33 = vld [vmem:[%s6977_s5 + $0x10] sm:$0xff] }
 0x23c   : > { %v2087_v6 = vpop.f32.mrf.mxu2  ;;  %v2444_v60 = vpop.f32.mrf.mxu3  ;;  %3637 = vmatpush.bf16.msra.mxu1 %v5203_v33 }
 0x23d   : > { %v2729_v5 = vmax.f32 %v2705_v31, 0.0  ;;  %v2123_v35 = vadd.f32 %v2087_v6, %v1870_v1  ;;  %v1836_v18 = vpop.f32.mrf.mxu1  ;;  %v2644_v17 = vpop.f32.mrf.mxu0  ;;  %v5227_v31 = vld [vmem:[%s6977_s5 + $0xd0] sm:$0xff] }
 0x23e   : > { %v1871_v46 = vadd.f32 %v1836_v18, %v6206_v55  ;;  %3844 = vmatpush.bf16.msra.mxu0 %v5227_v31 }
 0x23f   : > { %v6419_v19 = vpack.c.bf16 %v2729_v5, %v2728_v22  ;;  %v2480_v63 = vadd.f32 %v2444_v60, %v2123_v35 }
 0x240   : > { %3638 = vmatpush.bf16.msra.mxu1 %v5202_v30 }
 0x241   : > { %v2678_v41 = vadd.f32 %v2642_v29, %v2480_v63  ;;  %v5218_v63 = vld [vmem:[%s6977_s5 + $0x88] sm:$0xff] }
 0x242   : > { %3776 = vmatpush.bf16.msra.mxu3 %v5218_v63 }
 0x243   : > { %v2706_v55 = vadd.f32 %v6268_v14, %v2678_v41 }
 0x244   : > { %v2089_v49 = vpop.f32.mrf.mxu2  ;;  %v2446_v47 = vpop.f32.mrf.mxu3 }
 0x245   : > { %v2124_v45 = vadd.f32 %v2089_v49, %v1871_v46  ;;  %v1839_v16 = vpop.f32.mrf.mxu1  ;;  %v2647_v57 = vpop.f32.mrf.mxu0  ;;  %v2730_v38 = vmax.f32 %v2706_v55, 0.0  ;;  %v5226_v55 = vld [vmem:[%s6977_s5 + $0xc8] sm:$0xff] }
 0x246   : > { %v1872_v44 = vadd.f32 %v1839_v16, %v6216_v8  ;;  %v5211_v8 = vld [vmem:[%s6977_s5 + $0x50] sm:$0xff]  ;;  %3845 = vmatpush.bf16.msra.mxu0 %v5226_v55 }
 0x247   : > { %v2481_v61 = vadd.f32 %v2446_v47, %v2124_v45  ;;  %3706 = vmatpush.bf16.msra.mxu2 %v5211_v8  ;;  %v5217_v8 = vld [vmem:[%s6977_s5 + $0x80] sm:$0xff] }
 0x248   : > { %2985 = vmatmul.bf16.gmra.mxu1 %v6381_v59  ;;  %3192 = vmatmul.bf16.gmra.mxu0 %v6381_v59 }
 0x249   : > { %v2679_v23 = vadd.f32 %v2644_v17, %v2481_v61  ;;  %3054 = vmatmul.bf16.gmra.mxu2 %v6381_v59  ;;  %3123 = vmatmul.bf16.gmra.mxu3 %v6381_v59 }
 0x24a   : > { %3777 = vmatpush.bf16.msra.mxu3 %v5217_v8 }
 0x24b   : > { %v2707_v3 = vadd.f32 %v6268_v14, %v2679_v23 }
 0x24c   : > { %v2092_v11 = vpop.f32.mrf.mxu2  ;;  %v2449_v9 = vpop.f32.mrf.mxu3 }
 0x24d   : > { %v2731_v2 = vmax.f32 %v2707_v3, 0.0  ;;  %v2125_v10 = vadd.f32 %v2092_v11, %v1872_v44  ;;  %v1841_v58 = vpop.f32.mrf.mxu1  ;;  %v2649_v20 = vpop.f32.mrf.mxu0 }
 0x24e   : > { %v1873_v12 = vadd.f32 %v1841_v58, %v6223_v24 }
 0x24f   : > { %v6435_v39 = vpack.c.bf16 %v2731_v2, %v2730_v38  ;;  %v2482_v51 = vadd.f32 %v2449_v9, %v2125_v10 }
 0x251   : > { %v2680_v13 = vadd.f32 %v2647_v57, %v2482_v51 }
 0x253   : > { %v2708_v24 = vadd.f32 %v6268_v14, %v2680_v13 }
 0x254   : > { %v2094_v42 = vpop.f32.mrf.mxu2  ;;  %v2451_v40 = vpop.f32.mrf.mxu3 }
 0x255   : > { %v2126_v59 = vadd.f32 %v2094_v42, %v1873_v12  ;;  %v1844_v37 = vpop.f32.mrf.mxu1  ;;  %v2652_v34 = vpop.f32.mrf.mxu0  ;;  %v2732_v48 = vmax.f32 %v2708_v24, 0.0  ;;  %v5201_v24 = vld [vmem:[%s6977_s5] sm:$0xff] }
 0x256   : > { %v1874_v28 = vadd.f32 %v1844_v37, %v6233_v27  ;;  %3639 = vmatpush.bf16.msra.mxu1 %v5201_v24 }
 0x257   : > { %v2483_v4 = vadd.f32 %v2451_v40, %v2126_v59 }
 0x258   : > { %2990 = vmatmul.bf16.gmra.mxu1 %v6403_v53  ;;  %3197 = vmatmul.bf16.gmra.mxu0 %v6403_v53 }
 0x259   : > { %v2681_v25 = vadd.f32 %v2649_v20, %v2483_v4  ;;  %3059 = vmatmul.bf16.gmra.mxu2 %v6403_v53  ;;  %3128 = vmatmul.bf16.gmra.mxu3 %v6403_v53 }
 0x25b   : > { %v2709_v62 = vadd.f32 %v6268_v14, %v2681_v25  ;;  %v5225_v25 = vld [vmem:[%s6977_s5 + $0xc0] sm:$0xff] }
 0x25c   : > { %v2097_v52 = vpop.f32.mrf.mxu2  ;;  %v2454_v26 = vpop.f32.mrf.mxu3  ;;  %3846 = vmatpush.bf16.msra.mxu0 %v5225_v25 }
 0x25d   : > { %v2733_v56 = vmax.f32 %v2709_v62, 0.0  ;;  %v2127_v29 = vadd.f32 %v2097_v52, %v1874_v28  ;;  %v1846_v21 = vpop.f32.mrf.mxu1  ;;  %v2654_v36 = vpop.f32.mrf.mxu0 }
 0x25e   : > { %v1875_v1 = vadd.f32 %v1846_v21, %v6240_v0  ;;  %v5210_v0 = vld [vmem:[%s6977_s5 + $0x48] sm:$0xff] }
 0x25f   : > { %v6457_v53 = vpack.c.bf16 %v2733_v56, %v2732_v48  ;;  %v2484_v27 = vadd.f32 %v2454_v26, %v2127_v29  ;;  %3707 = vmatpush.bf16.msra.mxu2 %v5210_v0 }
 0x261   : > { %v2682_v22 = vadd.f32 %v2652_v34, %v2484_v27  ;;  %v5209_v34 = vld [vmem:[%s6977_s5 + $0x40] sm:$0xff] }
 0x263   : > { %v2710_v43 = vadd.f32 %v6268_v14, %v2682_v22  ;;  %3708 = vmatpush.bf16.msra.mxu2 %v5209_v34  ;;  %v2782_v22 = vld [vmem:[#allocation7] sm:$0xf] }
 0x264   : > { %v2099_v6 = vpop.f32.mrf.mxu2  ;;  %v2456_v60 = vpop.f32.mrf.mxu3 }
 0x265   : > { %v2128_v5 = vadd.f32 %v2099_v6, %v1875_v1  ;;  %v1849_v35 = vpop.f32.mrf.mxu1  ;;  %v2657_v18 = vpop.f32.mrf.mxu0  ;;  %v2734_v45 = vmax.f32 %v2710_v43, 0.0  ;;  %v6550_v43 = vperm.slane %v2782_v22, 1 }
 0x266   : > { %v1876_v49 = vadd.f32 %v1849_v35, %v6250_v50  ;;  %v6544_v35 = vperm.slane %v2782_v22, 3 }
 0x267   : > { %v2485_v17 = vadd.f32 %v2456_v60, %v2128_v5  ;;  %v6542_v5 = vperm.slane %v2782_v22, 0 }
 0x268   : > { %2995 = vmatmul.bf16.gmra.mxu1 %v6419_v19  ;;  %3202 = vmatmul.bf16.gmra.mxu0 %v6419_v19 }
 0x269   : > { %v2683_v32 = vadd.f32 %v2654_v36, %v2485_v17  ;;  %3064 = vmatmul.bf16.gmra.mxu2 %v6419_v19  ;;  %3133 = vmatmul.bf16.gmra.mxu3 %v6419_v19 }
 0x26b   : > { %v2711_v46 = vadd.f32 %v6268_v14, %v2683_v32  ;;  %v6552_v32 = vperm.slane %v2782_v22, 2 }
 0x26c   : > { %v2102_v47 = vpop.f32.mrf.mxu2  ;;  %v2459_v41 = vpop.f32.mrf.mxu3 }
 0x26d   : > { %v2735_v16 = vmax.f32 %v2711_v46, 0.0  ;;  %v2129_v57 = vadd.f32 %v2102_v47, %v1876_v49  ;;  %v1851_v19 = vpop.f32.mrf.mxu1  ;;  %v2659_v7 = vpop.f32.mrf.mxu0 }
 0x26e   : > { %v1877_v50 = vadd.f32 %v1851_v19, %v6257_v15 }
 0x26f   : > { %v2748_v61 = vpack.c.bf16 %v2735_v16, %v2734_v45  ;;  %v2486_v23 = vadd.f32 %v2459_v41, %v2129_v57 }
 0x271   : > { %v2684_v11 = vadd.f32 %v2657_v18, %v2486_v23 }
 0x273   : > { %v2712_v58 = vadd.f32 %v6268_v14, %v2684_v11 }
 0x274   : > { %v2104_v3 = vpop.f32.mrf.mxu2  ;;  %v2461_v44 = vpop.f32.mrf.mxu3 }
 0x275   : > { %v2130_v9 = vadd.f32 %v2104_v3, %v1877_v50  ;;  %v6480_v38 = vpop.f32.mrf.mxu1  ;;  %v6482_v2 = vpop.f32.mrf.mxu0  ;;  %v2736_v42 = vmax.f32 %v2712_v58, 0.0 }
 0x276   : > { %v2962_v45 = vadd.f32 %v6480_v38, %v6542_v5  ;;  %v3169_v16 = vadd.f32 %v6482_v2, %v6544_v35 }
 0x277   : > { %v2487_v10 = vadd.f32 %v2461_v44, %v2130_v9 }
 0x278   : > { %3000 = vmatmul.bf16.gmra.mxu1 %v6435_v39  ;;  %3207 = vmatmul.bf16.gmra.mxu0 %v6435_v39  ;;  %v3228_v23 = vmax.f32 %v2962_v45, 0.0  ;;  %v3231_v50 = vmax.f32 %v3169_v16, 0.0 }
 0x279   : > { %v2685_v20 = vadd.f32 %v2659_v7, %v2487_v10  ;;  %3069 = vmatmul.bf16.gmra.mxu2 %v6435_v39  ;;  %3138 = vmatmul.bf16.gmra.mxu3 %v6435_v39 }
 0x27b   : > { %v2713_v15 = vadd.f32 %v6268_v14, %v2685_v20 }
 0x27c   : > { %v3030_v51 = vpop.f32.mrf.mxu2  ;;  %v3099_v12 = vpop.f32.mrf.mxu3 }
 0x27d   : > { %v2737_v40 = vmax.f32 %v2713_v15, 0.0  ;;  %v2963_v13 = vpop.f32.mrf.mxu1  ;;  %v3170_v59 = vpop.f32.mrf.mxu0  ;;  %v3031_v57 = vadd.f32 %v3030_v51, %v6550_v43  ;;  %v3100_v19 = vadd.f32 %v3099_v12, %v6552_v32 }
 0x27e   : > { %v2964_v46 = vadd.f32 %v2963_v13, %v6542_v5  ;;  %v3171_v49 = vadd.f32 %v3170_v59, %v6544_v35 }
 0x27f   : > { %v2749_v37 = vpack.c.bf16 %v2737_v40, %v2736_v42  ;;  %v3229_v11 = vmax.f32 %v3031_v57, 0.0  ;;  %v3230_v9 = vmax.f32 %v3100_v19, 0.0 }
 0x280   : > { %v3232_v7 = vmax.f32 %v2964_v46, 0.0  ;;  %v3235_v30 = vmax.f32 %v3171_v49, 0.0 }
 0x282   : > { %v3324_v2 = vpack.c.bf16 %v3232_v7, %v3228_v23  ;;  %v3327_v58 = vpack.c.bf16 %v3235_v30, %v3231_v50 }
 0x284   : > { %v3032_v39 = vpop.f32.mrf.mxu2  ;;  %v3101_v54 = vpop.f32.mrf.mxu3 }
 0x285   : > { %v6496_v14 = vpop.f32.mrf.mxu1  ;;  %v6498_v4 = vpop.f32.mrf.mxu0  ;;  %v3033_v47 = vadd.f32 %v3032_v39, %v6550_v43  ;;  %v3102_v41 = vadd.f32 %v3101_v54, %v6552_v32 }
 0x286   : > { %v2967_v8 = vadd.f32 %v6496_v14, %v6542_v5  ;;  %v3174_v39 = vadd.f32 %v6498_v4, %v6544_v35 }
 0x287   : > { %v3234_v55 = vmax.f32 %v3102_v41, 0.0 }
 0x288   : > { %3005 = vmatmul.bf16.gmra.mxu1 %v6457_v53  ;;  %3212 = vmatmul.bf16.gmra.mxu0 %v6457_v53  ;;  %v3239_v46 = vmax.f32 %v3174_v39, 0.0 }
 0x289   : > { %3074 = vmatmul.bf16.gmra.mxu2 %v6457_v53  ;;  %3143 = vmatmul.bf16.gmra.mxu3 %v6457_v53  ;;  %v3326_v15 = vpack.c.bf16 %v3234_v55, %v3230_v9 }
 0x28c   : > { %v6510_v62 = vpop.f32.mrf.mxu2  ;;  %v6512_v28 = vpop.f32.mrf.mxu3 }
 0x28d   : > { %v6514_v52 = vpop.f32.mrf.mxu1  ;;  %v6516_v26 = vpop.f32.mrf.mxu0  ;;  %v3036_v54 = vadd.f32 %v6510_v62, %v6550_v43  ;;  %v3105_v24 = vadd.f32 %v6512_v28, %v6552_v32 }
 0x28e   : > { %v2969_v13 = vadd.f32 %v6514_v52, %v6542_v5  ;;  %v3176_v59 = vadd.f32 %v6516_v26, %v6544_v35 }
 0x28f   : > { %v3237_v14 = vmax.f32 %v3036_v54, 0.0 }
 0x290   : > { %v3240_v25 = vmax.f32 %v2969_v13, 0.0  ;;  %v3243_v52 = vmax.f32 %v3176_v59, 0.0 }
 0x292   : > { %v3331_v45 = vpack.c.bf16 %v3243_v52, %v3239_v46 }
 0x294   : > { %v6518_v48 = vpop.f32.mrf.mxu2  ;;  %v6520_v56 = vpop.f32.mrf.mxu3 }
 0x295   : > { %v6522_v29 = vpop.f32.mrf.mxu1  ;;  %v6524_v21 = vpop.f32.mrf.mxu0  ;;  %v3107_v34 = vadd.f32 %v6520_v56, %v6552_v32 }
 0x296   : > { %v3179_v9 = vadd.f32 %v6524_v21, %v6544_v35 }
 0x297   : > { %v3242_v22 = vmax.f32 %v3107_v34, 0.0 }
 0x298   : > { %3010 = vmatmul.bf16.gmra.mxu1 %v2748_v61  ;;  %3217 = vmatmul.bf16.gmra.mxu0 %v2748_v61  ;;  %v3247_v13 = vmax.f32 %v3179_v9, 0.0 }
 0x299   : > { %3079 = vmatmul.bf16.gmra.mxu2 %v2748_v61  ;;  %3148 = vmatmul.bf16.gmra.mxu3 %v2748_v61  ;;  %v3233_v61 = vmax.f32 %v3033_v47, 0.0  ;;  %v3238_v47 = vmax.f32 %v3105_v24, 0.0 }
 0x29b   : > { %v3325_v20 = vpack.c.bf16 %v3233_v61, %v3229_v11  ;;  %v3330_v28 = vpack.c.bf16 %v3242_v22, %v3238_v47  ;;  %v2972_v11 = vadd.f32 %v6522_v29, %v6542_v5 }
 0x29c   : > { %v6526_v36 = vpop.f32.mrf.mxu2  ;;  %v6528_v33 = vpop.f32.mrf.mxu3 }
 0x29d   : > { %v6530_v31 = vpop.f32.mrf.mxu1  ;;  %v6532_v53 = vpop.f32.mrf.mxu0 }
 0x29e   : > { %v2974_v61 = vadd.f32 %v6530_v31, %v6542_v5  ;;  %v3181_v55 = vadd.f32 %v6532_v53, %v6544_v35  ;;  %v3110_v31 = vadd.f32 %v6528_v33, %v6552_v32 }
 0x2a0   : > { %v3251_v53 = vmax.f32 %v3181_v55, 0.0 }
 0x2a4   : > { %v6534_v27 = vpop.f32.mrf.mxu2  ;;  %v6536_v1 = vpop.f32.mrf.mxu3 }
 0x2a5   : > { %v6538_v6 = vpop.f32.mrf.mxu1  ;;  %v6540_v60 = vpop.f32.mrf.mxu0  ;;  %v3043_v23 = vadd.f32 %v6534_v27, %v6550_v43  ;;  %v3112_v50 = vadd.f32 %v6536_v1, %v6552_v32  ;;  %v3244_v27 = vmax.f32 %v2972_v11, 0.0 }
 0x2a6   : > { %v3184_v47 = vadd.f32 %v6540_v60, %v6544_v35 }
 0x2a8   : > { %3015 = vmatmul.bf16.gmra.mxu1 %v2749_v37  ;;  %3222 = vmatmul.bf16.gmra.mxu0 %v2749_v37 }
 0x2a9   : > { %3084 = vmatmul.bf16.gmra.mxu2 %v2749_v37  ;;  %3153 = vmatmul.bf16.gmra.mxu3 %v2749_v37  ;;  %v3038_v37 = vadd.f32 %v6518_v48, %v6550_v43  ;;  %v3236_v48 = vmax.f32 %v2967_v8, 0.0  ;;  %v3335_v8 = vpack.c.bf16 %v3251_v53, %v3247_v13 }
 0x2ab   : > { %v3241_v26 = vmax.f32 %v3038_v37, 0.0  ;;  %v3328_v62 = vpack.c.bf16 %v3240_v25, %v3236_v48  ;;  %v3246_v37 = vmax.f32 %v3110_v31, 0.0 }
 0x2ac   : > { %v6546_v18 = vpop.f32.mrf.mxu2  ;;  %v6548_v17 = vpop.f32.mrf.mxu3 }
 0x2ad   : > { %v6554_v0 = vpop.f32.mrf.mxu1  ;;  %v6556_v63 = vpop.f32.mrf.mxu0  ;;  %v3329_v16 = vpack.c.bf16 %v3241_v26, %v3237_v14  ;;  %v2977_v14 = vadd.f32 %v6538_v6, %v6542_v5 }
 0x2ae   : > { %v2979_v26 = vadd.f32 %v6554_v0, %v6542_v5  ;;  %v3186_v22 = vadd.f32 %v6556_v63, %v6544_v35  ;;  %v3115_v0 = vadd.f32 %v6548_v17, %v6552_v32 }
 0x2b0   : > { %v3259_v63 = vmax.f32 %v3186_v22, 0.0 }
 0x2b4   : > { %v6568_v3 = vpop.f32.mrf.mxu2  ;;  %v6570_v44 = vpop.f32.mrf.mxu3 }
 0x2b5   : > { %v6572_v38 = vpop.f32.mrf.mxu1  ;;  %v6574_v10 = vpop.f32.mrf.mxu0  ;;  %v3048_v48 = vadd.f32 %v6568_v3, %v6550_v43  ;;  %v3117_v46 = vadd.f32 %v6570_v44, %v6552_v32  ;;  %v3252_v3 = vmax.f32 %v2977_v14, 0.0 }
 0x2b8   : > { %3640 = vmatmul.bf16.vlgmr.msra.gmra.mxu1 %v3324_v2  ;;  %3847 = vmatmul.bf16.vlgmr.msra.gmra.mxu0 %v3327_v58  ;;  %v3041_v2 = vadd.f32 %v6526_v36, %v6550_v43  ;;  %v3248_v58 = vmax.f32 %v2974_v61, 0.0  ;;  %v3255_v61 = vmax.f32 %v3184_v47, 0.0 }
 0x2b9   : > { %3709 = vmatmul.bf16.vlgmr.msra.gmra.mxu2 %v3325_v20  ;;  %3778 = vmatmul.bf16.vlgmr.msra.gmra.mxu3 %v3326_v15  ;;  %v3249_v20 = vmax.f32 %v3043_v23, 0.0  ;;  %v3250_v15 = vmax.f32 %v3112_v50, 0.0  ;;  %v3254_v23 = vmax.f32 %v3115_v0, 0.0 }
 0x2ba   : > { %v3245_v29 = vmax.f32 %v3041_v2, 0.0  ;;  %v3332_v36 = vpack.c.bf16 %v3248_v58, %v3244_v27  ;;  %v3339_v11 = vpack.c.bf16 %v3259_v63, %v3255_v61 }
 0x2bb   : > { %v3334_v33 = vpack.c.bf16 %v3250_v15, %v3246_v37  ;;  %v3189_v37 = vadd.f32 %v6574_v10, %v6544_v35 }
 0x2bc   : > { %v6576_v51 = vpop.f32.mrf.mxu2  ;;  %v6578_v12 = vpop.f32.mrf.mxu3  ;;  %v3333_v39 = vpack.c.bf16 %v3249_v20, %v3245_v29  ;;  %v2982_v29 = vadd.f32 %v6572_v38, %v6542_v5 }
 0x2bd   : > { %v6580_v42 = vpop.f32.mrf.mxu1  ;;  %v6582_v40 = vpop.f32.mrf.mxu0 }
 0x2be   : > { %v2984_v20 = vadd.f32 %v6580_v42, %v6542_v5  ;;  %v3191_v15 = vadd.f32 %v6582_v40, %v6544_v35  ;;  %v3120_v42 = vadd.f32 %v6578_v12, %v6552_v32 }
 0x2c0   : > { %v3267_v40 = vmax.f32 %v3191_v15, 0.0 }
 0x2c4   : > { %v6600_v49 = vpop.f32.mrf.mxu2  ;;  %v6602_v56 = vpop.f32.mrf.mxu3 }
 0x2c5   : > { %v6604_v41 = vpop.f32.mrf.mxu1  ;;  %v6606_v4 = vpop.f32.mrf.mxu0  ;;  %v3053_v27 = vadd.f32 %v6600_v49, %v6550_v43  ;;  %v3122_v13 = vadd.f32 %v6602_v56, %v6552_v32  ;;  %v3260_v49 = vmax.f32 %v2982_v29, 0.0 }
 0x2c8   : > { %3645 = vmatmul.bf16.gmra.mxu1 %v3328_v62  ;;  %3852 = vmatmul.bf16.gmra.mxu0 %v3331_v45  ;;  %v3046_v62 = vadd.f32 %v6546_v18, %v6550_v43  ;;  %v3256_v45 = vmax.f32 %v2979_v26, 0.0  ;;  %v3263_v26 = vmax.f32 %v3189_v37, 0.0 }
 0x2c9   : > { %3714 = vmatmul.bf16.gmra.mxu2 %v3329_v16  ;;  %3783 = vmatmul.bf16.gmra.mxu3 %v3330_v28  ;;  %v3257_v16 = vmax.f32 %v3048_v48, 0.0  ;;  %v3258_v28 = vmax.f32 %v3117_v46, 0.0  ;;  %v3262_v48 = vmax.f32 %v3120_v42, 0.0 }
 0x2ca   : > { %v3253_v6 = vmax.f32 %v3046_v62, 0.0  ;;  %v3336_v18 = vpack.c.bf16 %v3256_v45, %v3252_v3  ;;  %v3343_v14 = vpack.c.bf16 %v3267_v40, %v3263_v26 }
 0x2cb   : > { %v3338_v17 = vpack.c.bf16 %v3258_v28, %v3254_v23  ;;  %v3194_v23 = vadd.f32 %v6606_v4, %v6544_v35 }
 0x2cc   : > { %v6608_v57 = vpop.f32.mrf.mxu2  ;;  %v6610_v19 = vpop.f32.mrf.mxu3  ;;  %v3337_v9 = vpack.c.bf16 %v3257_v16, %v3253_v6  ;;  %v2987_v6 = vadd.f32 %v6604_v41, %v6542_v5 }
 0x2cd   : > { %v6612_v7 = vpop.f32.mrf.mxu1  ;;  %v6614_v30 = vpop.f32.mrf.mxu0 }
 0x2ce   : > { %v2989_v16 = vadd.f32 %v6612_v7, %v6542_v5  ;;  %v3196_v28 = vadd.f32 %v6614_v30, %v6544_v35  ;;  %v3125_v7 = vadd.f32 %v6610_v19, %v6552_v32 }
 0x2d0   : > { %v3275_v30 = vmax.f32 %v3196_v28, 0.0 }
 0x2d4   : > { %v6632_v59 = vpop.f32.mrf.mxu2  ;;  %v6634_v1 = vpop.f32.mrf.mxu3 }
 0x2d5   : > { %v6636_v34 = vpop.f32.mrf.mxu1  ;;  %v6638_v21 = vpop.f32.mrf.mxu0  ;;  %v3058_v3 = vadd.f32 %v6632_v59, %v6550_v43  ;;  %v3127_v61 = vadd.f32 %v6634_v1, %v6552_v32  ;;  %v3268_v59 = vmax.f32 %v2987_v6, 0.0 }
 0x2d8   : > { %3650 = vmatmul.bf16.gmra.mxu1 %v3332_v36  ;;  %3857 = vmatmul.bf16.gmra.mxu0 %v3335_v8  ;;  %v3051_v36 = vadd.f32 %v6576_v51, %v6550_v43  ;;  %v3264_v8 = vmax.f32 %v2984_v20, 0.0  ;;  %v3271_v20 = vmax.f32 %v3194_v23, 0.0 }
 0x2d9   : > { %3719 = vmatmul.bf16.gmra.mxu2 %v3333_v39  ;;  %3788 = vmatmul.bf16.gmra.mxu3 %v3334_v33  ;;  %v3265_v39 = vmax.f32 %v3053_v27, 0.0  ;;  %v3266_v33 = vmax.f32 %v3122_v13, 0.0  ;;  %v3270_v27 = vmax.f32 %v3125_v7, 0.0 }
 0x2da   : > { %v3261_v38 = vmax.f32 %v3051_v36, 0.0  ;;  %v3340_v51 = vpack.c.bf16 %v3264_v8, %v3260_v49  ;;  %v3347_v29 = vpack.c.bf16 %v3275_v30, %v3271_v20 }
 0x2db   : > { %v3342_v12 = vpack.c.bf16 %v3266_v33, %v3262_v48  ;;  %v3199_v48 = vadd.f32 %v6638_v21, %v6544_v35 }
 0x2dc   : > { %v6640_v54 = vpop.f32.mrf.mxu2  ;;  %v6642_v24 = vpop.f32.mrf.mxu3  ;;  %v3341_v47 = vpack.c.bf16 %v3265_v39, %v3261_v38  ;;  %v2992_v38 = vadd.f32 %v6636_v34, %v6542_v5 }
 0x2dd   : > { %v6644_v25 = vpop.f32.mrf.mxu1  ;;  %v6646_v52 = vpop.f32.mrf.mxu0 }
 0x2de   : > { %v2994_v39 = vadd.f32 %v6644_v25, %v6542_v5  ;;  %v3201_v33 = vadd.f32 %v6646_v52, %v6544_v35  ;;  %v3130_v25 = vadd.f32 %v6642_v24, %v6552_v32 }
 0x2e0   : > { %v3283_v52 = vmax.f32 %v3201_v33, 0.0 }
 0x2e4   : > { %v6664_v55 = vpop.f32.mrf.mxu2  ;;  %v6666_v44 = vpop.f32.mrf.mxu3 }
 0x2e5   : > { %v6668_v50 = vpop.f32.mrf.mxu1  ;;  %v6670_v60 = vpop.f32.mrf.mxu0  ;;  %v3063_v49 = vadd.f32 %v6664_v55, %v6550_v43  ;;  %v3132_v26 = vadd.f32 %v6666_v44, %v6552_v32  ;;  %v3276_v55 = vmax.f32 %v2992_v38, 0.0 }
 0x2e8   : > { %3655 = vmatmul.bf16.gmra.mxu1 %v3336_v18  ;;  %3862 = vmatmul.bf16.gmra.mxu0 %v3339_v11  ;;  %v3056_v18 = vadd.f32 %v6608_v57, %v6550_v43  ;;  %v3272_v11 = vmax.f32 %v2989_v16, 0.0  ;;  %v3279_v16 = vmax.f32 %v3199_v48, 0.0 }
 0x2e9   : > { %3724 = vmatmul.bf16.gmra.mxu2 %v3337_v9  ;;  %3793 = vmatmul.bf16.gmra.mxu3 %v3338_v17  ;;  %v3273_v9 = vmax.f32 %v3058_v3, 0.0  ;;  %v3274_v17 = vmax.f32 %v3127_v61, 0.0  ;;  %v3278_v3 = vmax.f32 %v3130_v25, 0.0 }
 0x2ea   : > { %v3269_v41 = vmax.f32 %v3056_v18, 0.0  ;;  %v3344_v57 = vpack.c.bf16 %v3272_v11, %v3268_v59  ;;  %v3351_v6 = vpack.c.bf16 %v3283_v52, %v3279_v16 }
 0x2eb   : > { %v3346_v19 = vpack.c.bf16 %v3274_v17, %v3270_v27  ;;  %v3204_v27 = vadd.f32 %v6670_v60, %v6544_v35 }
 0x2ec   : > { %v6672_v2 = vpop.f32.mrf.mxu2  ;;  %v6674_v31 = vpop.f32.mrf.mxu3  ;;  %v3345_v37 = vpack.c.bf16 %v3273_v9, %v3269_v41  ;;  %v2997_v41 = vadd.f32 %v6668_v50, %v6542_v5 }
 0x2ed   : > { %v6676_v58 = vpop.f32.mrf.mxu1  ;;  %v6678_v53 = vpop.f32.mrf.mxu0 }
 0x2ee   : > { %v2999_v9 = vadd.f32 %v6676_v58, %v6542_v5  ;;  %v3206_v17 = vadd.f32 %v6678_v53, %v6544_v35  ;;  %v3135_v58 = vadd.f32 %v6674_v31, %v6552_v32 }
 0x2f0   : > { %v3291_v53 = vmax.f32 %v3206_v17, 0.0 }
 0x2f4   : > { %v6696_v22 = vpop.f32.mrf.mxu2  ;;  %v6698_v56 = vpop.f32.mrf.mxu3 }
 0x2f5   : > { %v6700_v46 = vpop.f32.mrf.mxu1  ;;  %v6702_v10 = vpop.f32.mrf.mxu0  ;;  %v3068_v59 = vadd.f32 %v6696_v22, %v6550_v43  ;;  %v3137_v20 = vadd.f32 %v6698_v56, %v6552_v32  ;;  %v3284_v22 = vmax.f32 %v2997_v41, 0.0 }
 0x2f8   : > { %3660 = vmatmul.bf16.gmra.mxu1 %v3340_v51  ;;  %3867 = vmatmul.bf16.gmra.mxu0 %v3343_v14  ;;  %v3061_v51 = vadd.f32 %v6640_v54, %v6550_v43  ;;  %v3280_v14 = vmax.f32 %v2994_v39, 0.0  ;;  %v3287_v39 = vmax.f32 %v3204_v27, 0.0 }
 0x2f9   : > { %3729 = vmatmul.bf16.gmra.mxu2 %v3341_v47  ;;  %3798 = vmatmul.bf16.gmra.mxu3 %v3342_v12  ;;  %v3281_v47 = vmax.f32 %v3063_v49, 0.0  ;;  %v3282_v12 = vmax.f32 %v3132_v26, 0.0  ;;  %v3286_v49 = vmax.f32 %v3135_v58, 0.0 }
 0x2fa   : > { %v3277_v34 = vmax.f32 %v3061_v51, 0.0  ;;  %v3348_v54 = vpack.c.bf16 %v3280_v14, %v3276_v55  ;;  %v3355_v38 = vpack.c.bf16 %v3291_v53, %v3287_v39 }
 0x2fb   : > { %v3350_v24 = vpack.c.bf16 %v3282_v12, %v3278_v3  ;;  %v3209_v3 = vadd.f32 %v6702_v10, %v6544_v35 }
 0x2fc   : > { %v6704_v62 = vpop.f32.mrf.mxu2  ;;  %v6706_v0 = vpop.f32.mrf.mxu3  ;;  %v3349_v23 = vpack.c.bf16 %v3281_v47, %v3277_v34  ;;  %v3002_v34 = vadd.f32 %v6700_v46, %v6542_v5 }
 0x2fd   : > { %v6708_v45 = vpop.f32.mrf.mxu1  ;;  %v6710_v63 = vpop.f32.mrf.mxu0 }
 0x2fe   : > { %v3004_v47 = vadd.f32 %v6708_v45, %v6542_v5  ;;  %v3211_v12 = vadd.f32 %v6710_v63, %v6544_v35  ;;  %v3140_v45 = vadd.f32 %v6706_v0, %v6552_v32 }
 0x300   : > { %v3299_v63 = vmax.f32 %v3211_v12, 0.0 }
 0x304   : > { %v6728_v15 = vpop.f32.mrf.mxu2  ;;  %v6730_v1 = vpop.f32.mrf.mxu3 }
 0x305   : > { %v6732_v13 = vpop.f32.mrf.mxu1  ;;  %v6734_v4 = vpop.f32.mrf.mxu0  ;;  %v3073_v55 = vadd.f32 %v6728_v15, %v6550_v43  ;;  %v3142_v16 = vadd.f32 %v6730_v1, %v6552_v32  ;;  %v3292_v15 = vmax.f32 %v3002_v34, 0.0 }
 0x308   : > { %3665 = vmatmul.bf16.gmra.mxu1 %v3344_v57  ;;  %3872 = vmatmul.bf16.gmra.mxu0 %v3347_v29  ;;  %v3066_v57 = vadd.f32 %v6672_v2, %v6550_v43  ;;  %v3288_v29 = vmax.f32 %v2999_v9, 0.0  ;;  %v3295_v9 = vmax.f32 %v3209_v3, 0.0 }
 0x309   : > { %3734 = vmatmul.bf16.gmra.mxu2 %v3345_v37  ;;  %3803 = vmatmul.bf16.gmra.mxu3 %v3346_v19  ;;  %v3289_v37 = vmax.f32 %v3068_v59, 0.0  ;;  %v3290_v19 = vmax.f32 %v3137_v20, 0.0  ;;  %v3294_v59 = vmax.f32 %v3140_v45, 0.0 }
 0x30a   : > { %v3285_v50 = vmax.f32 %v3066_v57, 0.0  ;;  %v3352_v2 = vpack.c.bf16 %v3288_v29, %v3284_v22  ;;  %v3359_v27 = vpack.c.bf16 %v3299_v63, %v3295_v9 }
 0x30b   : > { %v3354_v31 = vpack.c.bf16 %v3290_v19, %v3286_v49 }
 0x30c   : > { %v6736_v36 = vpop.f32.mrf.mxu2  ;;  %v6738_v42 = vpop.f32.mrf.mxu3  ;;  %v3353_v48 = vpack.c.bf16 %v3289_v37, %v3285_v50 }
 0x30d   : > { %v6740_v8 = vpop.f32.mrf.mxu1  ;;  %v6742_v40 = vpop.f32.mrf.mxu0 }
 0x30e   : > { %v3009_v39 = vadd.f32 %v6740_v8, %v6542_v5  ;;  %v3216_v50 = vadd.f32 %v6742_v40, %v6544_v35  ;;  %v3145_v8 = vadd.f32 %v6738_v42, %v6552_v32 }
 0x310   : > { %v3304_v12 = vmax.f32 %v3009_v39, 0.0 }
 0x314   : > { %v6760_v28 = vpop.f32.mrf.mxu2  ;;  %v6762_v44 = vpop.f32.mrf.mxu3 }
 0x315   : > { %v6764_v61 = vpop.f32.mrf.mxu1  ;;  %v6766_v21 = vpop.f32.mrf.mxu0  ;;  %v3078_v49 = vadd.f32 %v6760_v28, %v6550_v43 }
 0x317   : > { %v3305_v28 = vmax.f32 %v3078_v49, 0.0 }
 0x318   : > { %3670 = vmatmul.bf16.gmra.mxu1 %v3348_v54  ;;  %3877 = vmatmul.bf16.gmra.mxu0 %v3351_v6  ;;  %v3071_v54 = vadd.f32 %v6704_v62, %v6550_v43  ;;  %v3296_v6 = vmax.f32 %v3004_v47, 0.0  ;;  %v6828_v62 = vld [vmem:[#allocation9] ss:$0 sm:$0xff]  ;;  %v3076_v47 = vadd.f32 %v6736_v36, %v6550_v43 }
 0x319   : > { %3739 = vmatmul.bf16.gmra.mxu2 %v3349_v23  ;;  %3808 = vmatmul.bf16.gmra.mxu3 %v3350_v24  ;;  %v3297_v23 = vmax.f32 %v3073_v55, 0.0  ;;  %v3298_v24 = vmax.f32 %v3142_v16, 0.0  ;;  %v3307_v55 = vmax.f32 %v3216_v50, 0.0 }
 0x31a   : > { %v3293_v46 = vmax.f32 %v3071_v54, 0.0  ;;  %v3356_v41 = vpack.c.bf16 %v3296_v6, %v3292_v15  ;;  %v3301_v6 = vmax.f32 %v3076_v47, 0.0 }
 0x31b   : > { %v3358_v0 = vpack.c.bf16 %v3298_v24, %v3294_v59 }
 0x31c   : > { %v6768_v18 = vpop.f32.mrf.mxu2  ;;  %v6770_v7 = vpop.f32.mrf.mxu3  ;;  %v3357_v57 = vpack.c.bf16 %v3297_v23, %v3293_v46  ;;  %v3361_v46 = vpack.c.bf16 %v3305_v28, %v3301_v6 }
 0x31d   : > { %v6772_v11 = vpop.f32.mrf.mxu1  ;;  %v6774_v30 = vpop.f32.mrf.mxu0 }
 0x324   : > { %v6792_v33 = vpop.f32.mrf.mxu2  ;;  %v6794_v56 = vpop.f32.mrf.mxu3 }
 0x325   : > { %v6796_v26 = vpop.f32.mrf.mxu1  ;;  %v6798_v60 = vpop.f32.mrf.mxu0  ;;  %v3083_v39 = vadd.f32 %v6792_v33, %v6550_v43  ;;  %v3152_v49 = vadd.f32 %v6794_v56, %v6552_v32 }
 0x327   : > { %v3314_v56 = vmax.f32 %v3152_v49, 0.0  ;;  %v3017_v49 = vadd.f32 %v6796_v26, %v6542_v5 }
 0x328   : > { %3675 = vmatmul.bf16.gmra.mxu1 %v3352_v2  ;;  %3882 = vmatmul.bf16.gmra.mxu0 %v3355_v38  ;;  %v3147_v2 = vadd.f32 %v6762_v44, %v6552_v32 }
 0x329   : > { %3744 = vmatmul.bf16.gmra.mxu2 %v3353_v48  ;;  %3813 = vmatmul.bf16.gmra.mxu3 %v3354_v31  ;;  %v3007_v48 = vadd.f32 %v6732_v13, %v6542_v5  ;;  %v3214_v31 = vadd.f32 %v6734_v4, %v6544_v35  ;;  %v3302_v4 = vmax.f32 %v3145_v8, 0.0  ;;  %v3313_v8 = vmax.f32 %v3083_v39, 0.0 }
 0x32a   : > { %v3306_v16 = vmax.f32 %v3147_v2, 0.0  ;;  %v3316_v26 = vmax.f32 %v3017_v49, 0.0 }
 0x32b   : > { %v3300_v3 = vmax.f32 %v3007_v48, 0.0  ;;  %v3303_v54 = vmax.f32 %v3214_v31, 0.0  ;;  %v3219_v48 = vadd.f32 %v6766_v21, %v6544_v35 }
 0x32c   : > { %v6800_v51 = vpop.f32.mrf.mxu2  ;;  %v6802_v25 = vpop.f32.mrf.mxu3  ;;  %v3362_v59 = vpack.c.bf16 %v3306_v16, %v3302_v4 }
 0x32d   : > { %v6804_v14 = vpop.f32.mrf.mxu1  ;;  %v6806_v52 = vpop.f32.mrf.mxu0  ;;  %v3360_v15 = vpack.c.bf16 %v3304_v12, %v3300_v3  ;;  %v3363_v42 = vpack.c.bf16 %v3307_v55, %v3303_v54  ;;  %v3311_v55 = vmax.f32 %v3219_v48, 0.0 }
 0x334   : > { %v6824_v17 = vpop.f32.mrf.mxu2  ;;  %v6826_v1 = vpop.f32.mrf.mxu3 }
 0x335   : > { %v3641_v20 = vpop.f32.mrf.mxu1  ;;  %v3848_v10 = vpop.f32.mrf.mxu0 }
 0x336   : > { %v3642_v58 = vadd.f32 %v6828_v62, %v3641_v20 }
 0x338   : > { %3680 = vmatmul.bf16.gmra.mxu1 %v3356_v41  ;;  %3887 = vmatmul.bf16.gmra.mxu0 %v3359_v27 }
 0x339   : > { %3749 = vmatmul.bf16.gmra.mxu2 %v3357_v57  ;;  %3818 = vmatmul.bf16.gmra.mxu3 %v3358_v0 }
 0x33c   : > { %v3710_v29 = vpop.f32.mrf.mxu2  ;;  %v3779_v53 = vpop.f32.mrf.mxu3 }
 0x33d   : > { %v3711_v37 = vadd.f32 %v3710_v29, %v3642_v58  ;;  %v3643_v19 = vpop.f32.mrf.mxu1  ;;  %v3850_v22 = vpop.f32.mrf.mxu0 }
 0x33e   : > { %v3644_v44 = vadd.f32 %v6828_v62, %v3643_v19  ;;  %v3014_v19 = vadd.f32 %v6772_v11, %v6542_v5  ;;  %v3081_v11 = vadd.f32 %v6768_v18, %v6550_v43 }
 0x33f   : > { %v3780_v38 = vadd.f32 %v3779_v53, %v3711_v37 }
 0x340   : > { %v3312_v31 = vmax.f32 %v3014_v19, 0.0  ;;  %v3309_v28 = vmax.f32 %v3081_v11, 0.0 }
 0x341   : > { %v3849_v40 = vadd.f32 %v3848_v10, %v3780_v38  ;;  %v3012_v38 = vadd.f32 %v6764_v61, %v6542_v5 }
 0x342   : > { %v3365_v4 = vpack.c.bf16 %v3313_v8, %v3309_v28 }
 0x343   : > { %v3908_v34 = vsub.f32 0.0, %v3849_v40  ;;  %v3308_v61 = vmax.f32 %v3012_v38, 0.0 }
 0x344   : > { %v3712_v13 = vpop.f32.mrf.mxu2  ;;  %v3781_v45 = vpop.f32.mrf.mxu3 }
 0x345   : > { %v3932_v63 = vmul.f32 1.442695, %v3908_v34  ;;  %v3713_v23 = vadd.f32 %v3712_v13, %v3644_v44  ;;  %v3646_v36 = vpop.f32.mrf.mxu1  ;;  %v3853_v24 = vpop.f32.mrf.mxu0  ;;  %v3364_v6 = vpack.c.bf16 %v3312_v31, %v3308_v61 }
 0x346   : > { %v3647_v41 = vadd.f32 %v6828_v62, %v3646_v36 }
 0x347   : > { %5371 = vpow2.f32 %v3932_v63  ;;  %v3782_v9 = vadd.f32 %v3781_v45, %v3713_v23 }
 0x348   : > { %3685 = vmatmul.bf16.gmra.mxu1 %v3360_v15  ;;  %3892 = vmatmul.bf16.gmra.mxu0 %v3363_v42 }
 0x349   : > { %v3851_v20 = vadd.f32 %v3850_v22, %v3782_v9  ;;  %3754 = vmatmul.bf16.gmra.mxu2 %v3361_v46  ;;  %3823 = vmatmul.bf16.gmra.mxu3 %v3362_v59  ;;  %v3221_v22 = vadd.f32 %v6774_v30, %v6544_v35  ;;  %v3150_v30 = vadd.f32 %v6770_v7, %v6552_v32 }
 0x34b   : > { %v3909_v10 = vsub.f32 0.0, %v3851_v20  ;;  %v3315_v47 = vmax.f32 %v3221_v22, 0.0  ;;  %v3310_v18 = vmax.f32 %v3150_v30, 0.0  ;;  %v3157_v22 = vadd.f32 %v6826_v1, %v6552_v32 }
 0x34c   : > { %v3715_v27 = vpop.f32.mrf.mxu2  ;;  %v3784_v57 = vpop.f32.mrf.mxu3 }
 0x34d   : > { %v5372_v0 = vpop.eup %5371  ;;  %v3934_v58 = vmul.f32 1.442695, %v3909_v10  ;;  %v3716_v29 = vadd.f32 %v3715_v27, %v3647_v41  ;;  %v3648_v53 = vpop.f32.mrf.mxu1  ;;  %v3367_v63 = vpack.c.bf16 %v3315_v47, %v3311_v55  ;;  %v3322_v30 = vmax.f32 %v3157_v22, 0.0 }
 0x34e   : > { %v3855_v37 = vpop.f32.mrf.mxu0  ;;  %v3980_v50 = vadd.f32 1.0, %v5372_v0  ;;  %v3649_v12 = vadd.f32 %v6828_v62, %v3648_v53  ;;  %v3226_v53 = vadd.f32 %v6806_v52, %v6544_v35  ;;  %v3086_v52 = vadd.f32 %v6800_v51, %v6550_v43 }
 0x34f   : > { %5373 = vpow2.f32 %v3934_v58  ;;  %v3785_v2 = vadd.f32 %v3784_v57, %v3716_v29  ;;  %v3019_v29 = vadd.f32 %v6804_v14, %v6542_v5  ;;  %v3224_v14 = vadd.f32 %v6798_v60, %v6544_v35 }
 0x350   : > { %5375 = vrcp.f32 %v3980_v50  ;;  %v3323_v1 = vmax.f32 %v3226_v53, 0.0  ;;  %v3317_v60 = vmax.f32 %v3086_v52, 0.0 }
 0x351   : > { %v3854_v33 = vadd.f32 %v3853_v24, %v3785_v2  ;;  %v3366_v24 = vpack.c.bf16 %v3314_v56, %v3310_v18  ;;  %v3320_v48 = vmax.f32 %v3019_v29, 0.0  ;;  %v3319_v35 = vmax.f32 %v3224_v14, 0.0 }
 0x353   : > { %v3910_v40 = vsub.f32 0.0, %v3854_v33  ;;  %v3368_v61 = vpack.c.bf16 %v3320_v48, %v3316_v26  ;;  %v3371_v28 = vpack.c.bf16 %v3323_v1, %v3319_v35 }
 0x354   : > { %v3717_v21 = vpop.f32.mrf.mxu2  ;;  %v3786_v16 = vpop.f32.mrf.mxu3 }
 0x355   : > { %v5374_v34 = vpop.eup %5373  ;;  %v3936_v44 = vmul.f32 1.442695, %v3910_v40  ;;  %v3718_v3 = vadd.f32 %v3717_v21, %v3649_v12  ;;  %v3651_v7 = vpop.f32.mrf.mxu1 }
 0x356   : > { %v3858_v54 = vpop.f32.mrf.mxu0  ;;  %v5376_v13 = vpop.eup %5375  ;;  %v3981_v45 = vadd.f32 1.0, %v5374_v34  ;;  %v3652_v46 = vadd.f32 %v6828_v62, %v3651_v7 }
 0x357   : > { %v4028_v23 = vmax.f32 %v5376_v13, 0.0  ;;  %5377 = vpow2.f32 %v3936_v44  ;;  %v3787_v36 = vadd.f32 %v3786_v16, %v3718_v3 }
 0x358   : > { %5379 = vrcp.f32 %v3981_v45  ;;  %3690 = vmatmul.bf16.gmra.mxu1 %v3364_v6  ;;  %3897 = vmatmul.bf16.gmra.mxu0 %v3367_v63 }
 0x359   : > { %v4052_v15 = vmin.f32 %v4028_v23, 1.0  ;;  %v3856_v42 = vadd.f32 %v3855_v37, %v3787_v36  ;;  %3759 = vmatmul.bf16.gmra.mxu2 %v3365_v4  ;;  %3828 = vmatmul.bf16.gmra.mxu3 %v3366_v24  ;;  %v3088_v37 = vadd.f32 %v6824_v17, %v6550_v43  ;;  %v3155_v17 = vadd.f32 %v6802_v25, %v6552_v32 }
 0x35b   : > { %4077 = vst.msk [vmem:[%s6871_s30] sm:$0xff] %vm4076_vm2, %v4052_v15  ;;  %v3911_v9 = vsub.f32 0.0, %v3856_v42  ;;  %v3321_v11 = vmax.f32 %v3088_v37, 0.0  ;;  %v3318_v47 = vmax.f32 %v3155_v17, 0.0 }
 0x35c   : > { %v3720_v59 = vpop.f32.mrf.mxu2  ;;  %v3789_v20 = vpop.f32.mrf.mxu3 }
 0x35d   : > { %v5378_v10 = vpop.eup %5377  ;;  %v3938_v41 = vmul.f32 1.442695, %v3911_v9  ;;  %v3721_v27 = vadd.f32 %v3720_v59, %v3652_v46  ;;  %v3653_v57 = vpop.f32.mrf.mxu1  ;;  %v3369_v55 = vpack.c.bf16 %v3321_v11, %v3317_v60  ;;  %v3370_v34 = vpack.c.bf16 %v3322_v30, %v3318_v47 }
 0x35e   : > { %v3860_v0 = vpop.f32.mrf.mxu0  ;;  %v5380_v58 = vpop.eup %5379  ;;  %v3982_v19 = vadd.f32 1.0, %v5378_v10  ;;  %v3654_v5 = vadd.f32 %v6828_v62, %v3653_v57 }
 0x35f   : > { %v4029_v39 = vmax.f32 %v5380_v58, 0.0  ;;  %5381 = vpow2.f32 %v3938_v41  ;;  %v3790_v50 = vadd.f32 %v3789_v20, %v3721_v27 }
 0x360   : > { %5383 = vrcp.f32 %v3982_v19 }
 0x361   : > { %v4053_v2 = vmin.f32 %v4029_v39, 1.0  ;;  %v3859_v38 = vadd.f32 %v3858_v54, %v3790_v50 }
 0x363   : > { %4078 = vst.msk [vmem:[%s6871_s30 + $0x8] sm:$0xff] %vm4076_vm2, %v4053_v2  ;;  %v3912_v33 = vsub.f32 0.0, %v3859_v38 }
 0x364   : > { %v3722_v31 = vpop.f32.mrf.mxu2  ;;  %v3791_v43 = vpop.f32.mrf.mxu3 }
 0x365   : > { %v5382_v51 = vpop.eup %5381  ;;  %v3940_v8 = vmul.f32 1.442695, %v3912_v33  ;;  %v3723_v32 = vadd.f32 %v3722_v31, %v3654_v5  ;;  %v3656_v25 = vpop.f32.mrf.mxu1 }
 0x366   : > { %v3863_v56 = vpop.f32.mrf.mxu0  ;;  %v5384_v40 = vpop.eup %5383  ;;  %v3983_v12 = vadd.f32 1.0, %v5382_v51  ;;  %v3657_v7 = vadd.f32 %v6828_v62, %v3656_v25 }
 0x367   : > { %v4030_v21 = vmax.f32 %v5384_v40, 0.0  ;;  %5385 = vpow2.f32 %v3940_v8  ;;  %v3792_v16 = vadd.f32 %v3791_v43, %v3723_v32 }
 0x368   : > { %5387 = vrcp.f32 %v3983_v12  ;;  %3695 = vmatmul.bf16.gmra.mxu1 %v3368_v61  ;;  %3902 = vmatmul.bf16.gmra.mxu0 %v3371_v28 }
 0x369   : > { %v4054_v18 = vmin.f32 %v4030_v21, 1.0  ;;  %v3861_v44 = vadd.f32 %v3860_v0, %v3792_v16  ;;  %3764 = vmatmul.bf16.gmra.mxu2 %v3369_v55  ;;  %3833 = vmatmul.bf16.gmra.mxu3 %v3370_v34 }
 0x36b   : > { %4079 = vst.msk [vmem:[%s6871_s30 + $0x10] sm:$0xff] %vm4076_vm2, %v4054_v18  ;;  %v3913_v3 = vsub.f32 0.0, %v3861_v44 }
 0x36c   : > { %v3725_v54 = vpop.f32.mrf.mxu2  ;;  %v3794_v13 = vpop.f32.mrf.mxu3 }
 0x36d   : > { %v5386_v45 = vpop.eup %5385  ;;  %v3942_v6 = vmul.f32 1.442695, %v3913_v3  ;;  %v3726_v4 = vadd.f32 %v3725_v54, %v3657_v7  ;;  %v3658_v63 = vpop.f32.mrf.mxu1 }
 0x36e   : > { %v3865_v23 = vpop.f32.mrf.mxu0  ;;  %v5388_v36 = vpop.eup %5387  ;;  %v3984_v24 = vadd.f32 1.0, %v5386_v45  ;;  %v3659_v20 = vadd.f32 %v6828_v62, %v3658_v63 }
 0x36f   : > { %v4031_v15 = vmax.f32 %v5388_v36, 0.0  ;;  %5389 = vpow2.f32 %v3942_v6  ;;  %v3795_v42 = vadd.f32 %v3794_v13, %v3726_v4 }
 0x370   : > { %5391 = vrcp.f32 %v3984_v24 }
 0x371   : > { %v4055_v9 = vmin.f32 %v4031_v15, 1.0  ;;  %v3864_v46 = vadd.f32 %v3863_v56, %v3795_v42 }
 0x373   : > { %4080 = vst.msk [vmem:[%s6871_s30 + $0x18] sm:$0xff] %vm4076_vm2, %v4055_v9  ;;  %v3914_v59 = vsub.f32 0.0, %v3864_v46 }
 0x374   : > { %v3727_v10 = vpop.f32.mrf.mxu2  ;;  %v3796_v41 = vpop.f32.mrf.mxu3 }
 0x375   : > { %v5390_v27 = vpop.eup %5389  ;;  %v3944_v57 = vmul.f32 1.442695, %v3914_v59  ;;  %v3728_v0 = vadd.f32 %v3727_v10, %v3659_v20  ;;  %v3661_v58 = vpop.f32.mrf.mxu1 }
 0x376   : > { %v3868_v29 = vpop.f32.mrf.mxu0  ;;  %v5392_v53 = vpop.eup %5391  ;;  %v3985_v37 = vadd.f32 1.0, %v5390_v27  ;;  %v3662_v14 = vadd.f32 %v6828_v62, %v3661_v58 }
 0x377   : > { %v4032_v19 = vmax.f32 %v5392_v53, 0.0  ;;  %5393 = vpow2.f32 %v3944_v57  ;;  %v3797_v22 = vadd.f32 %v3796_v41, %v3728_v0 }
 0x378   : > { %5395 = vrcp.f32 %v3985_v37 }
 0x379   : > { %v4056_v39 = vmin.f32 %v4032_v19, 1.0  ;;  %v3866_v50 = vadd.f32 %v3865_v23, %v3797_v22 }
 0x37b   : > { %4081 = vst.msk [vmem:[%s6871_s30 + $0x20] sm:$0xff] %vm4076_vm2, %v4056_v39  ;;  %v3915_v49 = vsub.f32 0.0, %v3866_v50 }
 0x37c   : > { %v3730_v52 = vpop.f32.mrf.mxu2  ;;  %v3799_v17 = vpop.f32.mrf.mxu3 }
 0x37d   : > { %v5394_v2 = vpop.eup %5393  ;;  %v3946_v38 = vmul.f32 1.442695, %v3915_v49  ;;  %v3731_v48 = vadd.f32 %v3730_v52, %v3662_v14  ;;  %v3663_v1 = vpop.f32.mrf.mxu1 }
 0x37e   : > { %v3870_v11 = vpop.f32.mrf.mxu0  ;;  %v5396_v30 = vpop.eup %5395  ;;  %v3986_v33 = vadd.f32 1.0, %v5394_v2  ;;  %v3664_v43 = vadd.f32 %v6828_v62, %v3663_v1 }
 0x37f   : > { %v4033_v5 = vmax.f32 %v5396_v30, 0.0  ;;  %5397 = vpow2.f32 %v3946_v38  ;;  %v3800_v26 = vadd.f32 %v3799_v17, %v3731_v48 }
 0x380   : > { %5399 = vrcp.f32 %v3986_v33 }
 0x381   : > { %v4057_v35 = vmin.f32 %v4033_v5, 1.0  ;;  %v3869_v60 = vadd.f32 %v3868_v29, %v3800_v26 }
 0x383   : > { %4082 = vst.msk [vmem:[%s6871_s30 + $0x28] sm:$0xff] %vm4076_vm2, %v4057_v35  ;;  %v3916_v31 = vsub.f32 0.0, %v3869_v60 }
 0x384   : > { %v3732_v51 = vpop.f32.mrf.mxu2  ;;  %v3801_v47 = vpop.f32.mrf.mxu3 }
 0x385   : > { %v5398_v8 = vpop.eup %5397  ;;  %v3948_v32 = vmul.f32 1.442695, %v3916_v31  ;;  %v3733_v25 = vadd.f32 %v3732_v51, %v3664_v43  ;;  %v3666_v56 = vpop.f32.mrf.mxu1 }
 0x386   : > { %v3873_v40 = vpop.f32.mrf.mxu0  ;;  %v5400_v12 = vpop.eup %5399  ;;  %v3987_v61 = vadd.f32 1.0, %v5398_v8  ;;  %v3667_v18 = vadd.f32 %v6828_v62, %v3666_v56 }
 0x387   : > { %v4034_v55 = vmax.f32 %v5400_v12, 0.0  ;;  %5401 = vpow2.f32 %v3948_v32  ;;  %v3802_v28 = vadd.f32 %v3801_v47, %v3733_v25 }
 0x388   : > { %5403 = vrcp.f32 %v3987_v61 }
 0x389   : > { %v4058_v21 = vmin.f32 %v4034_v55, 1.0  ;;  %v3871_v16 = vadd.f32 %v3870_v11, %v3802_v28 }
 0x38b   : > { %4083 = vst.msk [vmem:[%s6871_s30 + $0x30] sm:$0xff] %vm4076_vm2, %v4058_v21  ;;  %v3917_v34 = vsub.f32 0.0, %v3871_v16 }
 0x38c   : > { %v3735_v44 = vpop.f32.mrf.mxu2  ;;  %v3804_v3 = vpop.f32.mrf.mxu3 }
 0x38d   : > { %v5402_v7 = vpop.eup %5401  ;;  %v3950_v54 = vmul.f32 1.442695, %v3917_v34  ;;  %v3736_v13 = vadd.f32 %v3735_v44, %v3667_v18  ;;  %v3668_v45 = vpop.f32.mrf.mxu1 }
 0x38e   : > { %v3875_v6 = vpop.f32.mrf.mxu0  ;;  %v5404_v4 = vpop.eup %5403  ;;  %v3988_v63 = vadd.f32 1.0, %v5402_v7  ;;  %v3669_v9 = vadd.f32 %v6828_v62, %v3668_v45 }
 0x38f   : > { %v4035_v23 = vmax.f32 %v5404_v4, 0.0  ;;  %5405 = vpow2.f32 %v3950_v54  ;;  %v3805_v36 = vadd.f32 %v3804_v3, %v3736_v13 }
 0x390   : > { %5407 = vrcp.f32 %v3988_v63 }
 0x391   : > { %v4059_v24 = vmin.f32 %v4035_v23, 1.0  ;;  %v3874_v15 = vadd.f32 %v3873_v40, %v3805_v36 }
 0x393   : > { %4084 = vst.msk [vmem:[%s6871_s30 + $0x38] sm:$0xff] %vm4076_vm2, %v4059_v24  ;;  %v3918_v42 = vsub.f32 0.0, %v3874_v15 }
 0x394   : > { %v3737_v46 = vpop.f32.mrf.mxu2  ;;  %v3806_v59 = vpop.f32.mrf.mxu3 }
 0x395   : > { %v5406_v20 = vpop.eup %5405  ;;  %v3952_v10 = vmul.f32 1.442695, %v3918_v42  ;;  %v3738_v41 = vadd.f32 %v3737_v46, %v3669_v9  ;;  %v3671_v27 = vpop.f32.mrf.mxu1 }
 0x396   : > { %v3878_v57 = vpop.f32.mrf.mxu0  ;;  %v5408_v0 = vpop.eup %5407  ;;  %v3989_v58 = vadd.f32 1.0, %v5406_v20  ;;  %v3672_v39 = vadd.f32 %v6828_v62, %v3671_v27 }
 0x397   : > { %v4036_v29 = vmax.f32 %v5408_v0, 0.0  ;;  %5409 = vpow2.f32 %v3952_v10  ;;  %v3807_v53 = vadd.f32 %v3806_v59, %v3738_v41 }
 0x398   : > { %5411 = vrcp.f32 %v3989_v58 }
 0x399   : > { %v4060_v37 = vmin.f32 %v4036_v29, 1.0  ;;  %v3876_v19 = vadd.f32 %v3875_v6, %v3807_v53 }
 0x39b   : > { %4085 = vst.msk [vmem:[%s6871_s30 + $0x40] sm:$0xff] %vm4076_vm2, %v4060_v37  ;;  %v3919_v22 = vsub.f32 0.0, %v3876_v19 }
 0x39c   : > { %v3740_v50 = vpop.f32.mrf.mxu2  ;;  %v3809_v49 = vpop.f32.mrf.mxu3 }
 0x39d   : > { %v5410_v14 = vpop.eup %5409  ;;  %v3954_v52 = vmul.f32 1.442695, %v3919_v22  ;;  %v3741_v17 = vadd.f32 %v3740_v50, %v3672_v39  ;;  %v3673_v2 = vpop.f32.mrf.mxu1 }
 0x39e   : > { %v3880_v38 = vpop.f32.mrf.mxu0  ;;  %v5412_v48 = vpop.eup %5411  ;;  %v3990_v1 = vadd.f32 1.0, %v5410_v14  ;;  %v3674_v35 = vadd.f32 %v6828_v62, %v3673_v2 }
 0x39f   : > { %v4037_v11 = vmax.f32 %v5412_v48, 0.0  ;;  %5413 = vpow2.f32 %v3954_v52  ;;  %v3810_v30 = vadd.f32 %v3809_v49, %v3741_v17 }
 0x3a0   : > { %5415 = vrcp.f32 %v3990_v1 }
 0x3a1   : > { %v4061_v33 = vmin.f32 %v4037_v11, 1.0  ;;  %v3879_v5 = vadd.f32 %v3878_v57, %v3810_v30 }
 0x3a3   : > { %4086 = vst.msk [vmem:[%s6871_s30 + $0x48] sm:$0xff] %vm4076_vm2, %v4061_v33  ;;  %v3920_v26 = vsub.f32 0.0, %v3879_v5 }
 0x3a4   : > { %v3742_v60 = vpop.f32.mrf.mxu2  ;;  %v3811_v31 = vpop.f32.mrf.mxu3 }
 0x3a5   : > { %v5414_v43 = vpop.eup %5413  ;;  %v3956_v51 = vmul.f32 1.442695, %v3920_v26  ;;  %v3743_v47 = vadd.f32 %v3742_v60, %v3674_v35  ;;  %v3676_v8 = vpop.f32.mrf.mxu1 }
 0x3a6   : > { %v3883_v32 = vpop.f32.mrf.mxu0  ;;  %v5416_v25 = vpop.eup %5415  ;;  %v3991_v56 = vadd.f32 1.0, %v5414_v43  ;;  %v3677_v21 = vadd.f32 %v6828_v62, %v3676_v8 }
 0x3a7   : > { %v4038_v40 = vmax.f32 %v5416_v25, 0.0  ;;  %5417 = vpow2.f32 %v3956_v51  ;;  %v3812_v12 = vadd.f32 %v3811_v31, %v3743_v47 }
 0x3a8   : > { %5419 = vrcp.f32 %v3991_v56 }
 0x3a9   : > { %v4062_v61 = vmin.f32 %v4038_v40, 1.0  ;;  %v3881_v55 = vadd.f32 %v3880_v38, %v3812_v12 }
 0x3ab   : > { %4087 = vst.msk [vmem:[%s6871_s30 + $0x50] sm:$0xff] %vm4076_vm2, %v4062_v61  ;;  %v3921_v28 = vsub.f32 0.0, %v3881_v55 }
 0x3ac   : > { %v3745_v16 = vpop.f32.mrf.mxu2  ;;  %v3814_v34 = vpop.f32.mrf.mxu3 }
 0x3ad   : > { %v5418_v18 = vpop.eup %5417  ;;  %v3958_v44 = vmul.f32 1.442695, %v3921_v28  ;;  %v3746_v3 = vadd.f32 %v3745_v16, %v3677_v21  ;;  %v3678_v7 = vpop.f32.mrf.mxu1 }
 0x3ae   : > { %v3885_v54 = vpop.f32.mrf.mxu0  ;;  %v5420_v13 = vpop.eup %5419  ;;  %v3992_v45 = vadd.f32 1.0, %v5418_v18  ;;  %v3679_v24 = vadd.f32 %v6828_v62, %v3678_v7 }
 0x3af   : > { %v4039_v6 = vmax.f32 %v5420_v13, 0.0  ;;  %5421 = vpow2.f32 %v3958_v44  ;;  %v3815_v4 = vadd.f32 %v3814_v34, %v3746_v3 }
 0x3b0   : > { %5423 = vrcp.f32 %v3992_v45 }
 0x3b1   : > { %v4063_v63 = vmin.f32 %v4039_v6, 1.0  ;;  %v3884_v23 = vadd.f32 %v3883_v32, %v3815_v4 }
 0x3b3   : > { %4088 = vst.msk [vmem:[%s6871_s30 + $0x58] sm:$0xff] %vm4076_vm2, %v4063_v63  ;;  %v3922_v36 = vsub.f32 0.0, %v3884_v23 }
 0x3b4   : > { %v3747_v15 = vpop.f32.mrf.mxu2  ;;  %v3816_v42 = vpop.f32.mrf.mxu3 }
 0x3b5   : > { %v5422_v9 = vpop.eup %5421  ;;  %v3960_v46 = vmul.f32 1.442695, %v3922_v36  ;;  %v3748_v59 = vadd.f32 %v3747_v15, %v3679_v24  ;;  %v3681_v20 = vpop.f32.mrf.mxu1 }
 0x3b6   : > { %v3888_v10 = vpop.f32.mrf.mxu0  ;;  %v5424_v41 = vpop.eup %5423  ;;  %v3993_v27 = vadd.f32 1.0, %v5422_v9  ;;  %v3682_v37 = vadd.f32 %v6828_v62, %v3681_v20 }
 0x3b7   : > { %v4040_v57 = vmax.f32 %v5424_v41, 0.0  ;;  %5425 = vpow2.f32 %v3960_v46  ;;  %v3817_v0 = vadd.f32 %v3816_v42, %v3748_v59 }
 0x3b8   : > { %5427 = vrcp.f32 %v3993_v27 }
 0x3b9   : > { %v4064_v58 = vmin.f32 %v4040_v57, 1.0  ;;  %v3886_v29 = vadd.f32 %v3885_v54, %v3817_v0 }
 0x3bb   : > { %4089 = vst.msk [vmem:[%s6871_s30 + $0x60] sm:$0xff] %vm4076_vm2, %v4064_v58  ;;  %v3923_v53 = vsub.f32 0.0, %v3886_v29 }
 0x3bc   : > { %v3750_v19 = vpop.f32.mrf.mxu2  ;;  %v3819_v22 = vpop.f32.mrf.mxu3 }
 0x3bd   : > { %v5426_v39 = vpop.eup %5425  ;;  %v3962_v50 = vmul.f32 1.442695, %v3923_v53  ;;  %v3751_v49 = vadd.f32 %v3750_v19, %v3682_v37  ;;  %v3683_v14 = vpop.f32.mrf.mxu1 }
 0x3be   : > { %v3890_v52 = vpop.f32.mrf.mxu0  ;;  %v5428_v17 = vpop.eup %5427  ;;  %v3994_v2 = vadd.f32 1.0, %v5426_v39  ;;  %v3684_v33 = vadd.f32 %v6828_v62, %v3683_v14 }
 0x3bf   : > { %v4041_v38 = vmax.f32 %v5428_v17, 0.0  ;;  %5429 = vpow2.f32 %v3962_v50  ;;  %v3820_v48 = vadd.f32 %v3819_v22, %v3751_v49 }
 0x3c0   : > { %5431 = vrcp.f32 %v3994_v2 }
 0x3c1   : > { %v4065_v1 = vmin.f32 %v4041_v38, 1.0  ;;  %v3889_v11 = vadd.f32 %v3888_v10, %v3820_v48 }
 0x3c3   : > { %4090 = vst.msk [vmem:[%s6871_s30 + $0x68] sm:$0xff] %vm4076_vm2, %v4065_v1  ;;  %v3924_v30 = vsub.f32 0.0, %v3889_v11 }
 0x3c4   : > { %v3752_v5 = vpop.f32.mrf.mxu2  ;;  %v3821_v26 = vpop.f32.mrf.mxu3 }
 0x3c5   : > { %v5430_v35 = vpop.eup %5429  ;;  %v3964_v60 = vmul.f32 1.442695, %v3924_v30  ;;  %v3753_v31 = vadd.f32 %v3752_v5, %v3684_v33  ;;  %v3686_v43 = vpop.f32.mrf.mxu1 }
 0x3c6   : > { %v3893_v51 = vpop.f32.mrf.mxu0  ;;  %v5432_v47 = vpop.eup %5431  ;;  %v3995_v8 = vadd.f32 1.0, %v5430_v35  ;;  %v3687_v61 = vadd.f32 %v6828_v62, %v3686_v43 }
 0x3c7   : > { %v4042_v32 = vmax.f32 %v5432_v47, 0.0  ;;  %5433 = vpow2.f32 %v3964_v60  ;;  %v3822_v25 = vadd.f32 %v3821_v26, %v3753_v31 }
 0x3c8   : > { %5435 = vrcp.f32 %v3995_v8 }
 0x3c9   : > { %v4066_v56 = vmin.f32 %v4042_v32, 1.0  ;;  %v3891_v40 = vadd.f32 %v3890_v52, %v3822_v25 }
 0x3cb   : > { %4091 = vst.msk [vmem:[%s6871_s30 + $0x70] sm:$0xff] %vm4076_vm2, %v4066_v56  ;;  %v3925_v12 = vsub.f32 0.0, %v3891_v40 }
 0x3cc   : > { %v3755_v55 = vpop.f32.mrf.mxu2  ;;  %v3824_v28 = vpop.f32.mrf.mxu3 }
 0x3cd   : > { %v5434_v21 = vpop.eup %5433  ;;  %v3966_v16 = vmul.f32 1.442695, %v3925_v12  ;;  %v3756_v34 = vadd.f32 %v3755_v55, %v3687_v61  ;;  %v3688_v18 = vpop.f32.mrf.mxu1 }
 0x3ce   : > { %v5436_v44 = vpop.eup %5435  ;;  %v3996_v3 = vadd.f32 1.0, %v5434_v21  ;;  %v3895_v13 = vpop.f32.mrf.mxu0  ;;  %v3689_v63 = vadd.f32 %v6828_v62, %v3688_v18 }
 0x3cf   : > { %v4043_v7 = vmax.f32 %v5436_v44, 0.0  ;;  %5437 = vpow2.f32 %v3966_v16  ;;  %v3825_v54 = vadd.f32 %v3824_v28, %v3756_v34 }
 0x3d0   : > { %5439 = vrcp.f32 %v3996_v3 }
 0x3d1   : > { %v4067_v45 = vmin.f32 %v4043_v7, 1.0  ;;  %v3894_v6 = vadd.f32 %v3893_v51, %v3825_v54 }
 0x3d3   : > { %4092 = vst.msk [vmem:[%s6871_s30 + $0x78] sm:$0xff] %vm4076_vm2, %v4067_v45  ;;  %v3926_v4 = vsub.f32 0.0, %v3894_v6 }
 0x3d4   : > { %v3757_v23 = vpop.f32.mrf.mxu2  ;;  %v3826_v36 = vpop.f32.mrf.mxu3 }
 0x3d5   : > { %v5438_v24 = vpop.eup %5437  ;;  %v3968_v15 = vmul.f32 1.442695, %v3926_v4  ;;  %v3758_v42 = vadd.f32 %v3757_v23, %v3689_v63  ;;  %v3691_v9 = vpop.f32.mrf.mxu1 }
 0x3d6   : > { %v5440_v46 = vpop.eup %5439  ;;  %v3997_v59 = vadd.f32 1.0, %v5438_v24  ;;  %v3898_v57 = vpop.f32.mrf.mxu0  ;;  %v3692_v58 = vadd.f32 %v6828_v62, %v3691_v9 }
 0x3d7   : > { %v4044_v20 = vmax.f32 %v5440_v46, 0.0  ;;  %5441 = vpow2.f32 %v3968_v15  ;;  %v3827_v10 = vadd.f32 %v3826_v36, %v3758_v42 }
 0x3d8   : > { %5443 = vrcp.f32 %v3997_v59 }
 0x3d9   : > { %v4068_v41 = vmin.f32 %v4044_v20, 1.0  ;;  %v3896_v27 = vadd.f32 %v3895_v13, %v3827_v10 }
 0x3db   : > { %4093 = vst.msk [vmem:[%s6871_s30 + $0x80] sm:$0xff] %vm4076_vm2, %v4068_v41  ;;  %v3927_v0 = vsub.f32 0.0, %v3896_v27 }
 0x3dc   : > { %v3760_v29 = vpop.f32.mrf.mxu2  ;;  %v3829_v53 = vpop.f32.mrf.mxu3 }
 0x3dd   : > { %v5442_v37 = vpop.eup %5441  ;;  %v3970_v19 = vmul.f32 1.442695, %v3927_v0  ;;  %v3761_v22 = vadd.f32 %v3760_v29, %v3692_v58  ;;  %v3693_v39 = vpop.f32.mrf.mxu1 }
 0x3de   : > { %v5444_v50 = vpop.eup %5443  ;;  %v3998_v49 = vadd.f32 1.0, %v5442_v37  ;;  %v3694_v48 = vadd.f32 %v6828_v62, %v3693_v39  ;;  %v3900_v1 = vpop.f32.mrf.mxu0 }
 0x3df   : > { %v4045_v14 = vmax.f32 %v5444_v50, 0.0  ;;  %5445 = vpow2.f32 %v3970_v19  ;;  %v3830_v52 = vadd.f32 %v3829_v53, %v3761_v22 }
 0x3e0   : > { %5447 = vrcp.f32 %v3998_v49 }
 0x3e1   : > { %v4069_v17 = vmin.f32 %v4045_v14, 1.0  ;;  %v3899_v2 = vadd.f32 %v3898_v57, %v3830_v52 }
 0x3e3   : > { %4094 = vst.msk [vmem:[%s6871_s30 + $0x88] sm:$0xff] %vm4076_vm2, %v4069_v17  ;;  %v3928_v38 = vsub.f32 0.0, %v3899_v2 }
 0x3e4   : > { %v3762_v11 = vpop.f32.mrf.mxu2  ;;  %v3831_v30 = vpop.f32.mrf.mxu3 }
 0x3e5   : > { %v5446_v33 = vpop.eup %5445  ;;  %v3972_v5 = vmul.f32 1.442695, %v3928_v38  ;;  %v3763_v26 = vadd.f32 %v3762_v11, %v3694_v48  ;;  %v3696_v31 = vpop.f32.mrf.mxu1 }
 0x3e6   : > { %v5448_v35 = vpop.eup %5447  ;;  %v3999_v60 = vadd.f32 1.0, %v5446_v33  ;;  %v3697_v25 = vadd.f32 %v6828_v62, %v3696_v31  ;;  %v3903_v16 = vpop.f32.mrf.mxu0 }
 0x3e7   : > { %v4046_v43 = vmax.f32 %v5448_v35, 0.0  ;;  %5449 = vpow2.f32 %v3972_v5  ;;  %v3832_v51 = vadd.f32 %v3831_v30, %v3763_v26 }
 0x3e8   : > { %5451 = vrcp.f32 %v3999_v60 }
 0x3e9   : > { %v4070_v47 = vmin.f32 %v4046_v43, 1.0  ;;  %v3901_v8 = vadd.f32 %v3900_v1, %v3832_v51 }
 0x3eb   : > { %4095 = vst.msk [vmem:[%s6871_s30 + $0x90] sm:$0xff] %vm4076_vm2, %v4070_v47  ;;  %v3929_v32 = vsub.f32 0.0, %v3901_v8 }
 0x3ec   : > { %v3765_v56 = vpop.f32.mrf.mxu2  ;;  %v3834_v40 = vpop.f32.mrf.mxu3 }
 0x3ed   : > { %v5450_v12 = vpop.eup %5449  ;;  %v3974_v61 = vmul.f32 1.442695, %v3929_v32  ;;  %v3766_v55 = vadd.f32 %v3765_v56, %v3697_v25  ;;  %v3698_v44 = vpop.f32.mrf.mxu1 }
 0x3ee   : > { %v5452_v28 = vpop.eup %5451  ;;  %v4000_v21 = vadd.f32 1.0, %v5450_v12  ;;  %v3699_v13 = vadd.f32 %v6828_v62, %v3698_v44  ;;  %v3905_v9 = vpop.f32.mrf.mxu0 }
 0x3ef   : > { %v4047_v34 = vmax.f32 %v5452_v28, 0.0  ;;  %5453 = vpow2.f32 %v3974_v61  ;;  %v3835_v18 = vadd.f32 %v3834_v40, %v3766_v55 }
 0x3f0   : > { %5455 = vrcp.f32 %v4000_v21 }
 0x3f1   : > { %v4071_v3 = vmin.f32 %v4047_v34, 1.0  ;;  %v3904_v7 = vadd.f32 %v3903_v16, %v3835_v18 }
 0x3f3   : > { %4096 = vst.msk [vmem:[%s6871_s30 + $0x98] sm:$0xff] %vm4076_vm2, %v4071_v3  ;;  %v3930_v54 = vsub.f32 0.0, %v3904_v7 }
 0x3f4   : > { %v3767_v45 = vpop.f32.mrf.mxu2  ;;  %v3836_v24 = vpop.f32.mrf.mxu3 }
 0x3f5   : > { %v5454_v6 = vpop.eup %5453  ;;  %v3976_v4 = vmul.f32 1.442695, %v3930_v54  ;;  %v3768_v63 = vadd.f32 %v3767_v45, %v3699_v13 }
 0x3f6   : > { %v5456_v23 = vpop.eup %5455  ;;  %v4001_v36 = vadd.f32 1.0, %v5454_v6 }
 0x3f7   : > { %v4048_v15 = vmax.f32 %v5456_v23, 0.0  ;;  %5457 = vpow2.f32 %v3976_v4  ;;  %v3837_v42 = vadd.f32 %v3836_v24, %v3768_v63 }
 0x3f8   : > { %5459 = vrcp.f32 %v4001_v36 }
 0x3f9   : > { %v4072_v46 = vmin.f32 %v4048_v15, 1.0  ;;  %v3906_v59 = vadd.f32 %v3905_v9, %v3837_v42 }
 0x3fb   : > { %4097 = vst.msk [vmem:[%s6871_s30 + $0xa0] sm:$0xff] %vm4076_vm2, %v4072_v46  ;;  %v3931_v20 = vsub.f32 0.0, %v3906_v59 }
 0x3fd   : > { %v5458_v62 = vpop.eup %5457  ;;  %v3978_v10 = vmul.f32 1.442695, %v3931_v20 }
 0x3fe   : > { %v5460_v41 = vpop.eup %5459  ;;  %v4002_v27 = vadd.f32 1.0, %v5458_v62 }
 0x3ff   : > { %v4049_v57 = vmax.f32 %v5460_v41, 0.0  ;;  %5461 = vpow2.f32 %v3978_v10 }
 0x400   : > { %5463 = vrcp.f32 %v4002_v27 }
 0x401   : > { %v4073_v0 = vmin.f32 %v4049_v57, 1.0 }
 0x403   : > { %4098 = vst.msk [vmem:[%s6871_s30 + $0xa8] sm:$0xff] %vm4076_vm2, %v4073_v0 }
 0x405   : > { %v5462_v58 = vpop.eup %5461 }
 0x406   : > { %v5464_v29 = vpop.eup %5463  ;;  %v4003_v53 = vadd.f32 1.0, %v5462_v58 }
 0x407   : > { %v4050_v37 = vmax.f32 %v5464_v29, 0.0 }
 0x408   : > { %5465 = vrcp.f32 %v4003_v53 }
 0x409   : > { %v4074_v19 = vmin.f32 %v4050_v37, 1.0 }
 0x40b   : > { %4099 = vst.msk [vmem:[%s6871_s30 + $0xb0] sm:$0xff] %vm4076_vm2, %v4074_v19 }
 0x40e   : > { %v5466_v22 = vpop.eup %5465 }
 0x40f   : > { %v4051_v39 = vmax.f32 %v5466_v22, 0.0 }
 0x411   : > { %v4075_v50 = vmin.f32 %v4051_v39, 1.0 }
 0x413   : > { %4100 = vst.msk [vmem:[%s6871_s30 + $0xb8] sm:$0xff] %vm4076_vm2, %v4075_v50 }
 0x414 PF: > { %s20_s28 = sadd.s32 1, %s5671_s28   ;;  %s6989_s24 = smov %s5663_s26 }
 0x415   : > { %p17_p10 = scmp.ge.s32.totalorder %s20_s28, 6   ;;  %s6990_s25 = smov %s5667_s27 }
 0x416   : > { %s6991_s26 = smov %s6994_s20  ;;  %s6992_s27 = smov %s6998_s21 }
 0x417   :  { %19 = sbr.rel (!%p17_p10) target bundleno = 9 (0x9), region = 99 }
 0x41c   :  { %4130 = vsyncpa [#allocation3], 1 }
 0x41d   :  { %4132 = vsyncpa [#allocation3 + $0x1], 1 }
 0x41e   :  { %4133 = vsyncpa [#allocation5], 1 }
 0x41f   :  { %4134 = vsyncpa [#allocation8], 1 }

</bundles_post_ra>
